<compile_context>
chip_gen: v5e
topology: v5e:2x2
jax: 0.10.0
libtpu: 0.0.40
codegen_flags: <defaults>
</compile_context>

<pallas_src>
import jax
import jax.numpy as jnp
from jax.experimental import pallas as pl
from jax.experimental.pallas import tpu as pltpu


def _fe_kernel(x_ref, w_ref, b_ref, o_ref, xp_ref, col_ref):
    # x_ref  : (1, H, W, Cin)          unpadded NHWC input block for one image
    # w_ref  : (7, 7*Cin, 3*Cout)      stacked zero-padded 7x7 weights (ky-major)
    # b_ref  : (1, 3*Cout)             stacked bias
    # o_ref  : (1, 3*Cout, H*W)        lane-dense, flattened-NCHW output block
    # xp_ref : (H, W+6, Cin)           W-padded image (VMEM scratch)
    # col_ref: (rows, 7*Cin)           row-im2col, rows >= (H+6)*W (VMEM scratch)
    H, W, Cin = x_ref.shape[1], x_ref.shape[2], x_ref.shape[3]
    C3 = w_ref.shape[2]

    # In-kernel "same" padding along W: memset + interior store.
    xp_ref[...] = jnp.zeros_like(xp_ref)
    xp_ref[:, 3:3 + W, :] = x_ref[0]

    # Row-wise im2col.  col[(h+3)*W + w, kx*Cin + c] = xpad[h+3, w+kx, c];
    # rows [0, 3W) and [3W+H*W, (H+6)W) stay zero -> H-padding for free.
    col_ref[...] = jnp.zeros_like(col_ref)
    for kx in range(7):
        col_ref[3 * W:3 * W + H * W, kx * Cin:(kx + 1) * Cin] = (
            xp_ref[:, kx:kx + W, :].reshape(H * W, Cin))

    # Bias folded into the accumulator init (one broadcast, hoisted).
    acc = jnp.broadcast_to(b_ref[...], (H * W, C3)).astype(jnp.float32)

    # 7 fused matmuls: for each ky, a contiguous (H*W, 7*Cin) slice of col
    # against the (7*Cin, 3*Cout) weight slab for that ky.
    for ky in range(7):
        patch = col_ref[ky * W:ky * W + H * W, :]
        acc = acc + jnp.dot(patch, w_ref[ky], preferred_element_type=jnp.float32)

    # One small transpose -> lane-dense (3*Cout, H*W) slab, already NCHW order.
    o_ref[0] = acc.T.astype(o_ref.dtype)


def feature_extraction(x_nchw, w3, b3, w5, b5, w7, b7):
    """x_nchw: (N, Cin, H, W). Weights are HWIO. Returns (N, 3*Cout, H, W)."""
    N, Cin, H, W = x_nchw.shape
    Cout = w3.shape[-1]
    C3 = 3 * Cout
    KC = 7 * Cin

    x = jnp.transpose(x_nchw, (0, 2, 3, 1))  # -> NHWC (input boundary only)

    # Zero-pad the 3x3 / 5x5 kernels to 7x7 and stack along Cout.
    def pad7(w):
        p = (7 - w.shape[0]) // 2
        return jnp.pad(w, ((p, p), (p, p), (0, 0), (0, 0)))

    w_all = jnp.concatenate([pad7(w3), pad7(w5), pad7(w7)], axis=-1)  # (7,7,Cin,C3)
    w_all = w_all.reshape(7, KC, C3)                                  # ky-major slabs
    b_all = jnp.concatenate([b3, b5, b7]).reshape(1, C3)

    col_rows = -(-((H + 6) * W) // 8) * 8  # round up to sublane multiple

    out_flat = pl.pallas_call(
        _fe_kernel,
        out_shape=jax.ShapeDtypeStruct((N, C3, H * W), x.dtype),
        grid=(N,),
        in_specs=[
            pl.BlockSpec((1, H, W, Cin), lambda n: (n, 0, 0, 0)),
            pl.BlockSpec((7, KC, C3), lambda n: (0, 0, 0)),
            pl.BlockSpec((1, C3), lambda n: (0, 0)),
        ],
        out_specs=pl.BlockSpec((1, C3, H * W), lambda n: (n, 0, 0)),
        scratch_shapes=[
            pltpu.VMEM((H, W + 6, Cin), x.dtype),
            pltpu.VMEM((col_rows, KC), x.dtype),
        ],
        compiler_params=pltpu.CompilerParams(dimension_semantics=("parallel",)),
    )(x, w_all, b_all)

    # Already in (flattened) NCHW order: free reshape, no HBM transpose.
    return out_flat.reshape(N, C3, H, W)


def _reference(x_nchw, w3, b3, w5, b5, w7, b7):
    # Pure-JAX reference (lax conv) for correctness check.
    x = jnp.transpose(x_nchw, (0, 2, 3, 1))
    dn = jax.lax.conv_dimension_numbers(x.shape, w3.shape, ("NHWC", "HWIO", "NHWC"))

    def c(w, b):
        y = jax.lax.conv_general_dilated(x, w, (1, 1), "SAME", dimension_numbers=dn)
        return y + b[None, None, None, :]

    y = jnp.concatenate([c(w3, b3), c(w5, b5), c(w7, b7)], axis=-1)
    return jnp.transpose(y, (0, 3, 1, 2))


if __name__ == "__main__":
    key = jax.random.PRNGKey(0)
    N, Cin, H, W = 2, 4, 16, 16
    Cout = 8

    keys = jax.random.split(key, 7)
    x = jax.random.normal(keys[0], (N, Cin, H, W), jnp.float32)

    # deterministic parameter init (roughly matches nn.Conv2d uniform scale)
    def init_w(k, K):
        bound = 1.0 / (Cin * K * K) ** 0.5
        return jax.random.uniform(k, (K, K, Cin, Cout), jnp.float32, -bound, bound)

    def init_b(k, K):
        bound = 1.0 / (Cin * K * K) ** 0.5
        return jax.random.uniform(k, (Cout,), jnp.float32, -bound, bound)

    w3, b3 = init_w(keys[1], 3), init_b(keys[2], 3)
    w5, b5 = init_w(keys[3], 5), init_b(keys[4], 5)
    w7, b7 = init_w(keys[5], 7), init_b(keys[6], 7)

    out = feature_extraction(x, w3, b3, w5, b5, w7, b7)
    out = jax.block_until_ready(out)

    ref = _reference(x, w3, b3, w5, b5, w7, b7)
    assert out.shape == (N, 3 * Cout, H, W), out.shape
    assert jnp.allclose(out, ref, atol=1e-4, rtol=1e-4), "mismatch vs reference"

    print("KERNEL_OK")
</pallas_src>

<mosaic_0001>
module attributes {stable_mosaic.version = 11 : i64} {
  func.func @_fe_kernel(%arg0: i32, %arg1: memref<1x16x16x4xf32, #tpu.memory_space<vmem>>, %arg2: memref<7x28x24xf32, #tpu.memory_space<vmem>>, %arg3: memref<1x24xf32, #tpu.memory_space<vmem>>, %arg4: memref<1x24x256xf32, #tpu.memory_space<vmem>>, %arg5: memref<16x22x4xf32, #tpu.memory_space<vmem>>, %arg6: memref<352x28xf32, #tpu.memory_space<vmem>>) attributes {dimension_semantics = [#tpu.dimension_semantics<parallel>], iteration_bounds = array<i64: 2>, scalar_prefetch = 0 : i64, scratch_operands = 2 : i64, tpu.core_type = #tpu.core_type<tc>, window_params = [{transform_indices = @transform_0, window_bounds = array<i64: 1, 16, 16, 4>}, {pipeline_mode = #tpu.pipeline_mode<synchronous>, transform_indices = @transform_1, window_bounds = array<i64: 7, 28, 24>}, {pipeline_mode = #tpu.pipeline_mode<synchronous>, transform_indices = @transform_2, window_bounds = array<i64: 1, 24>}, {transform_indices = @transform_3, window_bounds = array<i64: 1, 24, 256>}]} {
    %cst = arith.constant 0.000000e+00 : f32
    %0 = vector.broadcast %cst : f32 to vector<16x22x4xf32>
    %c0 = arith.constant 0 : index
    %c0_0 = arith.constant 0 : index
    %c0_1 = arith.constant 0 : index
    %1 = vector.load %arg5[%c0, %c0_0, %c0_1] : memref<16x22x4xf32, #tpu.memory_space<vmem>>, vector<16x22x4xf32>
    tpu.vector_store %arg5[%c0, %c0_0, %c0_1], %0 {strides = array<i32>} : memref<16x22x4xf32, #tpu.memory_space<vmem>>, vector<16x22x4xf32>,
    %c0_2 = arith.constant 0 : index
    %c0_3 = arith.constant 0 : index
    %c0_4 = arith.constant 0 : index
    %c0_5 = arith.constant 0 : index
    %2 = vector.load %arg1[%c0_2, %c0_3, %c0_4, %c0_5] : memref<1x16x16x4xf32, #tpu.memory_space<vmem>>, vector<1x16x16x4xf32>
    %3 = vector.shape_cast %2 : vector<1x16x16x4xf32> to vector<16x16x4xf32>
    %c0_6 = arith.constant 0 : index
    %c3 = arith.constant 3 : index
    %c0_7 = arith.constant 0 : index
    %4 = vector.load %arg5[%c0_6, %c3, %c0_7] : memref<16x22x4xf32, #tpu.memory_space<vmem>>, vector<16x16x4xf32>
    tpu.vector_store %arg5[%c0_6, %c3, %c0_7], %3 {strides = array<i32>} : memref<16x22x4xf32, #tpu.memory_space<vmem>>, vector<16x16x4xf32>,
    %cst_8 = arith.constant 0.000000e+00 : f32
    %5 = vector.broadcast %cst_8 : f32 to vector<352x28xf32>
    %c0_9 = arith.constant 0 : index
    %c0_10 = arith.constant 0 : index
    %6 = vector.load %arg6[%c0_9, %c0_10] : memref<352x28xf32, #tpu.memory_space<vmem>>, vector<352x28xf32>
    tpu.vector_store %arg6[%c0_9, %c0_10], %5 {strides = array<i32>} : memref<352x28xf32, #tpu.memory_space<vmem>>, vector<352x28xf32>,
    %c0_11 = arith.constant 0 : index
    %c0_12 = arith.constant 0 : index
    %c0_13 = arith.constant 0 : index
    %7 = vector.load %arg5[%c0_11, %c0_12, %c0_13] : memref<16x22x4xf32, #tpu.memory_space<vmem>>, vector<16x16x4xf32>
    %8 = vector.shape_cast %7 : vector<16x16x4xf32> to vector<256x4xf32>
    %c48 = arith.constant 48 : index
    %c0_14 = arith.constant 0 : index
    %9 = vector.load %arg6[%c48, %c0_14] : memref<352x28xf32, #tpu.memory_space<vmem>>, vector<256x4xf32>
    tpu.vector_store %arg6[%c48, %c0_14], %8 {strides = array<i32>} : memref<352x28xf32, #tpu.memory_space<vmem>>, vector<256x4xf32>,
    %c0_15 = arith.constant 0 : index
    %c1 = arith.constant 1 : index
    %c0_16 = arith.constant 0 : index
    %10 = vector.load %arg5[%c0_15, %c1, %c0_16] : memref<16x22x4xf32, #tpu.memory_space<vmem>>, vector<16x16x4xf32>
    %11 = vector.shape_cast %10 : vector<16x16x4xf32> to vector<256x4xf32>
    %c48_17 = arith.constant 48 : index
    %c4 = arith.constant 4 : index
    %12 = vector.load %arg6[%c48_17, %c4] : memref<352x28xf32, #tpu.memory_space<vmem>>, vector<256x4xf32>
    tpu.vector_store %arg6[%c48_17, %c4], %11 {strides = array<i32>} : memref<352x28xf32, #tpu.memory_space<vmem>>, vector<256x4xf32>,
    %c0_18 = arith.constant 0 : index
    %c2 = arith.constant 2 : index
    %c0_19 = arith.constant 0 : index
    %13 = vector.load %arg5[%c0_18, %c2, %c0_19] : memref<16x22x4xf32, #tpu.memory_space<vmem>>, vector<16x16x4xf32>
    %14 = vector.shape_cast %13 : vector<16x16x4xf32> to vector<256x4xf32>
    %c48_20 = arith.constant 48 : index
    %c8 = arith.constant 8 : index
    %15 = vector.load %arg6[%c48_20, %c8] : memref<352x28xf32, #tpu.memory_space<vmem>>, vector<256x4xf32>
    tpu.vector_store %arg6[%c48_20, %c8], %14 {strides = array<i32>} : memref<352x28xf32, #tpu.memory_space<vmem>>, vector<256x4xf32>,
    %c0_21 = arith.constant 0 : index
    %c3_22 = arith.constant 3 : index
    %c0_23 = arith.constant 0 : index
    %16 = vector.load %arg5[%c0_21, %c3_22, %c0_23] : memref<16x22x4xf32, #tpu.memory_space<vmem>>, vector<16x16x4xf32>
    %17 = vector.shape_cast %16 : vector<16x16x4xf32> to vector<256x4xf32>
    %c48_24 = arith.constant 48 : index
    %c12 = arith.constant 12 : index
    %18 = vector.load %arg6[%c48_24, %c12] : memref<352x28xf32, #tpu.memory_space<vmem>>, vector<256x4xf32>
    tpu.vector_store %arg6[%c48_24, %c12], %17 {strides = array<i32>} : memref<352x28xf32, #tpu.memory_space<vmem>>, vector<256x4xf32>,
    %c0_25 = arith.constant 0 : index
    %c4_26 = arith.constant 4 : index
    %c0_27 = arith.constant 0 : index
    %19 = vector.load %arg5[%c0_25, %c4_26, %c0_27] : memref<16x22x4xf32, #tpu.memory_space<vmem>>, vector<16x16x4xf32>
    %20 = vector.shape_cast %19 : vector<16x16x4xf32> to vector<256x4xf32>
    %c48_28 = arith.constant 48 : index
    %c16 = arith.constant 16 : index
    %21 = vector.load %arg6[%c48_28, %c16] : memref<352x28xf32, #tpu.memory_space<vmem>>, vector<256x4xf32>
    tpu.vector_store %arg6[%c48_28, %c16], %20 {strides = array<i32>} : memref<352x28xf32, #tpu.memory_space<vmem>>, vector<256x4xf32>,
    %c0_29 = arith.constant 0 : index
    %c5 = arith.constant 5 : index
    %c0_30 = arith.constant 0 : index
    %22 = vector.load %arg5[%c0_29, %c5, %c0_30] : memref<16x22x4xf32, #tpu.memory_space<vmem>>, vector<16x16x4xf32>
    %23 = vector.shape_cast %22 : vector<16x16x4xf32> to vector<256x4xf32>
    %c48_31 = arith.constant 48 : index
    %c20 = arith.constant 20 : index
    %24 = vector.load %arg6[%c48_31, %c20] : memref<352x28xf32, #tpu.memory_space<vmem>>, vector<256x4xf32>
    tpu.vector_store %arg6[%c48_31, %c20], %23 {strides = array<i32>} : memref<352x28xf32, #tpu.memory_space<vmem>>, vector<256x4xf32>,
    %c0_32 = arith.constant 0 : index
    %c6 = arith.constant 6 : index
    %c0_33 = arith.constant 0 : index
    %25 = vector.load %arg5[%c0_32, %c6, %c0_33] : memref<16x22x4xf32, #tpu.memory_space<vmem>>, vector<16x16x4xf32>
    %26 = vector.shape_cast %25 : vector<16x16x4xf32> to vector<256x4xf32>
    %c48_34 = arith.constant 48 : index
    %c24 = arith.constant 24 : index
    %27 = vector.load %arg6[%c48_34, %c24] : memref<352x28xf32, #tpu.memory_space<vmem>>, vector<256x4xf32>
    tpu.vector_store %arg6[%c48_34, %c24], %26 {strides = array<i32>} : memref<352x28xf32, #tpu.memory_space<vmem>>, vector<256x4xf32>,
    %c0_35 = arith.constant 0 : index
    %c0_36 = arith.constant 0 : index
    %28 = vector.load %arg3[%c0_35, %c0_36] : memref<1x24xf32, #tpu.memory_space<vmem>>, vector<1x24xf32>
    %29 = vector.shape_cast %28 : vector<1x24xf32> to vector<1x24xf32>
    %30 = vector.broadcast %29 : vector<1x24xf32> to vector<256x24xf32>
    %c0_37 = arith.constant 0 : index
    %c0_38 = arith.constant 0 : index
    %31 = vector.load %arg6[%c0_37, %c0_38] : memref<352x28xf32, #tpu.memory_space<vmem>>, vector<256x28xf32>
    %c0_39 = arith.constant 0 : index
    %c0_40 = arith.constant 0 : index
    %c0_41 = arith.constant 0 : index
    %32 = vector.load %arg2[%c0_39, %c0_40, %c0_41] : memref<7x28x24xf32, #tpu.memory_space<vmem>>, vector<1x28x24xf32>
    %33 = vector.shape_cast %32 : vector<1x28x24xf32> to vector<28x24xf32>
    %cst_42 = arith.constant dense<0.000000e+00> : vector<256x24xf32>
    %34 = tpu.matmul %31, %33, %cst_42 {dimension_numbers = #tpu.dot_dimension_numbers<[1], [0], [0], [1], [0, 0, 1, 1], [], []>} : vector<256x28xf32>, vector<28x24xf32>, vector<256x24xf32> -> vector<256x24xf32>
    %35 = arith.addf %30, %34 : vector<256x24xf32>
    %c16_43 = arith.constant 16 : index
    %c0_44 = arith.constant 0 : index
    %36 = vector.load %arg6[%c16_43, %c0_44] : memref<352x28xf32, #tpu.memory_space<vmem>>, vector<256x28xf32>
    %c1_45 = arith.constant 1 : index
    %c0_46 = arith.constant 0 : index
    %c0_47 = arith.constant 0 : index
    %37 = vector.load %arg2[%c1_45, %c0_46, %c0_47] : memref<7x28x24xf32, #tpu.memory_space<vmem>>, vector<1x28x24xf32>
    %38 = vector.shape_cast %37 : vector<1x28x24xf32> to vector<28x24xf32>
    %cst_48 = arith.constant dense<0.000000e+00> : vector<256x24xf32>
    %39 = tpu.matmul %36, %38, %cst_48 {dimension_numbers = #tpu.dot_dimension_numbers<[1], [0], [0], [1], [0, 0, 1, 1], [], []>} : vector<256x28xf32>, vector<28x24xf32>, vector<256x24xf32> -> vector<256x24xf32>
    %40 = arith.addf %35, %39 : vector<256x24xf32>
    %c32 = arith.constant 32 : index
    %c0_49 = arith.constant 0 : index
    %41 = vector.load %arg6[%c32, %c0_49] : memref<352x28xf32, #tpu.memory_space<vmem>>, vector<256x28xf32>
    %c2_50 = arith.constant 2 : index
    %c0_51 = arith.constant 0 : index
    %c0_52 = arith.constant 0 : index
    %42 = vector.load %arg2[%c2_50, %c0_51, %c0_52] : memref<7x28x24xf32, #tpu.memory_space<vmem>>, vector<1x28x24xf32>
    %43 = vector.shape_cast %42 : vector<1x28x24xf32> to vector<28x24xf32>
    %cst_53 = arith.constant dense<0.000000e+00> : vector<256x24xf32>
    %44 = tpu.matmul %41, %43, %cst_53 {dimension_numbers = #tpu.dot_dimension_numbers<[1], [0], [0], [1], [0, 0, 1, 1], [], []>} : vector<256x28xf32>, vector<28x24xf32>, vector<256x24xf32> -> vector<256x24xf32>
    %45 = arith.addf %40, %44 : vector<256x24xf32>
    %c48_54 = arith.constant 48 : index
    %c0_55 = arith.constant 0 : index
    %46 = vector.load %arg6[%c48_54, %c0_55] : memref<352x28xf32, #tpu.memory_space<vmem>>, vector<256x28xf32>
    %c3_56 = arith.constant 3 : index
    %c0_57 = arith.constant 0 : index
    %c0_58 = arith.constant 0 : index
    %47 = vector.load %arg2[%c3_56, %c0_57, %c0_58] : memref<7x28x24xf32, #tpu.memory_space<vmem>>, vector<1x28x24xf32>
    %48 = vector.shape_cast %47 : vector<1x28x24xf32> to vector<28x24xf32>
    %cst_59 = arith.constant dense<0.000000e+00> : vector<256x24xf32>
    %49 = tpu.matmul %46, %48, %cst_59 {dimension_numbers = #tpu.dot_dimension_numbers<[1], [0], [0], [1], [0, 0, 1, 1], [], []>} : vector<256x28xf32>, vector<28x24xf32>, vector<256x24xf32> -> vector<256x24xf32>
    %50 = arith.addf %45, %49 : vector<256x24xf32>
    %c64 = arith.constant 64 : index
    %c0_60 = arith.constant 0 : index
    %51 = vector.load %arg6[%c64, %c0_60] : memref<352x28xf32, #tpu.memory_space<vmem>>, vector<256x28xf32>
    %c4_61 = arith.constant 4 : index
    %c0_62 = arith.constant 0 : index
    %c0_63 = arith.constant 0 : index
    %52 = vector.load %arg2[%c4_61, %c0_62, %c0_63] : memref<7x28x24xf32, #tpu.memory_space<vmem>>, vector<1x28x24xf32>
    %53 = vector.shape_cast %52 : vector<1x28x24xf32> to vector<28x24xf32>
    %cst_64 = arith.constant dense<0.000000e+00> : vector<256x24xf32>
    %54 = tpu.matmul %51, %53, %cst_64 {dimension_numbers = #tpu.dot_dimension_numbers<[1], [0], [0], [1], [0, 0, 1, 1], [], []>} : vector<256x28xf32>, vector<28x24xf32>, vector<256x24xf32> -> vector<256x24xf32>
    %55 = arith.addf %50, %54 : vector<256x24xf32>
    %c80 = arith.constant 80 : index
    %c0_65 = arith.constant 0 : index
    %56 = vector.load %arg6[%c80, %c0_65] : memref<352x28xf32, #tpu.memory_space<vmem>>, vector<256x28xf32>
    %c5_66 = arith.constant 5 : index
    %c0_67 = arith.constant 0 : index
    %c0_68 = arith.constant 0 : index
    %57 = vector.load %arg2[%c5_66, %c0_67, %c0_68] : memref<7x28x24xf32, #tpu.memory_space<vmem>>, vector<1x28x24xf32>
    %58 = vector.shape_cast %57 : vector<1x28x24xf32> to vector<28x24xf32>
    %cst_69 = arith.constant dense<0.000000e+00> : vector<256x24xf32>
    %59 = tpu.matmul %56, %58, %cst_69 {dimension_numbers = #tpu.dot_dimension_numbers<[1], [0], [0], [1], [0, 0, 1, 1], [], []>} : vector<256x28xf32>, vector<28x24xf32>, vector<256x24xf32> -> vector<256x24xf32>
    %60 = arith.addf %55, %59 : vector<256x24xf32>
    %c96 = arith.constant 96 : index
    %c0_70 = arith.constant 0 : index
    %61 = vector.load %arg6[%c96, %c0_70] : memref<352x28xf32, #tpu.memory_space<vmem>>, vector<256x28xf32>
    %c6_71 = arith.constant 6 : index
    %c0_72 = arith.constant 0 : index
    %c0_73 = arith.constant 0 : index
    %62 = vector.load %arg2[%c6_71, %c0_72, %c0_73] : memref<7x28x24xf32, #tpu.memory_space<vmem>>, vector<1x28x24xf32>
    %63 = vector.shape_cast %62 : vector<1x28x24xf32> to vector<28x24xf32>
    %cst_74 = arith.constant dense<0.000000e+00> : vector<256x24xf32>
    %64 = tpu.matmul %61, %63, %cst_74 {dimension_numbers = #tpu.dot_dimension_numbers<[1], [0], [0], [1], [0, 0, 1, 1], [], []>} : vector<256x28xf32>, vector<28x24xf32>, vector<256x24xf32> -> vector<256x24xf32>
    %65 = arith.addf %60, %64 : vector<256x24xf32>
    %66 = tpu.transpose %65, [1, 0] : vector<256x24xf32> -> vector<24x256xf32>
    %c0_75 = arith.constant 0 : index
    %c0_76 = arith.constant 0 : index
    %c0_77 = arith.constant 0 : index
    %67 = vector.load %arg4[%c0_75, %c0_76, %c0_77] : memref<1x24x256xf32, #tpu.memory_space<vmem>>, vector<1x24x256xf32>
    %68 = vector.shape_cast %67 : vector<1x24x256xf32> to vector<24x256xf32>
    %69 = vector.shape_cast %66 : vector<24x256xf32> to vector<1x24x256xf32>
    tpu.vector_store %arg4[%c0_75, %c0_76, %c0_77], %69 {strides = array<i32>} : memref<1x24x256xf32, #tpu.memory_space<vmem>>, vector<1x24x256xf32>,
    return
  }
  func.func @transform_0(%arg0: i32) -> (i32, i32, i32, i32) {
    %c0_i32 = arith.constant 0 : i32
    %c0_i32_0 = arith.constant 0 : i32
    %c0_i32_1 = arith.constant 0 : i32
    %c0_i32_2 = arith.constant 0 : i32
    return %arg0, %c0_i32, %c0_i32_0, %c0_i32_1 : i32, i32, i32, i32
  }
  func.func @transform_1(%arg0: i32) -> (i32, i32, i32) {
    %c0_i32 = arith.constant 0 : i32
    %c0_i32_0 = arith.constant 0 : i32
    %c0_i32_1 = arith.constant 0 : i32
    %c0_i32_2 = arith.constant 0 : i32
    return %c0_i32, %c0_i32_0, %c0_i32_1 : i32, i32, i32
  }
  func.func @transform_2(%arg0: i32) -> (i32, i32) {
    %c0_i32 = arith.constant 0 : i32
    %c0_i32_0 = arith.constant 0 : i32
    %c0_i32_1 = arith.constant 0 : i32
    return %c0_i32, %c0_i32_0 : i32, i32
  }
  func.func @transform_3(%arg0: i32) -> (i32, i32, i32) {
    %c0_i32 = arith.constant 0 : i32
    %c0_i32_0 = arith.constant 0 : i32
    %c0_i32_1 = arith.constant 0 : i32
    return %arg0, %c0_i32, %c0_i32_0 : i32, i32, i32
  }
}

</mosaic_0001>

<bundles_post_ra>
// kernel: tpu_custom_call.1
= control target key start
LH: loop header
LB: loop body
LE: loop exit
PB: predicated region body
PF: predicated region fallthrough
CT: control target
= control target key end

     0   :  { %8 = vsyncpa [#allocation5], 0  ;;  %s5795_s0 = inlined_call_operand.vmem [shape: f32[2,16,16,4], index: 0, kind: input, shape index: {}]   ;;  %s5796_s1 = inlined_call_operand.vmem [shape: f32[7,28,24], index: 1, kind: input, shape index: {}]   ;;  %s5797_s2 = inlined_call_operand.vmem [shape: f32[1,24], index: 2, kind: input, shape index: {}]   ;;  %s5798_s3 = inlined_call_operand.hbm [shape: f32[2,24,256], index: 3, kind: output, shape index: {}]  }
   0x1   :  { %10 = vsyncpa [#allocation5 + $0x1], 0  ;;  %s4088_s12 = smov 0   ;;  %s4090_s13 = smov 0  }
   0x2   :  { %s4092_s14 = smov 0   ;;  %s4094_s15 = smov 0  }
   0x3 LB: > { %s4109_s16 = sadd.s32 4294967295, %s4058_s15   ;;  %s3669_s17 = sadd.s32 4294967294, %s4058_s15   ;;  %s4058_s15 = sphi %s4094_s15, %s5922_s15   ;;  %s4054_s14 = sphi %s4092_s14, %s5921_s14   ;;  %s4050_s13 = sphi %s4090_s13, %s5920_s13   ;;  %s4046_s12 = sphi %s4088_s12, %s5919_s12  }
   0x4   : > { %s4113_s18 = sadd.s32 1, %s4058_s15   ;;  %s91_s19 = sadd.s32 1, %s4054_s14 }
   0x5   : > { %s88_s20 = ssub.s32 %s4058_s15, %s4113_s18  ;;  %p101_p0 = scmp.ne.s32.totalorder %s4054_s14, %s4050_s13 }
   0x6   : > { %p89_p1 = scmp.eq.s32.totalorder %s88_s20, 0  ;;  %p102_p2 = scmp.eq.s32.totalorder %s4109_s16, 1 }
   0x7   : > { %p107_p3 = scmp.ne.s32.totalorder %s4050_s13, %s4046_s12  ;;  %p108_p4 = scmp.eq.s32.totalorder %s3669_s17, 1 }
   0x8   : > { %s4124_s21 = scalar_select %p89_p1, %s4054_s14, %s91_s19  }
   0x9   : > { %p4126_p5 = por %p102_p2, %p101_p0  ;;  %p4130_p6 = por %p108_p4, %p107_p3 }
   0xa   : > { %p3672_p7 = scmp.ge.s32.totalorder %s4058_s15, 1  ;;  %p140_p8 = scmp.lt.s32.totalorder %s4058_s15, 3 }
   0xc   : > { %p141_p9 = pnand %p3672_p7, %p140_p8 }
   0xe   : > { %144 = sbr.rel (%p141_p9) target bundleno = 1129 (0x469), region = 32 }
  0x13   : > { %p164_p10 = scmp.lt.s32.totalorder %s4109_s16, 1  ;;  %vm169_vm0 = vcmask 31744   ;;  %v4060_v0 = vmov 0.0   ;;  %s4061_s29 = smov 4   ;;  %vm172_vm1 = vcmask 29696   ;;  %vm283_vm2 = vcmask 228352  }
  0x14   : > { %174 = vst.msk [vmem:[#allocation2 + $0x18] sm:$0xff] %vm169_vm0, %v4060_v0  ;;  %s4062_s30 = smov 8   ;;  %s4063_s4 = smov 20   ;;  %vm552_vm3 = vcmask 64544   ;;  %vm1686_vm4 = vcmask 1043456   ;;  %vm745_vm5 = vcmask 97344  }
  0x15   : > { %s165_s24 = scalar_select %p164_p10, %s4109_s16, 1  ;;  %175 = vst.msk [vmem:[#allocation2 + $0x20] sm:$0xff] %vm169_vm0, %v4060_v0  ;;  %vm938_vm6 = vcmask 130144   ;;  %vm1131_vm7 = vcmask 162944   ;;  %vm1324_vm8 = vcmask 195744   ;;  %vm1517_vm9 = vcmask 228544  }
  0x16   : > { %170 = vst.msk [vmem:[#allocation2] sm:$0xff] %vm169_vm0, %v4060_v0  ;;  %s4064_s5 = smov 16   ;;  %s4065_s6 = smov 12  }
  0x17   : > { %s3933_s25 = sshll.u32 %s165_s24, 8  ;;  %171 = vst.msk [vmem:[#allocation2 + $0x8] sm:$0xff] %vm169_vm0, %v4060_v0  ;;  %s4066_s7 = smov 24  }
  0x18   : > { %s4149_s28 = scalar_lea.vmem %s5795_s0, %s3933_s25  ;;  %177 = vst.msk [vmem:[#allocation2 + $0x30] sm:$0xff] %vm169_vm0, %v4060_v0  ;;  %s4016_s27 = scalar_lea.hbm %s5798_s3, 96 }
  0x19   : > { %v221_v1 = vld [vmem:[%s4149_s28 + $0x10] sm:$0xff]  ;;  %178 = vst.msk [vmem:[#allocation2 + $0x38] sm:$0xff] %vm169_vm0, %v4060_v0  ;;  %v219_v3 = vld [vmem:[%s4149_s28] sm:$0xff]  ;;  %v222_v4 = vld [vmem:[%s4149_s28 + $0x18] sm:$0xff] }
  0x1a   : > { %253 = vst.msk [vmem:[#allocation2 + $0x1b] sm:$0xff] %vm169_vm0, %v221_v1  ;;  %v220_v7 = vld [vmem:[%s4149_s28 + $0x8] sm:$0xff]  ;;  %v225_v8 = vld [vmem:[%s4149_s28 + $0x30] sm:$0xff]  ;;  %v226_v9 = vld [vmem:[%s4149_s28 + $0x38] sm:$0xff] }
  0x1b   : > { %180 = vst.msk [vmem:[#allocation2 + $0x48] sm:$0xff] %vm169_vm0, %v4060_v0  ;;  %v237_v10 = vld [vmem:[%s4149_s28 + $0x90] sm:$0xff]  ;;  %v223_v11 = vld [vmem:[%s4149_s28 + $0x20] sm:$0xff]  ;;  %v238_v12 = vld [vmem:[%s4149_s28 + $0x98] sm:$0xff] }
  0x1c   : > { %181 = vst.msk [vmem:[#allocation2 + $0x50] sm:$0xff] %vm169_vm0, %v4060_v0  ;;  %v224_v13 = vld [vmem:[%s4149_s28 + $0x28] sm:$0xff]  ;;  %v227_v14 = vld [vmem:[%s4149_s28 + $0x40] sm:$0xff]  ;;  %v241_v40 = vld [vmem:[%s4149_s28 + $0xb0] sm:$0xff] }
  0x1d   : > { %183 = vst.msk [vmem:[#allocation2 + $0x60] sm:$0xff] %vm169_vm0, %v4060_v0  ;;  %v239_v20 = vld [vmem:[%s4149_s28 + $0xa0] sm:$0xff]  ;;  %v240_v24 = vld [vmem:[%s4149_s28 + $0xa8] sm:$0xff] }
  0x1e   : > { %184 = vst.msk [vmem:[#allocation2 + $0x68] sm:$0xff] %vm169_vm0, %v4060_v0 }
  0x1f   : > { %186 = vst.msk [vmem:[#allocation2 + $0x78] sm:$0xff] %vm169_vm0, %v4060_v0 }
  0x20   : > { %187 = vst.msk [vmem:[#allocation2 + $0x80] sm:$0xff] %vm169_vm0, %v4060_v0 }
  0x21   : > { %v394_v2 = vld [vmem:[#allocation2 + $0x19] sm:$0xff]  ;;  %189 = vst.msk [vmem:[#allocation2 + $0x90] sm:$0xff] %vm169_vm0, %v4060_v0 }
  0x22   : > { %460 = vrot.lane.b32.xlu1 %v394_v2, %s4061_s29  ;;  %190 = vst.msk [vmem:[#allocation2 + $0x98] sm:$0xff] %vm169_vm0, %v4060_v0  ;;  %v330_v48 = vld [vmem:[#allocation2 + $0x18] sm:$0xff] }
  0x23   : > { %192 = vst.msk [vmem:[#allocation2 + $0xa8] sm:$0xff] %vm169_vm0, %v4060_v0 }
  0x24   : > { %193 = vst.msk [vmem:[#allocation2 + $0xb0] sm:$0xff] %vm169_vm0, %v4060_v0 }
  0x25   : > { %195 = vst.msk [vmem:[#allocation2 + $0xc0] sm:$0xff] %vm169_vm0, %v4060_v0 }
  0x26   : > { %196 = vst.msk [vmem:[#allocation2 + $0xc8] sm:$0xff] %vm169_vm0, %v4060_v0 }
  0x27   : > { %198 = vst.msk [vmem:[#allocation2 + $0xd8] sm:$0xff] %vm169_vm0, %v4060_v0 }
  0x28   : > { %199 = vst.msk [vmem:[#allocation2 + $0xe0] sm:$0xff] %vm169_vm0, %v4060_v0 }
  0x29   : > { %201 = vst.msk [vmem:[#allocation2 + $0xf0] sm:$0xff] %vm169_vm0, %v4060_v0 }
  0x2a   : > { %202 = vst.msk [vmem:[#allocation2 + $0xf8] sm:$0xff] %vm169_vm0, %v4060_v0 }
  0x2b   : > { %204 = vst.msk [vmem:[#allocation2 + $0x108] sm:$0xff] %vm169_vm0, %v4060_v0 }
  0x2c   : > { %205 = vst.msk [vmem:[#allocation2 + $0x110] sm:$0xff] %vm169_vm0, %v4060_v0 }
  0x2d   : > { %207 = vst.msk [vmem:[#allocation2 + $0x120] sm:$0xff] %vm169_vm0, %v4060_v0 }
  0x2e   : > { %208 = vst.msk [vmem:[#allocation2 + $0x128] sm:$0xff] %vm169_vm0, %v4060_v0 }
  0x2f   : > { %210 = vst.msk [vmem:[#allocation2 + $0x138] sm:$0xff] %vm169_vm0, %v4060_v0 }
  0x30   : > { %211 = vst.msk [vmem:[#allocation2 + $0x140] sm:$0xff] %vm169_vm0, %v4060_v0 }
  0x31   : > { %213 = vst.msk [vmem:[#allocation2 + $0x150] sm:$0xff] %vm169_vm0, %v4060_v0 }
  0x32   : > { %214 = vst.msk [vmem:[#allocation2 + $0x158] sm:$0xff] %vm169_vm0, %v4060_v0 }
  0x33   : > { %216 = vst.msk [vmem:[#allocation2 + $0x168] sm:$0xff] %vm169_vm0, %v4060_v0 }
  0x34   : > { %217 = vst.msk [vmem:[#allocation2 + $0x170] sm:$0xff] %vm169_vm0, %v4060_v0 }
  0x35   : > { %251 = vst.msk [vmem:[#allocation2 + $0x3] sm:$0xff] %vm169_vm0, %v219_v3 }
  0x36   : > { %176 = vst.msk [vmem:[#allocation2 + $0x28] sm:$0x3f] %vm172_vm1, %v4060_v0 }
  0x37   : > { %254 = vst.msk [vmem:[#allocation2 + $0x23] sm:$0xff] %vm169_vm0, %v222_v4  ;;  %v587_v4 = vld [vmem:[#allocation2 + $0x1a] sm:$0xff] }
  0x38   : > { %173 = vst.msk [vmem:[#allocation2 + $0x10] sm:$0x3f] %vm172_vm1, %v4060_v0 }
  0x39   : > { %179 = vst.msk [vmem:[#allocation2 + $0x40] sm:$0x3f] %vm172_vm1, %v4060_v0 }
  0x3a   : > { %182 = vst.msk [vmem:[#allocation2 + $0x58] sm:$0x3f] %vm172_vm1, %v4060_v0 }
  0x3b   : > { %185 = vst.msk [vmem:[#allocation2 + $0x70] sm:$0x3f] %vm172_vm1, %v4060_v0 }
  0x3c   : > { %v392_v5 = vld [vmem:[#allocation2 + $0x1] sm:$0xff]  ;;  %188 = vst.msk [vmem:[#allocation2 + $0x88] sm:$0x3f] %vm172_vm1, %v4060_v0 }
  0x3d   : > { %456 = vrot.lane.b32.xlu0 %v392_v5, %s4061_s29  ;;  %191 = vst.msk [vmem:[#allocation2 + $0xa0] sm:$0x3f] %vm172_vm1, %v4060_v0  ;;  %v585_v42 = vld [vmem:[#allocation2 + $0x2] sm:$0xff] }
  0x3e   : > { %v395_v6 = vld [vmem:[#allocation2 + $0x21] sm:$0xff]  ;;  %194 = vst.msk [vmem:[#allocation2 + $0xb8] sm:$0x3f] %vm172_vm1, %v4060_v0 }
  0x3f   : > { %462 = vrot.lane.b32.xlu1 %v395_v6, %s4061_s29  ;;  %197 = vst.msk [vmem:[#allocation2 + $0xd0] sm:$0x3f] %vm172_vm1, %v4060_v0  ;;  %v778_v49 = vld [vmem:[#allocation2 + $0x3] sm:$0xff] }
  0x40   : > { %200 = vst.msk [vmem:[#allocation2 + $0xe8] sm:$0x3f] %vm172_vm1, %v4060_v0 }
  0x41   : > { %203 = vst.msk [vmem:[#allocation2 + $0x100] sm:$0x3f] %vm172_vm1, %v4060_v0 }
  0x42   : > { %206 = vst.msk [vmem:[#allocation2 + $0x118] sm:$0x3f] %vm172_vm1, %v4060_v0 }
  0x43   : > { %209 = vst.msk [vmem:[#allocation2 + $0x130] sm:$0x3f] %vm172_vm1, %v4060_v0 }
  0x44   : > { %212 = vst.msk [vmem:[#allocation2 + $0x148] sm:$0x3f] %vm172_vm1, %v4060_v0 }
  0x45   : > { %215 = vst.msk [vmem:[#allocation2 + $0x160] sm:$0x3f] %vm172_vm1, %v4060_v0 }
  0x46   : > { %218 = vst.msk [vmem:[#allocation2 + $0x178] sm:$0x3f] %vm172_vm1, %v4060_v0 }
  0x47   : > { %252 = vst.msk [vmem:[#allocation2 + $0xb] sm:$0xff] %vm169_vm0, %v220_v7  ;;  %v328_v7 = vld [vmem:[#allocation2] sm:$0xff] }
  0x48   : > { %257 = vst.msk [vmem:[#allocation2 + $0x4b] sm:$0xff] %vm169_vm0, %v225_v8 }
  0x49   : > { %258 = vst.msk [vmem:[#allocation2 + $0x53] sm:$0xff] %vm169_vm0, %v226_v9 }
  0x4a   : > { %269 = vst.msk [vmem:[#allocation2 + $0xdb] sm:$0xff] %vm169_vm0, %v237_v10 }
  0x4b   : > { %255 = vst.msk [vmem:[#allocation2 + $0x33] sm:$0xff] %vm169_vm0, %v223_v11  ;;  %v242_v11 = vld [vmem:[%s4149_s28 + $0xb8] sm:$0xff] }
  0x4c   : > { %270 = vst.msk [vmem:[#allocation2 + $0xe3] sm:$0xff] %vm169_vm0, %v238_v12  ;;  %v331_v12 = vld [vmem:[#allocation2 + $0x20] sm:$0xff] }
  0x4d   : > { %256 = vst.msk [vmem:[#allocation2 + $0x3b] sm:$0xff] %vm169_vm0, %v224_v13 }
  0x4e   : > { %v393_v15 = vld [vmem:[#allocation2 + $0x9] sm:$0xff]  ;;  %259 = vst.msk [vmem:[#allocation2 + $0x63] sm:$0xff] %vm169_vm0, %v227_v14 }
  0x4f   : > { %458 = vrot.lane.b32.xlu0 %v393_v15, %s4061_s29  ;;  %v398_v18 = vld [vmem:[#allocation2 + $0x49] sm:$0xff]  ;;  %271 = vst.msk [vmem:[#allocation2 + $0xf3] sm:$0xff] %vm169_vm0, %v239_v20 }
  0x50   : > { %v399_v16 = vld [vmem:[#allocation2 + $0x51] sm:$0xff]  ;;  %272 = vst.msk [vmem:[#allocation2 + $0xfb] sm:$0xff] %vm169_vm0, %v240_v24  ;;  %v971_v43 = vld [vmem:[#allocation2 + $0x4] sm:$0xff] }
  0x51   : > { %470 = vrot.lane.b32.xlu1 %v399_v16, %s4061_s29  ;;  %v603_v19 = vld [vmem:[#allocation2 + $0xda] sm:$0xff]  ;;  %273 = vst.msk [vmem:[#allocation2 + $0x10b] sm:$0xff] %vm169_vm0, %v241_v40  ;;  %v1164_v50 = vld [vmem:[#allocation2 + $0x5] sm:$0xff]  ;;  %v1358_v62 = vld [vmem:[#allocation2 + $0xe] sm:$0xff] }
  0x52   : > { %v396_v17 = vld [vmem:[#allocation2 + $0x31] sm:$0xff]  ;;  %v410_v22 = vld [vmem:[#allocation2 + $0xd9] sm:$0xff]  ;;  %292 = vst.msk [vmem:[#allocation3 + $0x40] sm:$0xff] %vm283_vm2, %v4060_v0  ;;  %v1357_v55 = vld [vmem:[#allocation2 + $0x6] sm:$0xff] }
  0x53   : > { %464 = vrot.lane.b32.xlu2 %v396_v17, %s4061_s29  ;;  %v1182_v23 = vld [vmem:[#allocation2 + $0xdd] sm:$0xff]  ;;  %v1183_v30 = vld [vmem:[#allocation2 + $0xe5] sm:$0xff]  ;;  %362 = vst.msk [vmem:[#allocation3 + $0x40] sm:$0xff] %vm169_vm0, %v330_v48  ;;  %v1165_v6 = vld [vmem:[#allocation2 + $0xd] sm:$0xff] }
  0x54   : > { %v397_v21 = vld [vmem:[#allocation2 + $0x39] sm:$0xff]  ;;  %v604_v27 = vld [vmem:[#allocation2 + $0xe2] sm:$0xff]  ;;  %284 = vst.msk [vmem:[#allocation3] sm:$0xff] %vm283_vm2, %v4060_v0  ;;  %v779_v54 = vld [vmem:[#allocation2 + $0xb] sm:$0xff] }
  0x55   : > { %v400_v25 = vld [vmem:[#allocation2 + $0x61] sm:$0xff]  ;;  %285 = vst.msk [vmem:[#allocation3 + $0x8] sm:$0xff] %vm283_vm2, %v4060_v0  ;;  %v586_v59 = vld [vmem:[#allocation2 + $0xa] sm:$0xff]  ;;  %v333_v17 = vld [vmem:[#allocation2 + $0x38] sm:$0xff] }
  0x56   : > { %v989_v26 = vld [vmem:[#allocation2 + $0xdc] sm:$0xff]  ;;  %v990_v32 = vld [vmem:[#allocation2 + $0xe4] sm:$0xff]  ;;  %v605_v33 = vld [vmem:[#allocation2 + $0xf2] sm:$0xff]  ;;  %286 = vst.msk [vmem:[#allocation3 + $0x10] sm:$0xff] %vm283_vm2, %v4060_v0 }
  0x57   : > { %468 = vrot.lane.b32.xlu0 %v398_v18, %s4061_s29  ;;  %v796_v28 = vld [vmem:[#allocation2 + $0xdb] sm:$0xff]  ;;  %v797_v34 = vld [vmem:[#allocation2 + $0xe3] sm:$0xff]  ;;  %v412_v35 = vld [vmem:[#allocation2 + $0xf1] sm:$0xff]  ;;  %287 = vst.msk [vmem:[#allocation3 + $0x18] sm:$0xff] %vm283_vm2, %v4060_v0 }
  0x58   : > { %v411_v29 = vld [vmem:[#allocation2 + $0xe1] sm:$0xff]  ;;  %v1184_v36 = vld [vmem:[#allocation2 + $0xf5] sm:$0xff]  ;;  %288 = vst.msk [vmem:[#allocation3 + $0x20] sm:$0xff] %vm283_vm2, %v4060_v0  ;;  %v414_v56 = vld [vmem:[#allocation2 + $0x109] sm:$0xff] }
  0x59   : > { %685 = vrot.lane.b32.xlu1 %v603_v19, %s4062_s30  ;;  %v1375_v31 = vld [vmem:[#allocation2 + $0xde] sm:$0xff]  ;;  %v1376_v37 = vld [vmem:[#allocation2 + $0xe6] sm:$0xff]  ;;  %v991_v38 = vld [vmem:[#allocation2 + $0xf4] sm:$0xff]  ;;  %289 = vst.msk [vmem:[#allocation3 + $0x28] sm:$0xff] %vm283_vm2, %v4060_v0 }
  0x5a   : > { %v413_v39 = vld [vmem:[#allocation2 + $0xf9] sm:$0xff]  ;;  %290 = vst.msk [vmem:[#allocation3 + $0x30] sm:$0xff] %vm283_vm2, %v4060_v0  ;;  %v800_v58 = vld [vmem:[#allocation2 + $0x10b] sm:$0xff] }
  0x5b   : > { %466 = vrot.lane.b32.xlu2 %v397_v21, %s4061_s29  ;;  %v798_v41 = vld [vmem:[#allocation2 + $0xf3] sm:$0xff]  ;;  %v992_v46 = vld [vmem:[#allocation2 + $0xfc] sm:$0xff]  ;;  %291 = vst.msk [vmem:[#allocation3 + $0x38] sm:$0xff] %vm283_vm2, %v4060_v0  ;;  %v607_v2 = vld [vmem:[#allocation2 + $0x10a] sm:$0xff] }
  0x5c   : > { %v1377_v44 = vld [vmem:[#allocation2 + $0xf6] sm:$0xff]  ;;  %v1378_v51 = vld [vmem:[#allocation2 + $0xfe] sm:$0xff]  ;;  %293 = vst.msk [vmem:[#allocation3 + $0x48] sm:$0xff] %vm283_vm2, %v4060_v0  ;;  %v972_v60 = vld [vmem:[#allocation2 + $0xc] sm:$0xff] }
  0x5d   : > { %v606_v45 = vld [vmem:[#allocation2 + $0xfa] sm:$0xff]  ;;  %294 = vst.msk [vmem:[#allocation3 + $0x50] sm:$0xff] %vm283_vm2, %v4060_v0  ;;  %v332_v9 = vld [vmem:[#allocation2 + $0x30] sm:$0xff]  ;;  %v329_v14 = vld [vmem:[#allocation2 + $0x8] sm:$0xff] }
  0x5e   : > { %v799_v52 = vld [vmem:[#allocation2 + $0xfb] sm:$0xff]  ;;  %295 = vst.msk [vmem:[#allocation3 + $0x58] sm:$0xff] %vm283_vm2, %v4060_v0  ;;  %v1588_v16 = vld [vmem:[%s5796_s1 + $0x10] sm:$0xff]  ;;  %v334_v20 = vld [vmem:[#allocation2 + $0x48] sm:$0xff] }
  0x5f   : > { %492 = vrot.lane.b32.xlu0 %v410_v22, %s4061_s29  ;;  %v1185_v53 = vld [vmem:[#allocation2 + $0xfd] sm:$0xff]  ;;  %296 = vst.msk [vmem:[#allocation3 + $0x60] sm:$0xff] %vm283_vm2, %v4060_v0  ;;  %v335_v19 = vld [vmem:[#allocation2 + $0x50] sm:$0xff] }
  0x60   : > { %297 = vst.msk [vmem:[#allocation3 + $0x68] sm:$0xff] %vm283_vm2, %v4060_v0  ;;  %v336_v24 = vld [vmem:[#allocation2 + $0x60] sm:$0xff]  ;;  %v3710_v48 = vld [vmem:[%s5796_s1 + $0x30] sm:$0xff] }
  0x61   : > { %1264 = vrot.lane.b32.xlu1 %v1182_v23, %s4063_s4  ;;  %298 = vst.msk [vmem:[#allocation3 + $0x70] sm:$0xff] %vm283_vm2, %v4060_v0  ;;  %v780_v40 = vld [vmem:[#allocation2 + $0x1b] sm:$0xff] }
  0x62   : > { %299 = vst.msk [vmem:[#allocation3 + $0x78] sm:$0xff] %vm283_vm2, %v4060_v0 }
  0x63   : > { %472 = vrot.lane.b32.xlu2 %v400_v25, %s4061_s29  ;;  %300 = vst.msk [vmem:[#allocation3 + $0x80] sm:$0xff] %vm283_vm2, %v4060_v0 }
  0x64   : > { %301 = vst.msk [vmem:[#allocation3 + $0x88] sm:$0xff] %vm283_vm2, %v4060_v0 }
  0x65   : > { %302 = vst.msk [vmem:[#allocation3 + $0x90] sm:$0xff] %vm283_vm2, %v4060_v0 }
  0x66   : > { %303 = vst.msk [vmem:[#allocation3 + $0x98] sm:$0xff] %vm283_vm2, %v4060_v0 }
  0x67   : > { %1071 = vrot.lane.b32.xlu0 %v989_v26, %s4064_s5  ;;  %304 = vst.msk [vmem:[#allocation3 + $0xa0] sm:$0xff] %vm283_vm2, %v4060_v0 }
  0x68   : > { %305 = vst.msk [vmem:[#allocation3 + $0xa8] sm:$0xff] %vm283_vm2, %v4060_v0 }
  0x69   : > { %687 = vrot.lane.b32.xlu1 %v604_v27, %s4062_s30  ;;  %306 = vst.msk [vmem:[#allocation3 + $0xb0] sm:$0xff] %vm283_vm2, %v4060_v0  ;;  %v1587_v27 = vld [vmem:[%s5796_s1 + $0x8] sm:$0xff] }
  0x6a   : > { %307 = vst.msk [vmem:[#allocation3 + $0xb8] sm:$0xff] %vm283_vm2, %v4060_v0 }
  0x6b   : > { %878 = vrot.lane.b32.xlu2 %v796_v28, %s4065_s6  ;;  %308 = vst.msk [vmem:[#allocation3 + $0xc0] sm:$0xff] %vm283_vm2, %v4060_v0  ;;  %v346_v28 = vld [vmem:[#allocation2 + $0xd8] sm:$0xff] }
  0x6c   : > { %309 = vst.msk [vmem:[#allocation3 + $0xc8] sm:$0xff] %vm283_vm2, %v4060_v0 }
  0x6d   : > { %310 = vst.msk [vmem:[#allocation3 + $0xd0] sm:$0xff] %vm283_vm2, %v4060_v0 }
  0x6e   : > { %311 = vst.msk [vmem:[#allocation3 + $0xd8] sm:$0xff] %vm283_vm2, %v4060_v0 }
  0x6f   : > { %494 = vrot.lane.b32.xlu0 %v411_v29, %s4061_s29  ;;  %312 = vst.msk [vmem:[#allocation3 + $0xe0] sm:$0xff] %vm283_vm2, %v4060_v0  ;;  %v1586_v29 = vld [vmem:[%s5796_s1] sm:$0xff] }
  0x70   : > { %313 = vst.msk [vmem:[#allocation3 + $0xe8] sm:$0xff] %vm283_vm2, %v4060_v0 }
  0x71   : > { %1266 = vrot.lane.b32.xlu1 %v1183_v30, %s4063_s4  ;;  %314 = vst.msk [vmem:[#allocation3 + $0xf0] sm:$0xff] %vm283_vm2, %v4060_v0 }
  0x72   : > { %315 = vst.msk [vmem:[#allocation3 + $0xf8] sm:$0xff] %vm283_vm2, %v4060_v0 }
  0x73   : > { %1457 = vrot.lane.b32.xlu2 %v1375_v31, %s4066_s7  ;;  %316 = vst.msk [vmem:[#allocation3 + $0x100] sm:$0xff] %vm283_vm2, %v4060_v0 }
  0x74   : > { %317 = vst.msk [vmem:[#allocation3 + $0x108] sm:$0xff] %vm283_vm2, %v4060_v0 }
  0x75   : > { %318 = vst.msk [vmem:[#allocation3 + $0x110] sm:$0xff] %vm283_vm2, %v4060_v0 }
  0x76   : > { %319 = vst.msk [vmem:[#allocation3 + $0x118] sm:$0xff] %vm283_vm2, %v4060_v0 }
  0x77   : > { %1073 = vrot.lane.b32.xlu0 %v990_v32, %s4064_s5  ;;  %320 = vst.msk [vmem:[#allocation3 + $0x120] sm:$0xff] %vm283_vm2, %v4060_v0  ;;  %v1166_v32 = vld [vmem:[#allocation2 + $0x1d] sm:$0xff] }
  0x78   : > { %321 = vst.msk [vmem:[#allocation3 + $0x128] sm:$0xff] %vm283_vm2, %v4060_v0 }
  0x79   : > { %689 = vrot.lane.b32.xlu1 %v605_v33, %s4062_s30  ;;  %322 = vst.msk [vmem:[#allocation3 + $0x130] sm:$0xff] %vm283_vm2, %v4060_v0 }
  0x7a   : > { %323 = vst.msk [vmem:[#allocation3 + $0x138] sm:$0xff] %vm283_vm2, %v4060_v0 }
  0x7b   : > { %880 = vrot.lane.b32.xlu2 %v797_v34, %s4065_s6  ;;  %324 = vst.msk [vmem:[#allocation3 + $0x140] sm:$0xff] %vm283_vm2, %v4060_v0 }
  0x7c   : > { %325 = vst.msk [vmem:[#allocation3 + $0x148] sm:$0xff] %vm283_vm2, %v4060_v0 }
  0x7d   : > { %326 = vst.msk [vmem:[#allocation3 + $0x150] sm:$0xff] %vm283_vm2, %v4060_v0 }
  0x7e   : > { %327 = vst.msk [vmem:[#allocation3 + $0x158] sm:$0xff] %vm283_vm2, %v4060_v0  ;;  %v1589_v0 = vld [vmem:[%s5796_s1 + $0x18] sm:$0xf] }
  0x7f   : > { %496 = vrot.lane.b32.xlu0 %v412_v35, %s4061_s29  ;;  %360 = vst.msk [vmem:[#allocation3 + $0x30] sm:$0xff] %vm169_vm0, %v328_v7  ;;  %3934 = vmatpush.msk.msra.mxu3 %vm1686_vm4, %v1589_v0  ;;  %v1554_v35 = vld [vmem:[#allocation3] sm:$0xff]  ;;  %v3747_v7 = vld [vmem:[%s5796_s1 + $0x50] sm:$0xff] }
  0x80   : > { %364 = vst.msk [vmem:[#allocation3 + $0x50] sm:$0xff] %vm169_vm0, %v332_v9  ;;  %3675 = vmatpush.msk.msra.mxu0 %vm1686_vm4, %v1589_v0  ;;  %v588_v9 = vld [vmem:[#allocation2 + $0x22] sm:$0xff] }
  0x81   : > { %1268 = vrot.lane.b32.xlu1 %v1184_v36, %s4063_s4  ;;  %274 = vst.msk [vmem:[#allocation2 + $0x113] sm:$0xff] %vm169_vm0, %v242_v11  ;;  %3935 = vmatpush.msra.mxu3 %v1588_v16  ;;  %v781_v11 = vld [vmem:[#allocation2 + $0x23] sm:$0xff] }
  0x82   : > { %363 = vst.msk [vmem:[#allocation3 + $0x48] sm:$0xff] %vm169_vm0, %v331_v12  ;;  %1703 = vmatpush.msra.mxu0 %v1588_v16 }
  0x83   : > { %1459 = vrot.lane.b32.xlu2 %v1376_v37, %s4066_s7  ;;  %361 = vst.msk [vmem:[#allocation3 + $0x38] sm:$0xff] %vm169_vm0, %v329_v14  ;;  %3936 = vmatpush.msra.mxu3 %v1587_v27  ;;  %v347_v37 = vld [vmem:[#allocation2 + $0xe0] sm:$0xff] }
  0x84   : > { %365 = vst.msk [vmem:[#allocation3 + $0x58] sm:$0xff] %vm169_vm0, %v333_v17  ;;  %1704 = vmatpush.msra.mxu0 %v1587_v27  ;;  %v3745_v14 = vld [vmem:[%s5796_s1 + $0x40] sm:$0xff] }
  0x85   : > { %367 = vst.msk [vmem:[#allocation3 + $0x68] sm:$0xff] %vm169_vm0, %v335_v19  ;;  %3937 = vmatpush.msra.mxu3 %v1586_v29  ;;  %v1360_v27 = vld [vmem:[#allocation2 + $0x26] sm:$0xff] }
  0x86   : > { %366 = vst.msk [vmem:[#allocation3 + $0x60] sm:$0xff] %vm169_vm0, %v334_v20  ;;  %1705 = vmatpush.msra.mxu0 %v1586_v29 }
  0x87   : > { %1075 = vrot.lane.b32.xlu0 %v991_v38, %s4064_s5  ;;  %368 = vst.msk [vmem:[#allocation3 + $0x70] sm:$0xff] %vm169_vm0, %v336_v24  ;;  %3676 = vmatmul.msk.f32.vlgmr.msra.gmra.mxu0 %vm283_vm2, %v1554_v35  ;;  %v243_v38 = vld [vmem:[%s4149_s28 + $0xc0] sm:$0xff]  ;;  %v350_v35 = vld [vmem:[#allocation2 + $0x108] sm:$0xff] }
  0x88   : > { %v993_v21 = vld [vmem:[#allocation2 + $0x10c] sm:$0xff]  ;;  %378 = vst.msk [vmem:[#allocation3 + $0xc0] sm:$0xff] %vm169_vm0, %v346_v28 }
  0x89   : > { %498 = vrot.lane.b32.xlu1 %v413_v39, %s4061_s29  ;;  %v608_v22 = vld [vmem:[#allocation2 + $0x112] sm:$0xff]  ;;  %379 = vst.msk [vmem:[#allocation3 + $0xc8] sm:$0xff] %vm169_vm0, %v347_v37 }
  0x8a   : > { %v1186_v25 = vld [vmem:[#allocation2 + $0x10d] sm:$0xff]  ;;  %275 = vst.msk [vmem:[#allocation2 + $0x123] sm:$0xff] %vm169_vm0, %v243_v38  ;;  %v1361_v38 = vld [vmem:[#allocation2 + $0x36] sm:$0xff] }
  0x8b   : > { %882 = vrot.lane.b32.xlu2 %v798_v41, %s4065_s6  ;;  %v1379_v31 = vld [vmem:[#allocation2 + $0x10e] sm:$0xff]  ;;  %382 = vst.msk [vmem:[#allocation3 + $0xe0] sm:$0xff] %vm169_vm0, %v350_v35 }
  0x8c   : > { %v415_v33 = vld [vmem:[#allocation2 + $0x111] sm:$0xff] }
  0x8d   : > { %v1187_v41 = vld [vmem:[#allocation2 + $0x115] sm:$0xff] }
  0x8f   : > { %649 = vrot.lane.b32.xlu0 %v585_v42, %s4062_s30  ;;  %v973_v42 = vld [vmem:[#allocation2 + $0x1c] sm:$0xff] }
  0x91   : > { %1035 = vrot.lane.b32.xlu1 %v971_v43, %s4064_s5  ;;  %v609_v17 = vld [vmem:[#allocation2 + $0x122] sm:$0xff] }
  0x92   : > { %v802_v19 = vld [vmem:[#allocation2 + $0x123] sm:$0xff] }
  0x93   : > { %1461 = vrot.lane.b32.xlu2 %v1377_v44, %s4066_s7  ;;  %v348_v44 = vld [vmem:[#allocation2 + $0xf0] sm:$0xff] }
  0x94   : > { %v461_v47 = vpop.permute.xlu1 %460  ;;  %380 = vst.msk [vmem:[#allocation3 + $0xd0] sm:$0xff] %vm169_vm0, %v348_v44  ;;  %v975_v44 = vld [vmem:[#allocation2 + $0x34] sm:$0xff] }
  0x95   : > { %555 = vst.msk [vmem:[#allocation3 + $0x40] sm:$0xff] %vm552_vm3, %v461_v47  ;;  %v3711_v47 = vld [vmem:[%s5796_s1 + $0x38] sm:$0xf] }
  0x96   : > { %3712 = vmatpush.msk.msra.mxu1 %vm1686_vm4, %v3711_v47  ;;  %3938 = vmatpush.msk.msrb.mxu3 %vm1686_vm4, %v3711_v47  ;;  %v1168_v47 = vld [vmem:[#allocation2 + $0x35] sm:$0xff] }
  0x97   : > { %691 = vrot.lane.b32.xlu0 %v606_v45, %s4062_s30  ;;  %v1555_v45 = vld [vmem:[#allocation3 + $0x8] sm:$0xff] }
  0x98   : > { %3677 = vmatmul.msk.f32.gmra.mxu0 %vm283_vm2, %v1555_v45  ;;  %1984 = vmatpush.msra.mxu1 %v3710_v48  ;;  %v590_v45 = vld [vmem:[#allocation2 + $0x3a] sm:$0xff] }
  0x99   : > { %1077 = vrot.lane.b32.xlu1 %v992_v46, %s4064_s5  ;;  %3939 = vmatpush.msrb.mxu3 %v3710_v48 }
  0x9b   : > { %842 = vrot.lane.b32.xlu2 %v778_v49, %s4065_s6  ;;  %v244_v49 = vld [vmem:[%s4149_s28 + $0xc8] sm:$0xff] }
  0x9c   : > { %276 = vst.msk [vmem:[#allocation2 + $0x12b] sm:$0xff] %vm169_vm0, %v244_v49 }
  0x9f   : > { %1228 = vrot.lane.b32.xlu0 %v1164_v50, %s4063_s4 }
  0xa1   : > { %1463 = vrot.lane.b32.xlu1 %v1378_v51, %s4066_s7 }
  0xa3   : > { %884 = vrot.lane.b32.xlu2 %v799_v52, %s4065_s6  ;;  %v801_v52 = vld [vmem:[#allocation2 + $0x113] sm:$0xff]  ;;  %v417_v37 = vld [vmem:[#allocation2 + $0x129] sm:$0xff] }
  0xa7   : > { %1270 = vrot.lane.b32.xlu0 %v1185_v53, %s4063_s4  ;;  %v416_v53 = vld [vmem:[#allocation2 + $0x121] sm:$0xff] }
  0xa9   : > { %844 = vrot.lane.b32.xlu1 %v779_v54, %s4065_s6  ;;  %v994_v54 = vld [vmem:[#allocation2 + $0x114] sm:$0xff] }
  0xab   : > { %1421 = vrot.lane.b32.xlu2 %v1357_v55, %s4066_s7 }
  0xad   : > { %v465_v57 = vpop.permute.xlu2 %464 }
  0xae   : > { %557 = vst.msk [vmem:[#allocation3 + $0x50] sm:$0xff] %vm552_vm3, %v465_v57  ;;  %v3708_v57 = vld [vmem:[%s5796_s1 + $0x20] sm:$0xff] }
  0xaf   : > { %500 = vrot.lane.b32.xlu0 %v414_v56, %s4061_s29  ;;  %v457_v63 = vpop.permute.xlu0 %456  ;;  %v3709_v56 = vld [vmem:[%s5796_s1 + $0x28] sm:$0xff] }
  0xb0   : > { %553 = vst.msk [vmem:[#allocation3 + $0x30] sm:$0xff] %vm552_vm3, %v457_v63  ;;  %1985 = vmatpush.msra.mxu1 %v3709_v56  ;;  %3940 = vmatpush.msrb.mxu3 %v3709_v56  ;;  %v1380_v63 = vld [vmem:[#allocation2 + $0x116] sm:$0xff] }
  0xb1   : > { %886 = vrot.lane.b32.xlu1 %v800_v58, %s4065_s6  ;;  %v463_v1 = vpop.permute.xlu1 %462 }
  0xb2   : > { %556 = vst.msk [vmem:[#allocation3 + $0x48] sm:$0xff] %vm552_vm3, %v463_v1  ;;  %1986 = vmatpush.msra.mxu1 %v3708_v57  ;;  %3941 = vmatpush.msrb.mxu3 %v3708_v57  ;;  %v351_v57 = vld [vmem:[#allocation2 + $0x110] sm:$0xff] }
  0xb3   : > { %651 = vrot.lane.b32.xlu2 %v586_v59, %s4062_s30  ;;  %v1556_v59 = vld [vmem:[#allocation3 + $0x10] sm:$0xff]  ;;  %383 = vst.msk [vmem:[#allocation3 + $0xe8] sm:$0xff] %vm169_vm0, %v351_v57 }
  0xb4   : > { %3678 = vmatmul.msk.f32.gmra.mxu0 %vm283_vm2, %v1556_v59  ;;  %3713 = vmatmul.msk.f32.vlgmr.msra.gmra.mxu1 %vm283_vm2, %v1556_v59  ;;  %v784_v59 = vld [vmem:[#allocation2 + $0x4b] sm:$0xff] }
  0xb5   : > { %v467_v61 = vpop.permute.xlu2 %466 }
  0xb6   : > { %558 = vst.msk [vmem:[#allocation3 + $0x58] sm:$0xff] %vm552_vm3, %v467_v61  ;;  %v1359_v61 = vld [vmem:[#allocation2 + $0x1e] sm:$0xff] }
  0xb7   : > { %1037 = vrot.lane.b32.xlu0 %v972_v60, %s4064_s5 }
  0xb9   : > { %1423 = vrot.lane.b32.xlu1 %v1358_v62, %s4066_s7  ;;  %v974_v62 = vld [vmem:[#allocation2 + $0x24] sm:$0xff] }
  0xbb   : > { %693 = vrot.lane.b32.xlu2 %v607_v2, %s4062_s30  ;;  %v349_v2 = vld [vmem:[#allocation2 + $0xf8] sm:$0xff] }
  0xbc   : > { %381 = vst.msk [vmem:[#allocation3 + $0xd8] sm:$0xff] %vm169_vm0, %v349_v2  ;;  %v1363_v2 = vld [vmem:[#allocation2 + $0x4e] sm:$0xff] }
  0xbd   : > { %v4386_v3 = vpop.permute.xlu2 %472 }
  0xbe   : > { %561 = vst.msk [vmem:[#allocation3 + $0x70] sm:$0xff] %vm552_vm3, %v4386_v3  ;;  %v1557_v3 = vld [vmem:[#allocation3 + $0x18] sm:$0xff] }
  0xbf   : > { %1079 = vrot.lane.b32.xlu0 %v993_v21, %s4064_s5  ;;  %3679 = vmatmul.msk.f32.gmra.mxu0 %vm283_vm2, %v1557_v3  ;;  %v1559_v21 = vld [vmem:[#allocation3 + $0x28] sm:$0xff] }
  0xc0   : > { %3714 = vmatmul.msk.f32.gmra.mxu1 %vm283_vm2, %v1557_v3  ;;  %v1362_v3 = vld [vmem:[#allocation2 + $0x3e] sm:$0xff] }
  0xc1   : > { %v459_v5 = vpop.permute.xlu0 %458  ;;  %653 = vrot.lane.b32.xlu1 %v587_v4, %s4062_s30 }
  0xc2   : > { %554 = vst.msk [vmem:[#allocation3 + $0x38] sm:$0xff] %vm552_vm3, %v459_v5 }
  0xc3   : > { %v471_v8 = vpop.permute.xlu1 %470  ;;  %1230 = vrot.lane.b32.xlu2 %v1165_v6, %s4063_s4  ;;  %v3748_v6 = vld [vmem:[%s5796_s1 + $0x58] sm:$0xf] }
  0xc4   : > { %560 = vst.msk [vmem:[#allocation3 + $0x68] sm:$0xff] %vm552_vm3, %v471_v8  ;;  %3749 = vmatpush.msk.msra.mxu2 %vm1686_vm4, %v3748_v6 }
  0xc5   : > { %v4406_v10 = vpop.permute.xlu2 %878 }
  0xc6   : > { %2265 = vmatpush.msra.mxu2 %v3747_v7 }
  0xc7   : > { %1465 = vrot.lane.b32.xlu0 %v1379_v31, %s4066_s7  ;;  %v1188_v31 = vld [vmem:[#allocation2 + $0x125] sm:$0xff] }
  0xc9   : > { %v469_v13 = vpop.permute.xlu0 %468  ;;  %695 = vrot.lane.b32.xlu1 %v608_v22, %s4062_s30 }
  0xca   : > { %559 = vst.msk [vmem:[#allocation3 + $0x60] sm:$0xff] %vm552_vm3, %v469_v13  ;;  %v3746_v13 = vld [vmem:[%s5796_s1 + $0x48] sm:$0xff] }
  0xcb   : > { %v686_v15 = vpop.permute.xlu1 %685  ;;  %1272 = vrot.lane.b32.xlu2 %v1186_v25, %s4063_s4  ;;  %2266 = vmatpush.msra.mxu2 %v3746_v13  ;;  %v1167_v25 = vld [vmem:[#allocation2 + $0x25] sm:$0xff] }
  0xcd   : > { %v1458_v18 = vpop.permute.xlu2 %1457  ;;  %2267 = vmatpush.msra.mxu2 %v3745_v14 }
  0xcf   : > { %846 = vrot.lane.b32.xlu0 %v780_v40, %s4065_s6  ;;  %v610_v40 = vld [vmem:[#allocation2 + $0x12a] sm:$0xff] }
  0xd1   : > { %v493_v23 = vpop.permute.xlu0 %492  ;;  %1232 = vrot.lane.b32.xlu1 %v1166_v32, %s4063_s4  ;;  %v803_v32 = vld [vmem:[#allocation2 + $0x12b] sm:$0xff] }
  0xd2   : > { %571 = vst.msk [vmem:[#allocation3 + $0xc0] sm:$0xff] %vm552_vm3, %v493_v23 }
  0xd3   : > { %v1265_v26 = vpop.permute.xlu1 %1264  ;;  %764 = vst.msk [vmem:[#allocation3 + $0xc0] sm:$0xff] %vm745_vm5, %v686_v15  ;;  %502 = vrot.lane.b32.xlu2 %v415_v33, %s4061_s29  ;;  %v1558_v15 = vld [vmem:[#allocation3 + $0x20] sm:$0xff]  ;;  %v589_v33 = vld [vmem:[#allocation2 + $0x32] sm:$0xff] }
  0xd4   : > { %957 = vst.msk [vmem:[#allocation3 + $0xc0] sm:$0xff] %vm938_vm6, %v4406_v10  ;;  %v995_v10 = vld [vmem:[#allocation2 + $0x124] sm:$0xff]  ;;  %3680 = vmatmul.msk.f32.gmra.mxu0 %vm283_vm2, %v1558_v15  ;;  %3715 = vmatmul.msk.f32.gmra.mxu1 %vm283_vm2, %v1558_v15 }
  0xd5   : > { %v881_v30 = vpop.permute.xlu2 %880  ;;  %3750 = vmatmul.msk.f32.vlgmr.msra.gmra.mxu2 %vm283_vm2, %v1558_v15 }
  0xd7   : > { %888 = vrot.lane.b32.xlu0 %v801_v52, %s4065_s6  ;;  %v1169_v52 = vld [vmem:[#allocation2 + $0x3d] sm:$0xff] }
  0xd9   : > { %v1072_v34 = vpop.permute.xlu0 %1071  ;;  %1274 = vrot.lane.b32.xlu1 %v1187_v41, %s4063_s4 }
  0xda   : > { %1150 = vst.msk [vmem:[#allocation3 + $0xc0] sm:$0xff] %vm1131_vm7, %v1072_v34 }
  0xdb   : > { %v688_v36 = vpop.permute.xlu1 %687  ;;  %1343 = vst.msk [vmem:[#allocation3 + $0xc0] sm:$0xff] %vm1324_vm8, %v1265_v26  ;;  %1039 = vrot.lane.b32.xlu2 %v973_v42, %s4064_s5  ;;  %v782_v26 = vld [vmem:[#allocation2 + $0x33] sm:$0xff] }
  0xdc   : > { %1536 = vst.msk [vmem:[#allocation3 + $0xc0] sm:$0xff] %vm1517_vm9, %v1458_v18  ;;  %v1381_v18 = vld [vmem:[#allocation2 + $0x126] sm:$0xff]  ;;  %3681 = vmatmul.msk.f32.gmra.mxu0 %vm283_vm2, %v1559_v21  ;;  %3716 = vmatmul.msk.f32.gmra.mxu1 %vm283_vm2, %v1559_v21 }
  0xdd   : > { %v1460_v39 = vpop.permute.xlu2 %1459  ;;  %3751 = vmatmul.msk.f32.gmra.mxu2 %vm283_vm2, %v1559_v21  ;;  %v229_v21 = vld [vmem:[%s4149_s28 + $0x50] sm:$0xff] }
  0xde   : > { %261 = vst.msk [vmem:[#allocation2 + $0x7b] sm:$0xff] %vm169_vm0, %v229_v21 }
  0xdf   : > { %1425 = vrot.lane.b32.xlu0 %v1359_v61, %s4066_s7 }
  0xe1   : > { %v495_v43 = vpop.permute.xlu0 %494  ;;  %504 = vrot.lane.b32.xlu1 %v416_v53, %s4061_s29 }
  0xe2   : > { %572 = vst.msk [vmem:[#allocation3 + $0xc8] sm:$0xff] %vm552_vm3, %v495_v43 }
  0xe3   : > { %765 = vst.msk [vmem:[#allocation3 + $0xc8] sm:$0xff] %vm745_vm5, %v688_v36  ;;  %v1267_v46 = vpop.permute.xlu1 %1266  ;;  %v1578_v50 = vld [vmem:[#allocation3 + $0xc0] sm:$0xff]  ;;  %1081 = vrot.lane.b32.xlu2 %v994_v54, %s4064_s5  ;;  %v1189_v54 = vld [vmem:[#allocation2 + $0x12d] sm:$0xff] }
  0xe4   : > { %958 = vst.msk [vmem:[#allocation3 + $0xc8] sm:$0xff] %vm938_vm6, %v881_v30  ;;  %3700 = vmatmul.msk.f32.vlgmr.msra.gmra.mxu3 %vm283_vm2, %v1578_v50 }
  0xe5   : > { %v883_v51 = vpop.permute.xlu2 %882  ;;  %3942 = vmatpush.msk.msra.mxu3 %vm1686_vm4, %v3748_v6  ;;  %v591_v6 = vld [vmem:[#allocation2 + $0x4a] sm:$0xff]  ;;  %v402_v57 = vld [vmem:[#allocation2 + $0x79] sm:$0xff] }
  0xe7   : > { %3943 = vmatpush.msra.mxu3 %v3747_v7  ;;  %655 = vrot.lane.b32.xlu0 %v588_v9, %s4062_s30  ;;  %v978_v7 = vld [vmem:[#allocation2 + $0x54] sm:$0xff] }
  0xe9   : > { %v1074_v55 = vpop.permute.xlu0 %1073  ;;  %1041 = vrot.lane.b32.xlu1 %v974_v62, %s4064_s5  ;;  %3944 = vmatpush.msra.mxu3 %v3746_v13  ;;  %v593_v13 = vld [vmem:[#allocation2 + $0x62] sm:$0xff] }
  0xea   : > { %1151 = vst.msk [vmem:[#allocation3 + $0xc8] sm:$0xff] %vm1131_vm7, %v1074_v55 }
  0xeb   : > { %1344 = vst.msk [vmem:[#allocation3 + $0xc8] sm:$0xff] %vm1324_vm8, %v1267_v46  ;;  %v690_v58 = vpop.permute.xlu1 %689  ;;  %1467 = vrot.lane.b32.xlu2 %v1380_v63, %s4066_s7  ;;  %3945 = vmatpush.msra.mxu3 %v3745_v14  ;;  %v592_v14 = vld [vmem:[#allocation2 + $0x52] sm:$0xff] }
  0xec   : > { %1537 = vst.msk [vmem:[#allocation3 + $0xc8] sm:$0xff] %vm1517_vm9, %v1460_v39 }
  0xed   : > { %v1462_v60 = vpop.permute.xlu2 %1461 }
  0xef   : > { %697 = vrot.lane.b32.xlu0 %v609_v17, %s4062_s30 }
  0xf1   : > { %v497_v1 = vpop.permute.xlu0 %496  ;;  %1083 = vrot.lane.b32.xlu1 %v995_v10, %s4064_s5 }
  0xf2   : > { %573 = vst.msk [vmem:[#allocation3 + $0xd0] sm:$0xff] %vm552_vm3, %v497_v1  ;;  %v976_v1 = vld [vmem:[#allocation2 + $0x3c] sm:$0xff] }
  0xf3   : > { %766 = vst.msk [vmem:[#allocation3 + $0xd0] sm:$0xff] %vm745_vm5, %v690_v58  ;;  %v1579_v4 = vld [vmem:[#allocation3 + $0xc8] sm:$0xff]  ;;  %v1269_v5 = vpop.permute.xlu1 %1268  ;;  %848 = vrot.lane.b32.xlu2 %v781_v11, %s4065_s6 }
  0xf4   : > { %959 = vst.msk [vmem:[#allocation3 + $0xd0] sm:$0xff] %vm938_vm6, %v883_v51  ;;  %3701 = vmatmul.msk.f32.gmra.mxu3 %vm283_vm2, %v1579_v4  ;;  %v996_v51 = vld [vmem:[#allocation2 + $0x12c] sm:$0xff] }
  0xf5   : > { %v843_v8 = vpop.permute.xlu2 %842  ;;  %v1382_v58 = vld [vmem:[#allocation2 + $0x12e] sm:$0xff] }
  0xf6   : > { %v228_v4 = vld [vmem:[%s4149_s28 + $0x48] sm:$0xff] }
  0xf7   : > { %1234 = vrot.lane.b32.xlu0 %v1167_v25, %s4063_s4  ;;  %260 = vst.msk [vmem:[#allocation2 + $0x6b] sm:$0xff] %vm169_vm0, %v228_v4  ;;  %v231_v4 = vld [vmem:[%s4149_s28 + $0x60] sm:$0xff] }
  0xf8   : > { %263 = vst.msk [vmem:[#allocation2 + $0x93] sm:$0xff] %vm169_vm0, %v231_v4 }
  0xf9   : > { %v1076_v12 = vpop.permute.xlu0 %1075  ;;  %1469 = vrot.lane.b32.xlu1 %v1381_v18, %s4066_s7  ;;  %v785_v18 = vld [vmem:[#allocation2 + $0x53] sm:$0xff] }
  0xfa   : > { %1152 = vst.msk [vmem:[#allocation3 + $0xd0] sm:$0xff] %vm1131_vm7, %v1076_v12  ;;  %v1170_v12 = vld [vmem:[#allocation2 + $0x4d] sm:$0xff] }
  0xfb   : > { %1345 = vst.msk [vmem:[#allocation3 + $0xd0] sm:$0xff] %vm1324_vm8, %v1269_v5  ;;  %v499_v0 = vpop.permute.xlu1 %498  ;;  %890 = vrot.lane.b32.xlu2 %v802_v19, %s4065_s6 }
  0xfc   : > { %1538 = vst.msk [vmem:[#allocation3 + $0xd0] sm:$0xff] %vm1517_vm9, %v1462_v60  ;;  %v783_v60 = vld [vmem:[#allocation2 + $0x3b] sm:$0xff] }
  0xfd   : > { %574 = vst.msk [vmem:[#allocation3 + $0xd8] sm:$0xff] %vm552_vm3, %v499_v0  ;;  %v885_v16 = vpop.permute.xlu2 %884  ;;  %v352_v0 = vld [vmem:[#allocation2 + $0x120] sm:$0xff] }
  0xfe   : > { %384 = vst.msk [vmem:[#allocation3 + $0xf0] sm:$0xff] %vm169_vm0, %v352_v0  ;;  %v1172_v19 = vld [vmem:[#allocation2 + $0x65] sm:$0xff]  ;;  %v1173_v35 = vld [vmem:[#allocation2 + $0x6d] sm:$0xff] }
  0xff   : > { %1276 = vrot.lane.b32.xlu0 %v1188_v31, %s4063_s4 }
 0x101   : > { %v650_v20 = vpop.permute.xlu0 %649  ;;  %850 = vrot.lane.b32.xlu1 %v782_v26, %s4065_s6 }
 0x102   : > { %746 = vst.msk [vmem:[#allocation3 + $0x30] sm:$0xff] %vm745_vm5, %v650_v20  ;;  %v1171_v20 = vld [vmem:[#allocation2 + $0x55] sm:$0xff] }
 0x103   : > { %939 = vst.msk [vmem:[#allocation3 + $0x30] sm:$0xff] %vm938_vm6, %v843_v8  ;;  %v4530_v22 = vld [vmem:[#allocation3 + $0xd0] sm:$0xff]  ;;  %v1036_v23 = vpop.permute.xlu1 %1035  ;;  %1427 = vrot.lane.b32.xlu2 %v1360_v27, %s4066_s7 }
 0x104   : > { %3702 = vmatmul.msk.f32.gmra.mxu3 %vm283_vm2, %v4530_v22  ;;  %1132 = vst.msk [vmem:[#allocation3 + $0x30] sm:$0xff] %vm1131_vm7, %v1036_v23  ;;  %v977_v8 = vld [vmem:[#allocation2 + $0x4c] sm:$0xff]  ;;  %v1364_v27 = vld [vmem:[#allocation2 + $0x56] sm:$0xff] }
 0x105   : > { %v1422_v24 = vpop.permute.xlu2 %1421 }
 0x107   : > { %506 = vrot.lane.b32.xlu0 %v417_v37, %s4061_s29 }
 0x109   : > { %v692_v28 = vpop.permute.xlu0 %691  ;;  %892 = vrot.lane.b32.xlu1 %v803_v32, %s4065_s6 }
 0x10a   : > { %767 = vst.msk [vmem:[#allocation3 + $0xd8] sm:$0xff] %vm745_vm5, %v692_v28  ;;  %v594_v28 = vld [vmem:[#allocation2 + $0x6a] sm:$0xff] }
 0x10b   : > { %960 = vst.msk [vmem:[#allocation3 + $0xd8] sm:$0xff] %vm938_vm6, %v885_v16  ;;  %v1078_v29 = vpop.permute.xlu1 %1077  ;;  %657 = vrot.lane.b32.xlu2 %v589_v33, %s4062_s30 }
 0x10c   : > { %1153 = vst.msk [vmem:[#allocation3 + $0xd8] sm:$0xff] %vm1131_vm7, %v1078_v29  ;;  %v786_v29 = vld [vmem:[#allocation2 + $0x63] sm:$0xff] }
 0x10d   : > { %v652_v30 = vpop.permute.xlu2 %651 }
 0x10e   : > { %747 = vst.msk [vmem:[#allocation3 + $0x38] sm:$0xff] %vm745_vm5, %v652_v30  ;;  %v230_v30 = vld [vmem:[%s4149_s28 + $0x58] sm:$0xff] }
 0x10f   : > { %1043 = vrot.lane.b32.xlu0 %v975_v44, %s4064_s5  ;;  %262 = vst.msk [vmem:[#allocation2 + $0x83] sm:$0xff] %vm169_vm0, %v230_v30  ;;  %v353_v44 = vld [vmem:[#allocation2 + $0x128] sm:$0xff] }
 0x110   : > { %385 = vst.msk [vmem:[#allocation3 + $0xf8] sm:$0xff] %vm169_vm0, %v353_v44 }
 0x111   : > { %v1229_v34 = vpop.permute.xlu0 %1228  ;;  %1429 = vrot.lane.b32.xlu1 %v1361_v38, %s4066_s7 }
 0x112   : > { %1325 = vst.msk [vmem:[#allocation3 + $0x30] sm:$0xff] %vm1324_vm8, %v1229_v34  ;;  %v979_v34 = vld [vmem:[#allocation2 + $0x64] sm:$0xff] }
 0x113   : > { %1518 = vst.msk [vmem:[#allocation3 + $0x30] sm:$0xff] %vm1517_vm9, %v1422_v24  ;;  %v1464_v36 = vpop.permute.xlu1 %1463  ;;  %699 = vrot.lane.b32.xlu2 %v610_v40, %s4062_s30  ;;  %v401_v40 = vld [vmem:[#allocation2 + $0x69] sm:$0xff] }
 0x115   : > { %v694_v41 = vpop.permute.xlu2 %693 }
 0x117   : > { %1085 = vrot.lane.b32.xlu0 %v996_v51, %s4064_s5  ;;  %v980_v51 = vld [vmem:[#allocation2 + $0x6c] sm:$0xff] }
 0x119   : > { %v1271_v39 = vpop.permute.xlu0 %1270  ;;  %659 = vrot.lane.b32.xlu1 %v590_v45, %s4062_s30  ;;  %v245_v45 = vld [vmem:[%s4149_s28 + $0xd0] sm:$0xff] }
 0x11a   : > { %1346 = vst.msk [vmem:[#allocation3 + $0xd8] sm:$0xff] %vm1324_vm8, %v1271_v39  ;;  %v1560_v42 = vld [vmem:[#allocation3 + $0x30] sm:$0xff] }
 0x11b   : > { %1539 = vst.msk [vmem:[#allocation3 + $0xd8] sm:$0xff] %vm1517_vm9, %v1464_v36  ;;  %3682 = vmatmul.msk.f32.gmra.mxu0 %vm283_vm2, %v1560_v42  ;;  %3717 = vmatmul.msk.f32.gmra.mxu1 %vm283_vm2, %v1560_v42  ;;  %v845_v43 = vpop.permute.xlu1 %844  ;;  %v1365_v36 = vld [vmem:[#allocation2 + $0x66] sm:$0xff] }
 0x11c   : > { %3752 = vmatmul.msk.f32.gmra.mxu2 %vm283_vm2, %v1560_v42  ;;  %940 = vst.msk [vmem:[#allocation3 + $0x38] sm:$0xff] %vm938_vm6, %v845_v43  ;;  %1236 = vrot.lane.b32.xlu2 %v1168_v47, %s4063_s4  ;;  %v595_v42 = vld [vmem:[#allocation2 + $0x7a] sm:$0xff]  ;;  %v787_v43 = vld [vmem:[#allocation2 + $0x6b] sm:$0xff] }
 0x11d   : > { %v1231_v50 = vpop.permute.xlu2 %1230  ;;  %277 = vst.msk [vmem:[#allocation2 + $0x13b] sm:$0xff] %vm169_vm0, %v245_v45  ;;  %v790_v45 = vld [vmem:[#allocation2 + $0x93] sm:$0xff] }
 0x11f   : > { %1471 = vrot.lane.b32.xlu0 %v1382_v58, %s4066_s7  ;;  %v596_v58 = vld [vmem:[#allocation2 + $0x82] sm:$0xff] }
 0x121   : > { %v501_v46 = vpop.permute.xlu0 %500  ;;  %1238 = vrot.lane.b32.xlu1 %v1169_v52, %s4063_s4  ;;  %v1174_v52 = vld [vmem:[#allocation2 + $0x7d] sm:$0xff] }
 0x122   : > { %575 = vst.msk [vmem:[#allocation3 + $0xe0] sm:$0xff] %vm552_vm3, %v501_v46  ;;  %v4564_v48 = vld [vmem:[#allocation3 + $0xd8] sm:$0xff] }
 0x123   : > { %768 = vst.msk [vmem:[#allocation3 + $0xe0] sm:$0xff] %vm745_vm5, %v694_v41  ;;  %3703 = vmatmul.msk.f32.gmra.mxu3 %vm283_vm2, %v4564_v48  ;;  %v887_v49 = vpop.permute.xlu1 %886 }
 0x124   : > { %961 = vst.msk [vmem:[#allocation3 + $0xe0] sm:$0xff] %vm938_vm6, %v887_v49  ;;  %1278 = vrot.lane.b32.xlu2 %v1189_v54, %s4063_s4 }
 0x125   : > { %v1273_v56 = vpop.permute.xlu2 %1272 }
 0x127   : > { %1045 = vrot.lane.b32.xlu0 %v976_v1, %s4064_s5  ;;  %v981_v1 = vld [vmem:[#allocation2 + $0x7c] sm:$0xff] }
 0x129   : > { %v1038_v53 = vpop.permute.xlu0 %1037  ;;  %854 = vrot.lane.b32.xlu1 %v784_v59, %s4065_s6  ;;  %v788_v59 = vld [vmem:[#allocation2 + $0x7b] sm:$0xff] }
 0x12a   : > { %1133 = vst.msk [vmem:[#allocation3 + $0x38] sm:$0xff] %vm1131_vm7, %v1038_v53  ;;  %v1366_v53 = vld [vmem:[#allocation2 + $0x6e] sm:$0xff] }
 0x12b   : > { %1326 = vst.msk [vmem:[#allocation3 + $0x38] sm:$0xff] %vm1324_vm8, %v1231_v50  ;;  %v1424_v55 = vpop.permute.xlu1 %1423 }
 0x12c   : > { %1519 = vst.msk [vmem:[#allocation3 + $0x38] sm:$0xff] %vm1517_vm9, %v1424_v55  ;;  %852 = vrot.lane.b32.xlu2 %v783_v60, %s4065_s6  ;;  %v246_v60 = vld [vmem:[%s4149_s28 + $0xd8] sm:$0xff] }
 0x12d   : > { %v503_v63 = vpop.permute.xlu2 %502  ;;  %278 = vst.msk [vmem:[#allocation2 + $0x143] sm:$0xff] %vm169_vm0, %v246_v60  ;;  %v234_v60 = vld [vmem:[%s4149_s28 + $0x78] sm:$0xff] }
 0x12e   : > { %576 = vst.msk [vmem:[#allocation3 + $0xe8] sm:$0xff] %vm552_vm3, %v503_v63 }
 0x12f   : > { %661 = vrot.lane.b32.xlu0 %v591_v6, %s4062_s30  ;;  %266 = vst.msk [vmem:[#allocation2 + $0xb3] sm:$0xff] %vm169_vm0, %v234_v60 }
 0x131   : > { %1433 = vrot.lane.b32.xlu1 %v1363_v2, %s4066_s7  ;;  %v1080_v9 = vpop.permute.xlu0 %1079  ;;  %v611_v2 = vld [vmem:[#allocation2 + $0x13a] sm:$0xff] }
 0x132   : > { %1154 = vst.msk [vmem:[#allocation3 + $0xe0] sm:$0xff] %vm1131_vm7, %v1080_v9  ;;  %v403_v9 = vld [vmem:[#allocation2 + $0x81] sm:$0xff] }
 0x133   : > { %v654_v61 = vpop.permute.xlu1 %653  ;;  %v1561_v62 = vld [vmem:[#allocation3 + $0x38] sm:$0xff]  ;;  %1347 = vst.msk [vmem:[#allocation3 + $0xe0] sm:$0xff] %vm1324_vm8, %v1273_v56 }
 0x134   : > { %748 = vst.msk [vmem:[#allocation3 + $0x40] sm:$0xff] %vm745_vm5, %v654_v61  ;;  %3683 = vmatmul.msk.f32.gmra.mxu0 %vm283_vm2, %v1561_v62  ;;  %3718 = vmatmul.msk.f32.gmra.mxu1 %vm283_vm2, %v1561_v62 }
 0x135   : > { %3753 = vmatmul.msk.f32.gmra.mxu2 %vm283_vm2, %v1561_v62  ;;  %1431 = vrot.lane.b32.xlu2 %v1362_v3, %s4066_s7  ;;  %v1040_v5 = vpop.permute.xlu2 %1039  ;;  %v1367_v3 = vld [vmem:[#allocation2 + $0x7e] sm:$0xff] }
 0x137   : > { %1240 = vrot.lane.b32.xlu0 %v1170_v12, %s4063_s4 }
 0x139   : > { %1049 = vrot.lane.b32.xlu1 %v978_v7, %s4064_s5  ;;  %v1466_v15 = vpop.permute.xlu0 %1465 }
 0x13a   : > { %1540 = vst.msk [vmem:[#allocation3 + $0xe0] sm:$0xff] %vm1517_vm9, %v1466_v15  ;;  %v789_v15 = vld [vmem:[#allocation2 + $0x83] sm:$0xff] }
 0x13b   : > { %v696_v10 = vpop.permute.xlu1 %695 }
 0x13c   : > { %769 = vst.msk [vmem:[#allocation3 + $0xe8] sm:$0xff] %vm745_vm5, %v696_v10  ;;  %v1175_v10 = vld [vmem:[#allocation2 + $0x85] sm:$0xff] }
 0x13d   : > { %1047 = vrot.lane.b32.xlu2 %v977_v8, %s4064_s5  ;;  %v1082_v11 = vpop.permute.xlu2 %1081 }
 0x13f   : > { %856 = vrot.lane.b32.xlu0 %v785_v18, %s4065_s6  ;;  %v232_v18 = vld [vmem:[%s4149_s28 + $0x68] sm:$0xff] }
 0x140   : > { %264 = vst.msk [vmem:[#allocation2 + $0x9b] sm:$0xff] %vm169_vm0, %v232_v18 }
 0x141   : > { %665 = vrot.lane.b32.xlu1 %v593_v13, %s4062_s30  ;;  %v847_v23 = vpop.permute.xlu0 %846  ;;  %v4606_v24 = vld [vmem:[#allocation3 + $0xe0] sm:$0xff] }
 0x142   : > { %941 = vst.msk [vmem:[#allocation3 + $0x40] sm:$0xff] %vm938_vm6, %v847_v23  ;;  %3704 = vmatmul.msk.f32.gmra.mxu3 %vm283_vm2, %v4606_v24  ;;  %v804_v23 = vld [vmem:[#allocation2 + $0x13b] sm:$0xff] }
 0x143   : > { %v1233_v16 = vpop.permute.xlu1 %1232  ;;  %1134 = vst.msk [vmem:[#allocation3 + $0x40] sm:$0xff] %vm1131_vm7, %v1040_v5 }
 0x144   : > { %1327 = vst.msk [vmem:[#allocation3 + $0x40] sm:$0xff] %vm1324_vm8, %v1233_v16  ;;  %v1190_v16 = vld [vmem:[#allocation2 + $0x13d] sm:$0xff] }
 0x145   : > { %663 = vrot.lane.b32.xlu2 %v592_v14, %s4062_s30  ;;  %v1468_v17 = vpop.permute.xlu2 %1467 }
 0x147   : > { %1435 = vrot.lane.b32.xlu0 %v1364_v27, %s4066_s7  ;;  %v405_v4 = vld [vmem:[#allocation2 + $0x99] sm:$0xff] }
 0x149   : > { %1244 = vrot.lane.b32.xlu1 %v1172_v19, %s4063_s4  ;;  %v889_v31 = vpop.permute.xlu0 %888 }
 0x14a   : > { %962 = vst.msk [vmem:[#allocation3 + $0xe8] sm:$0xff] %vm938_vm6, %v889_v31  ;;  %v1368_v31 = vld [vmem:[#allocation2 + $0x86] sm:$0xff] }
 0x14b   : > { %v1275_v25 = vpop.permute.xlu1 %1274  ;;  %1155 = vst.msk [vmem:[#allocation3 + $0xe8] sm:$0xff] %vm1131_vm7, %v1082_v11  ;;  %v418_v11 = vld [vmem:[#allocation2 + $0x139] sm:$0xff] }
 0x14c   : > { %1348 = vst.msk [vmem:[#allocation3 + $0xe8] sm:$0xff] %vm1324_vm8, %v1275_v25  ;;  %v597_v25 = vld [vmem:[#allocation2 + $0x92] sm:$0xff] }
 0x14d   : > { %1242 = vrot.lane.b32.xlu2 %v1171_v20, %s4063_s4  ;;  %v849_v26 = vpop.permute.xlu2 %848  ;;  %1541 = vst.msk [vmem:[#allocation3 + $0xe8] sm:$0xff] %vm1517_vm9, %v1468_v17  ;;  %v982_v17 = vld [vmem:[#allocation2 + $0x84] sm:$0xff] }
 0x14f   : > { %1051 = vrot.lane.b32.xlu0 %v979_v34, %s4064_s5 }
 0x151   : > { %667 = vrot.lane.b32.xlu1 %v594_v28, %s4062_s30  ;;  %v1426_v37 = vpop.permute.xlu0 %1425 }
 0x152   : > { %1520 = vst.msk [vmem:[#allocation3 + $0x40] sm:$0xff] %vm1517_vm9, %v1426_v37  ;;  %v404_v37 = vld [vmem:[#allocation2 + $0x91] sm:$0xff] }
 0x153   : > { %v505_v32 = vpop.permute.xlu1 %504 }
 0x154   : > { %577 = vst.msk [vmem:[#allocation3 + $0xf0] sm:$0xff] %vm552_vm3, %v505_v32  ;;  %v4628_v41 = vld [vmem:[#allocation3 + $0xe8] sm:$0xff] }
 0x155   : > { %858 = vrot.lane.b32.xlu2 %v786_v29, %s4065_s6  ;;  %v891_v33 = vpop.permute.xlu2 %890  ;;  %3705 = vmatmul.msk.f32.gmra.mxu3 %vm283_vm2, %v4628_v41  ;;  %v612_v32 = vld [vmem:[#allocation2 + $0x142] sm:$0xff] }
 0x157   : > { %474 = vrot.lane.b32.xlu0 %v401_v40, %s4061_s29 }
 0x159   : > { %1246 = vrot.lane.b32.xlu1 %v1173_v35, %s4063_s4  ;;  %v656_v46 = vpop.permute.xlu0 %655  ;;  %v1562_v47 = vld [vmem:[#allocation3 + $0x40] sm:$0xff] }
 0x15a   : > { %749 = vst.msk [vmem:[#allocation3 + $0x48] sm:$0xff] %vm745_vm5, %v656_v46  ;;  %3684 = vmatmul.msk.f32.gmra.mxu0 %vm283_vm2, %v1562_v47  ;;  %3719 = vmatmul.msk.f32.gmra.mxu1 %vm283_vm2, %v1562_v47  ;;  %v1191_v46 = vld [vmem:[#allocation2 + $0x145] sm:$0xff] }
 0x15b   : > { %v1042_v38 = vpop.permute.xlu1 %1041  ;;  %942 = vst.msk [vmem:[#allocation3 + $0x48] sm:$0xff] %vm938_vm6, %v849_v26  ;;  %3754 = vmatmul.msk.f32.gmra.mxu2 %vm283_vm2, %v1562_v47  ;;  %v997_v26 = vld [vmem:[#allocation2 + $0x13c] sm:$0xff]  ;;  %v983_v47 = vld [vmem:[#allocation2 + $0x94] sm:$0xff] }
 0x15c   : > { %1135 = vst.msk [vmem:[#allocation3 + $0x48] sm:$0xff] %vm1131_vm7, %v1042_v38  ;;  %v1176_v38 = vld [vmem:[#allocation2 + $0x95] sm:$0xff] }
 0x15d   : > { %1437 = vrot.lane.b32.xlu2 %v1365_v36, %s4066_s7  ;;  %v1428_v39 = vpop.permute.xlu2 %1427 }
 0x15f   : > { %1053 = vrot.lane.b32.xlu0 %v980_v51, %s4064_s5 }
 0x161   : > { %669 = vrot.lane.b32.xlu1 %v595_v42, %s4062_s30  ;;  %v698_v54 = vpop.permute.xlu0 %697 }
 0x162   : > { %770 = vst.msk [vmem:[#allocation3 + $0xf0] sm:$0xff] %vm745_vm5, %v698_v54  ;;  %v805_v54 = vld [vmem:[#allocation2 + $0x143] sm:$0xff] }
 0x163   : > { %v1084_v49 = vpop.permute.xlu1 %1083  ;;  %963 = vst.msk [vmem:[#allocation3 + $0xf0] sm:$0xff] %vm938_vm6, %v891_v33  ;;  %v1383_v33 = vld [vmem:[#allocation2 + $0x13e] sm:$0xff] }
 0x164   : > { %1156 = vst.msk [vmem:[#allocation3 + $0xf0] sm:$0xff] %vm1131_vm7, %v1084_v49  ;;  %v233_v49 = vld [vmem:[%s4149_s28 + $0x70] sm:$0xff] }
 0x165   : > { %860 = vrot.lane.b32.xlu2 %v787_v43, %s4065_s6  ;;  %v658_v50 = vpop.permute.xlu2 %657  ;;  %265 = vst.msk [vmem:[#allocation2 + $0xab] sm:$0xff] %vm169_vm0, %v233_v49 }
 0x166   : > { %750 = vst.msk [vmem:[#allocation3 + $0x50] sm:$0xff] %vm745_vm5, %v658_v50 }
 0x167   : > { %476 = vrot.lane.b32.xlu0 %v402_v57, %s4061_s29 }
 0x169   : > { %1248 = vrot.lane.b32.xlu1 %v1174_v52, %s4063_s4  ;;  %v1235_v61 = vpop.permute.xlu0 %1234 }
 0x16a   : > { %1328 = vst.msk [vmem:[#allocation3 + $0x48] sm:$0xff] %vm1324_vm8, %v1235_v61  ;;  %v1369_v61 = vld [vmem:[#allocation2 + $0x96] sm:$0xff] }
 0x16b   : > { %v1470_v55 = vpop.permute.xlu1 %1469  ;;  %1521 = vst.msk [vmem:[#allocation3 + $0x48] sm:$0xff] %vm1517_vm9, %v1428_v39  ;;  %v419_v39 = vld [vmem:[#allocation2 + $0x141] sm:$0xff] }
 0x16c   : > { %v600_v18 = vld [vmem:[#allocation2 + $0xb2] sm:$0xff] }
 0x16d   : > { %1439 = vrot.lane.b32.xlu2 %v1366_v53, %s4066_s7  ;;  %v700_v56 = vpop.permute.xlu2 %699 }
 0x16f   : > { %1055 = vrot.lane.b32.xlu0 %v981_v1, %s4064_s5 }
 0x171   : > { %671 = vrot.lane.b32.xlu1 %v596_v58, %s4062_s30  ;;  %v1277_v5 = vpop.permute.xlu0 %1276 }
 0x172   : > { %1349 = vst.msk [vmem:[#allocation3 + $0xf0] sm:$0xff] %vm1324_vm8, %v1277_v5  ;;  %v1842_v7 = vld [vmem:[#allocation3 + $0x48] sm:$0xff] }
 0x173   : > { %v851_v62 = vpop.permute.xlu1 %850  ;;  %1542 = vst.msk [vmem:[#allocation3 + $0xf0] sm:$0xff] %vm1517_vm9, %v1470_v55  ;;  %3720 = vmatmul.msk.f32.gmra.mxu1 %vm283_vm2, %v1842_v7  ;;  %3755 = vmatmul.msk.f32.gmra.mxu2 %vm283_vm2, %v1842_v7  ;;  %v598_v55 = vld [vmem:[#allocation2 + $0x9a] sm:$0xff]  ;;  %v599_v5 = vld [vmem:[#allocation2 + $0xaa] sm:$0xff] }
 0x174   : > { %943 = vst.msk [vmem:[#allocation3 + $0x50] sm:$0xff] %vm938_vm6, %v851_v62  ;;  %3685 = vmatmul.msk.f32.gmra.mxu0 %vm283_vm2, %v1842_v7  ;;  %v1177_v62 = vld [vmem:[#allocation2 + $0x9d] sm:$0xff] }
 0x175   : > { %862 = vrot.lane.b32.xlu2 %v788_v59, %s4065_s6 }
 0x176   : > { %v1237_v63 = vpop.permute.xlu2 %1236 }
 0x177   : > { %478 = vrot.lane.b32.xlu0 %v403_v9, %s4061_s29 }
 0x179   : > { %701 = vrot.lane.b32.xlu1 %v611_v2, %s4062_s30  ;;  %v507_v12 = vpop.permute.xlu0 %506 }
 0x17a   : > { %578 = vst.msk [vmem:[#allocation3 + $0xf8] sm:$0xff] %vm552_vm3, %v507_v12  ;;  %v4673_v14 = vld [vmem:[#allocation3 + $0xf0] sm:$0xff]  ;;  %v1370_v12 = vld [vmem:[#allocation2 + $0x9e] sm:$0xff] }
 0x17b   : > { %v893_v6 = vpop.permute.xlu1 %892  ;;  %771 = vst.msk [vmem:[#allocation3 + $0xf8] sm:$0xff] %vm745_vm5, %v700_v56  ;;  %3706 = vmatmul.msk.f32.gmra.mxu3 %vm283_vm2, %v4673_v14  ;;  %v998_v56 = vld [vmem:[#allocation2 + $0x144] sm:$0xff] }
 0x17c   : > { %964 = vst.msk [vmem:[#allocation3 + $0xf8] sm:$0xff] %vm938_vm6, %v893_v6  ;;  %v791_v6 = vld [vmem:[#allocation2 + $0x9b] sm:$0xff] }
 0x17d   : > { %1441 = vrot.lane.b32.xlu2 %v1367_v3, %s4066_s7 }
 0x17e   : > { %v1279_v8 = vpop.permute.xlu2 %1278 }
 0x17f   : > { %864 = vrot.lane.b32.xlu0 %v789_v15, %s4065_s6 }
 0x181   : > { %1250 = vrot.lane.b32.xlu1 %v1175_v10, %s4063_s4  ;;  %v1044_v19 = vpop.permute.xlu0 %1043  ;;  %v984_v10 = vld [vmem:[#allocation2 + $0x9c] sm:$0xff] }
 0x182   : > { %1136 = vst.msk [vmem:[#allocation3 + $0x50] sm:$0xff] %vm1131_vm7, %v1044_v19  ;;  %v792_v19 = vld [vmem:[#allocation2 + $0xab] sm:$0xff] }
 0x183   : > { %v1430_v13 = vpop.permute.xlu1 %1429  ;;  %1329 = vst.msk [vmem:[#allocation3 + $0x50] sm:$0xff] %vm1324_vm8, %v1237_v63  ;;  %v1384_v63 = vld [vmem:[#allocation2 + $0x146] sm:$0xff] }
 0x184   : > { %1522 = vst.msk [vmem:[#allocation3 + $0x50] sm:$0xff] %vm1517_vm9, %v1430_v13  ;;  %v235_v13 = vld [vmem:[%s4149_s28 + $0x80] sm:$0xff] }
 0x185   : > { %508 = vrot.lane.b32.xlu2 %v418_v11, %s4061_s29  ;;  %v1178_v11 = vld [vmem:[#allocation2 + $0xad] sm:$0xff]  ;;  %267 = vst.msk [vmem:[#allocation2 + $0xc3] sm:$0xff] %vm169_vm0, %v235_v13 }
 0x186   : > { %v853_v0 = vpop.permute.xlu2 %852 }
 0x187   : > { %894 = vrot.lane.b32.xlu0 %v804_v23, %s4065_s6 }
 0x189   : > { %1280 = vrot.lane.b32.xlu1 %v1190_v16, %s4063_s4  ;;  %v1086_v27 = vpop.permute.xlu0 %1085 }
 0x18a   : > { %1157 = vst.msk [vmem:[#allocation3 + $0xf8] sm:$0xff] %vm1131_vm7, %v1086_v27 }
 0x18b   : > { %v660_v20 = vpop.permute.xlu1 %659  ;;  %1350 = vst.msk [vmem:[#allocation3 + $0xf8] sm:$0xff] %vm1324_vm8, %v1279_v8  ;;  %v1843_v29 = vld [vmem:[#allocation3 + $0x50] sm:$0xff] }
 0x18c   : > { %751 = vst.msk [vmem:[#allocation3 + $0x58] sm:$0xff] %vm745_vm5, %v660_v20  ;;  %3721 = vmatmul.msk.f32.gmra.mxu1 %vm283_vm2, %v1843_v29  ;;  %3756 = vmatmul.msk.f32.gmra.mxu2 %vm283_vm2, %v1843_v29  ;;  %v339_v20 = vld [vmem:[#allocation2 + $0x80] sm:$0xff] }
 0x18d   : > { %1057 = vrot.lane.b32.xlu2 %v982_v17, %s4064_s5  ;;  %944 = vst.msk [vmem:[#allocation3 + $0x58] sm:$0xff] %vm938_vm6, %v853_v0  ;;  %3686 = vmatmul.msk.f32.gmra.mxu0 %vm283_vm2, %v1843_v29  ;;  %v406_v17 = vld [vmem:[#allocation2 + $0xa9] sm:$0xff]  ;;  %v354_v29 = vld [vmem:[#allocation2 + $0x138] sm:$0xff] }
 0x18e   : > { %371 = vst.msk [vmem:[#allocation3 + $0x88] sm:$0xff] %vm169_vm0, %v339_v20 }
 0x18f   : > { %v1432_v21 = vpop.permute.xlu2 %1431  ;;  %1443 = vrot.lane.b32.xlu0 %v1368_v31, %s4066_s7  ;;  %v1179_v31 = vld [vmem:[#allocation2 + $0xb5] sm:$0xff]  ;;  %386 = vst.msk [vmem:[#allocation3 + $0x100] sm:$0xff] %vm169_vm0, %v354_v29 }
 0x191   : > { %673 = vrot.lane.b32.xlu1 %v597_v25, %s4062_s30  ;;  %v1472_v34 = vpop.permute.xlu0 %1471 }
 0x192   : > { %1543 = vst.msk [vmem:[#allocation3 + $0xf8] sm:$0xff] %vm1517_vm9, %v1472_v34  ;;  %v1371_v34 = vld [vmem:[#allocation2 + $0xae] sm:$0xff] }
 0x193   : > { %v1239_v28 = vpop.permute.xlu1 %1238 }
 0x195   : > { %1087 = vrot.lane.b32.xlu2 %v997_v26, %s4064_s5 }
 0x197   : > { %v1048_v30 = vpop.permute.xlu2 %1047  ;;  %480 = vrot.lane.b32.xlu0 %v404_v37, %s4061_s29 }
 0x199   : > { %703 = vrot.lane.b32.xlu1 %v612_v32, %s4062_s30  ;;  %v1046_v40 = vpop.permute.xlu0 %1045  ;;  %v4704_v42 = vld [vmem:[#allocation3 + $0xf8] sm:$0xff] }
 0x19a   : > { %1137 = vst.msk [vmem:[#allocation3 + $0x58] sm:$0xff] %vm1131_vm7, %v1046_v40  ;;  %3707 = vmatmul.msk.f32.gmra.mxu3 %vm283_vm2, %v4704_v42  ;;  %v3822_v32 = vld [vmem:[%s5796_s1 + $0x98] sm:$0xf] }
 0x19b   : > { %v855_v35 = vpop.permute.xlu1 %854  ;;  %1330 = vst.msk [vmem:[#allocation3 + $0x58] sm:$0xff] %vm1324_vm8, %v1239_v28  ;;  %v3896_v28 = vld [vmem:[%s5796_s1 + $0xd8] sm:$0xf]  ;;  %3823 = vmatpush.msk.msrb.mxu0 %vm1686_vm4, %v3822_v32 }
 0x19c   : > { %1523 = vst.msk [vmem:[#allocation3 + $0x58] sm:$0xff] %vm1517_vm9, %v1432_v21  ;;  %v236_v21 = vld [vmem:[%s4149_s28 + $0x88] sm:$0xff]  ;;  %3897 = vmatpush.msk.msrb.mxu2 %vm1686_vm4, %v3896_v28  ;;  %v793_v40 = vld [vmem:[#allocation2 + $0xb3] sm:$0xff] }
 0x19d   : > { %1473 = vrot.lane.b32.xlu2 %v1383_v33, %s4066_s7  ;;  %268 = vst.msk [vmem:[#allocation2 + $0xcb] sm:$0xff] %vm169_vm0, %v236_v21  ;;  %v3859_v33 = vld [vmem:[%s5796_s1 + $0xb8] sm:$0xf] }
 0x19e   : > { %3860 = vmatpush.msk.msrb.mxu1 %vm1686_vm4, %v3859_v33  ;;  %v341_v28 = vld [vmem:[#allocation2 + $0x98] sm:$0xff] }
 0x19f   : > { %v664_v36 = vpop.permute.xlu2 %663  ;;  %866 = vrot.lane.b32.xlu0 %v790_v45, %s4065_s6  ;;  %373 = vst.msk [vmem:[#allocation3 + $0x98] sm:$0xff] %vm169_vm0, %v341_v28 }
 0x1a0   : > { %753 = vst.msk [vmem:[#allocation3 + $0x68] sm:$0xff] %vm745_vm5, %v664_v36 }
 0x1a1   : > { %1252 = vrot.lane.b32.xlu1 %v1176_v38, %s4063_s4  ;;  %v662_v50 = vpop.permute.xlu0 %661  ;;  %v407_v38 = vld [vmem:[#allocation2 + $0xb1] sm:$0xff] }
 0x1a2   : > { %752 = vst.msk [vmem:[#allocation3 + $0x60] sm:$0xff] %vm745_vm5, %v662_v50  ;;  %3737 = vmatmul.msk.f32.vlgmr.msrb.gmra.mxu3 %vm283_vm2, %v4530_v22  ;;  %v337_v22 = vld [vmem:[#allocation2 + $0x68] sm:$0xff]  ;;  %v1372_v50 = vld [vmem:[#allocation2 + $0xb6] sm:$0xff] }
 0x1a3   : > { %v1434_v43 = vpop.permute.xlu1 %1433  ;;  %945 = vst.msk [vmem:[#allocation3 + $0x60] sm:$0xff] %vm938_vm6, %v855_v35  ;;  %v1565_v52 = vld [vmem:[#allocation3 + $0x58] sm:$0xff] }
 0x1a4   : > { %1138 = vst.msk [vmem:[#allocation3 + $0x60] sm:$0xff] %vm1131_vm7, %v1048_v30  ;;  %3687 = vmatmul.msk.f32.gmra.mxu0 %vm283_vm2, %v1565_v52  ;;  %3722 = vmatmul.msk.f32.gmra.mxu1 %vm283_vm2, %v1565_v52  ;;  %v985_v30 = vld [vmem:[#allocation2 + $0xac] sm:$0xff] }
 0x1a5   : > { %510 = vrot.lane.b32.xlu2 %v419_v39, %s4061_s29  ;;  %3757 = vmatmul.msk.f32.gmra.mxu2 %vm283_vm2, %v1565_v52  ;;  %369 = vst.msk [vmem:[#allocation3 + $0x78] sm:$0xff] %vm169_vm0, %v337_v22  ;;  %v601_v39 = vld [vmem:[#allocation2 + $0xc2] sm:$0xff]  ;;  %v988_v13 = vld [vmem:[#allocation2 + $0xcc] sm:$0xff] }
 0x1a6   : > { %v1180_v49 = vld [vmem:[#allocation2 + $0xc5] sm:$0xff] }
 0x1a7   : > { %v1243_v44 = vpop.permute.xlu2 %1242  ;;  %896 = vrot.lane.b32.xlu0 %v805_v54, %s4065_s6  ;;  %v794_v22 = vld [vmem:[#allocation2 + $0xc3] sm:$0xff] }
 0x1a9   : > { %1282 = vrot.lane.b32.xlu1 %v1191_v46, %s4063_s4  ;;  %v1241_v57 = vpop.permute.xlu0 %1240 }
 0x1aa   : > { %1331 = vst.msk [vmem:[#allocation3 + $0x60] sm:$0xff] %vm1324_vm8, %v1241_v57  ;;  %3738 = vmatmul.msk.f32.gmra.mxu3 %vm283_vm2, %v4564_v48  ;;  %v340_v57 = vld [vmem:[#allocation2 + $0x90] sm:$0xff] }
 0x1ab   : > { %v1050_v51 = vpop.permute.xlu1 %1049  ;;  %1524 = vst.msk [vmem:[#allocation3 + $0x60] sm:$0xff] %vm1517_vm9, %v1434_v43 }
 0x1ac   : > { %372 = vst.msk [vmem:[#allocation3 + $0x90] sm:$0xff] %vm169_vm0, %v340_v57  ;;  %v4928_v57 = vld [vmem:[#allocation3 + $0xe0] sm:$0xff] }
 0x1ad   : > { %1059 = vrot.lane.b32.xlu2 %v983_v47, %s4064_s5  ;;  %v986_v47 = vld [vmem:[#allocation2 + $0xb4] sm:$0xff] }
 0x1af   : > { %v859_v53 = vpop.permute.xlu2 %858  ;;  %1445 = vrot.lane.b32.xlu0 %v1369_v61, %s4066_s7 }
 0x1b1   : > { %675 = vrot.lane.b32.xlu1 %v598_v55, %s4062_s30  ;;  %v857_v1 = vpop.permute.xlu0 %856  ;;  %v408_v55 = vld [vmem:[#allocation2 + $0xc1] sm:$0xff] }
 0x1b2   : > { %946 = vst.msk [vmem:[#allocation3 + $0x68] sm:$0xff] %vm938_vm6, %v857_v1  ;;  %3739 = vmatmul.msk.f32.gmra.mxu3 %vm283_vm2, %v4606_v24  ;;  %v1566_v48 = vld [vmem:[#allocation3 + $0x60] sm:$0xff]  ;;  %v338_v24 = vld [vmem:[#allocation2 + $0x78] sm:$0xff] }
 0x1b3   : > { %v666_v58 = vpop.permute.xlu1 %665  ;;  %1139 = vst.msk [vmem:[#allocation3 + $0x68] sm:$0xff] %vm1131_vm7, %v1050_v51  ;;  %3688 = vmatmul.msk.f32.gmra.mxu0 %vm283_vm2, %v1566_v48  ;;  %3723 = vmatmul.msk.f32.gmra.mxu1 %vm283_vm2, %v1566_v48  ;;  %v247_v51 = vld [vmem:[%s4149_s28 + $0xe0] sm:$0xff] }
 0x1b4   : > { %754 = vst.msk [vmem:[#allocation3 + $0x70] sm:$0xff] %vm745_vm5, %v666_v58  ;;  %3758 = vmatmul.msk.f32.gmra.mxu2 %vm283_vm2, %v1566_v48  ;;  %v248_v58 = vld [vmem:[%s4149_s28 + $0xe8] sm:$0xff] }
 0x1b5   : > { %1089 = vrot.lane.b32.xlu2 %v998_v56, %s4064_s5  ;;  %947 = vst.msk [vmem:[#allocation3 + $0x70] sm:$0xff] %vm938_vm6, %v859_v53  ;;  %v602_v56 = vld [vmem:[#allocation2 + $0xca] sm:$0xff] }
 0x1b6   : > { %1332 = vst.msk [vmem:[#allocation3 + $0x68] sm:$0xff] %vm1324_vm8, %v1243_v44  ;;  %v987_v1 = vld [vmem:[#allocation2 + $0xc4] sm:$0xff] }
 0x1b7   : > { %v1438_v59 = vpop.permute.xlu2 %1437  ;;  %482 = vrot.lane.b32.xlu0 %v405_v4, %s4061_s29  ;;  %370 = vst.msk [vmem:[#allocation3 + $0x80] sm:$0xff] %vm169_vm0, %v338_v24  ;;  %v1373_v48 = vld [vmem:[#allocation2 + $0xc6] sm:$0xff] }
 0x1b8   : > { %279 = vst.msk [vmem:[#allocation2 + $0x153] sm:$0xff] %vm169_vm0, %v247_v51 }
 0x1b9   : > { %1254 = vrot.lane.b32.xlu1 %v1177_v62, %s4063_s4  ;;  %v1436_v7 = vpop.permute.xlu0 %1435  ;;  %280 = vst.msk [vmem:[#allocation2 + $0x15b] sm:$0xff] %vm169_vm0, %v248_v58 }
 0x1ba   : > { %1525 = vst.msk [vmem:[#allocation3 + $0x68] sm:$0xff] %vm1517_vm9, %v1436_v7  ;;  %3740 = vmatmul.msk.f32.gmra.mxu3 %vm283_vm2, %v4628_v41  ;;  %v795_v7 = vld [vmem:[#allocation2 + $0xcb] sm:$0xff] }
 0x1bb   : > { %v1245_v2 = vpop.permute.xlu1 %1244 }
 0x1bd   : > { %1475 = vrot.lane.b32.xlu2 %v1384_v63, %s4066_s7  ;;  %v355_v63 = vld [vmem:[#allocation2 + $0x140] sm:$0xff] }
 0x1be   : > { %387 = vst.msk [vmem:[#allocation3 + $0x108] sm:$0xff] %vm169_vm0, %v355_v63 }
 0x1bf   : > { %v861_v3 = vpop.permute.xlu2 %860  ;;  %1061 = vrot.lane.b32.xlu0 %v984_v10, %s4064_s5  ;;  %v613_v24 = vld [vmem:[#allocation2 + $0x152] sm:$0xff] }
 0x1c0   : > { %v3895_v10 = vld [vmem:[%s5796_s1 + $0xd0] sm:$0xff]  ;;  %v614_v21 = vld [vmem:[#allocation2 + $0x15a] sm:$0xff] }
 0x1c1   : > { %677 = vrot.lane.b32.xlu1 %v599_v5, %s4062_s30  ;;  %v1052_v0 = vpop.permute.xlu0 %1051  ;;  %v1567_v15 = vld [vmem:[#allocation3 + $0x68] sm:$0xff]  ;;  %3389 = vmatpush.msrb.mxu2 %v3895_v10  ;;  %v1193_v32 = vld [vmem:[#allocation2 + $0x15d] sm:$0xff]  ;;  %v3785_v10 = vld [vmem:[%s5796_s1 + $0x78] sm:$0xf] }
 0x1c2   : > { %1140 = vst.msk [vmem:[#allocation3 + $0x70] sm:$0xff] %vm1131_vm7, %v1052_v0  ;;  %3689 = vmatmul.msk.f32.gmra.mxu0 %vm283_vm2, %v1567_v15  ;;  %3724 = vmatmul.msk.f32.gmra.mxu1 %vm283_vm2, %v1567_v15  ;;  %v1192_v0 = vld [vmem:[#allocation2 + $0x155] sm:$0xff] }
 0x1c3   : > { %v668_v8 = vpop.permute.xlu1 %667  ;;  %1333 = vst.msk [vmem:[#allocation3 + $0x70] sm:$0xff] %vm1324_vm8, %v1245_v2  ;;  %3741 = vmatmul.msk.f32.gmra.mxu3 %vm283_vm2, %v4673_v14  ;;  %3759 = vmatmul.msk.f32.gmra.mxu2 %vm283_vm2, %v1567_v15  ;;  %v1181_v2 = vld [vmem:[#allocation2 + $0xcd] sm:$0xff]  ;;  %v1385_v33 = vld [vmem:[#allocation2 + $0x156] sm:$0xff] }
 0x1c4   : > { %1526 = vst.msk [vmem:[#allocation3 + $0x70] sm:$0xff] %vm1517_vm9, %v1438_v59  ;;  %v1374_v15 = vld [vmem:[#allocation2 + $0xce] sm:$0xff]  ;;  %3786 = vmatpush.msk.msrb.mxu3 %vm1686_vm4, %v3785_v10 }
 0x1c5   : > { %868 = vrot.lane.b32.xlu2 %v791_v6, %s4065_s6  ;;  %v409_v6 = vld [vmem:[#allocation2 + $0xc9] sm:$0xff] }
 0x1c7   : > { %v1440_v9 = vpop.permute.xlu2 %1439  ;;  %484 = vrot.lane.b32.xlu0 %v406_v17, %s4061_s29 }
 0x1c9   : > { %1256 = vrot.lane.b32.xlu1 %v1178_v11, %s4063_s4  ;;  %v475_v23 = vpop.permute.xlu0 %474 }
 0x1ca   : > { %562 = vst.msk [vmem:[#allocation3 + $0x78] sm:$0xff] %vm552_vm3, %v475_v23  ;;  %v806_v23 = vld [vmem:[#allocation2 + $0x153] sm:$0xff] }
 0x1cb   : > { %v1247_v16 = vpop.permute.xlu1 %1246  ;;  %755 = vst.msk [vmem:[#allocation3 + $0x78] sm:$0xff] %vm745_vm5, %v668_v8  ;;  %3742 = vmatmul.msk.f32.gmra.mxu3 %vm283_vm2, %v4704_v42  ;;  %v4778_v26 = vld [vmem:[#allocation3 + $0x70] sm:$0xff] }
 0x1cc   : > { %948 = vst.msk [vmem:[#allocation3 + $0x78] sm:$0xff] %vm938_vm6, %v861_v3  ;;  %3690 = vmatmul.msk.f32.gmra.mxu0 %vm283_vm2, %v4778_v26  ;;  %3725 = vmatmul.msk.f32.gmra.mxu1 %vm283_vm2, %v4778_v26 }
 0x1cd   : > { %1447 = vrot.lane.b32.xlu2 %v1370_v12, %s4066_s7  ;;  %3760 = vmatmul.msk.f32.gmra.mxu2 %vm283_vm2, %v4778_v26  ;;  %v3821_v12 = vld [vmem:[%s5796_s1 + $0x90] sm:$0xff] }
 0x1ce   : > { %2827 = vmatpush.msrb.mxu0 %v3821_v12  ;;  %v4969_v12 = vpop.f32.mrf.mxu1 }
 0x1cf   : > { %v863_v41 = vpop.permute.xlu2 %862  ;;  %1063 = vrot.lane.b32.xlu0 %v985_v30, %s4064_s5 }
 0x1d1   : > { %679 = vrot.lane.b32.xlu1 %v600_v18, %s4062_s30  ;;  %v1054_v35 = vpop.permute.xlu0 %1053 }
 0x1d2   : > { %1141 = vst.msk [vmem:[#allocation3 + $0x78] sm:$0xff] %vm1131_vm7, %v1054_v35 }
 0x1d3   : > { %v670_v25 = vpop.permute.xlu1 %669  ;;  %1334 = vst.msk [vmem:[#allocation3 + $0x78] sm:$0xff] %vm1324_vm8, %v1247_v16  ;;  %v3858_v16 = vld [vmem:[%s5796_s1 + $0xb0] sm:$0xff] }
 0x1d4   : > { %1527 = vst.msk [vmem:[#allocation3 + $0x78] sm:$0xff] %vm1517_vm9, %v1440_v9  ;;  %3108 = vmatpush.msrb.mxu1 %v3858_v16 }
 0x1d5   : > { %870 = vrot.lane.b32.xlu2 %v792_v19, %s4065_s6  ;;  %v420_v19 = vld [vmem:[#allocation2 + $0x151] sm:$0xff] }
 0x1d7   : > { %v1442_v27 = vpop.permute.xlu2 %1441  ;;  %486 = vrot.lane.b32.xlu0 %v407_v38, %s4061_s29  ;;  %v807_v38 = vld [vmem:[#allocation2 + $0x15b] sm:$0xff] }
 0x1d9   : > { %1258 = vrot.lane.b32.xlu1 %v1179_v31, %s4063_s4  ;;  %v477_v43 = vpop.permute.xlu0 %476  ;;  %v999_v31 = vld [vmem:[#allocation2 + $0x154] sm:$0xff] }
 0x1da   : > { %563 = vst.msk [vmem:[#allocation3 + $0x80] sm:$0xff] %vm552_vm3, %v477_v43 }
 0x1db   : > { %v1249_v36 = vpop.permute.xlu1 %1248  ;;  %756 = vst.msk [vmem:[#allocation3 + $0x80] sm:$0xff] %vm745_vm5, %v670_v25  ;;  %v4812_v45 = vld [vmem:[#allocation3 + $0x78] sm:$0xff] }
 0x1dc   : > { %949 = vst.msk [vmem:[#allocation3 + $0x80] sm:$0xff] %vm938_vm6, %v863_v41  ;;  %3691 = vmatmul.msk.f32.gmra.mxu0 %vm283_vm2, %v4812_v45  ;;  %3726 = vmatmul.msk.f32.gmra.mxu1 %vm283_vm2, %v4812_v45 }
 0x1dd   : > { %1449 = vrot.lane.b32.xlu2 %v1371_v34, %s4066_s7  ;;  %3761 = vmatmul.msk.f32.gmra.mxu2 %vm283_vm2, %v4812_v45 }
 0x1df   : > { %v509_v37 = vpop.permute.xlu2 %508  ;;  %1065 = vrot.lane.b32.xlu0 %v986_v47, %s4064_s5  ;;  %v1386_v47 = vld [vmem:[#allocation2 + $0x15e] sm:$0xff] }
 0x1e0   : > { %579 = vst.msk [vmem:[#allocation3 + $0x100] sm:$0xff] %vm552_vm3, %v509_v37  ;;  %v421_v37 = vld [vmem:[#allocation2 + $0x159] sm:$0xff] }
 0x1e1   : > { %681 = vrot.lane.b32.xlu1 %v601_v39, %s4062_s30  ;;  %v1056_v52 = vpop.permute.xlu0 %1055  ;;  %v342_v39 = vld [vmem:[#allocation2 + $0xa8] sm:$0xff] }
 0x1e2   : > { %1142 = vst.msk [vmem:[#allocation3 + $0x80] sm:$0xff] %vm1131_vm7, %v1056_v52 }
 0x1e3   : > { %v672_v44 = vpop.permute.xlu1 %671  ;;  %1335 = vst.msk [vmem:[#allocation3 + $0x80] sm:$0xff] %vm1324_vm8, %v1249_v36 }
 0x1e4   : > { %1528 = vst.msk [vmem:[#allocation3 + $0x80] sm:$0xff] %vm1517_vm9, %v1442_v27 }
 0x1e5   : > { %872 = vrot.lane.b32.xlu2 %v793_v40, %s4065_s6  ;;  %374 = vst.msk [vmem:[#allocation3 + $0xa0] sm:$0xff] %vm169_vm0, %v342_v39 }
 0x1e7   : > { %v1058_v46 = vpop.permute.xlu2 %1057  ;;  %488 = vrot.lane.b32.xlu0 %v408_v55, %s4061_s29 }
 0x1e9   : > { %1260 = vrot.lane.b32.xlu1 %v1180_v49, %s4063_s4  ;;  %v479_v59 = vpop.permute.xlu0 %478 }
 0x1ea   : > { %564 = vst.msk [vmem:[#allocation3 + $0x88] sm:$0xff] %vm552_vm3, %v479_v59  ;;  %v3820_v59 = vld [vmem:[%s5796_s1 + $0x88] sm:$0xff] }
 0x1eb   : > { %v702_v53 = vpop.permute.xlu1 %701  ;;  %757 = vst.msk [vmem:[#allocation3 + $0x88] sm:$0xff] %vm745_vm5, %v672_v44  ;;  %v4838_v61 = vld [vmem:[#allocation3 + $0x80] sm:$0xff]  ;;  %2828 = vmatpush.msrb.mxu0 %v3820_v59 }
 0x1ec   : > { %772 = vst.msk [vmem:[#allocation3 + $0x100] sm:$0xff] %vm745_vm5, %v702_v53  ;;  %3692 = vmatmul.msk.f32.gmra.mxu0 %vm283_vm2, %v4838_v61  ;;  %3727 = vmatmul.msk.f32.gmra.mxu1 %vm283_vm2, %v4838_v61  ;;  %v343_v53 = vld [vmem:[#allocation2 + $0xb0] sm:$0xff] }
 0x1ed   : > { %1451 = vrot.lane.b32.xlu2 %v1372_v50, %s4066_s7  ;;  %3762 = vmatmul.msk.f32.gmra.mxu2 %vm283_vm2, %v4838_v61  ;;  %375 = vst.msk [vmem:[#allocation3 + $0xa8] sm:$0xff] %vm169_vm0, %v343_v53 }
 0x1ef   : > { %v1088_v54 = vpop.permute.xlu2 %1087  ;;  %1067 = vrot.lane.b32.xlu0 %v987_v1, %s4064_s5  ;;  %v4939_v1 = vpop.f32.mrf.mxu0 }
 0x1f1   : > { %683 = vrot.lane.b32.xlu1 %v602_v56, %s4062_s30  ;;  %v865_v3 = vpop.permute.xlu0 %864 }
 0x1f2   : > { %950 = vst.msk [vmem:[#allocation3 + $0x88] sm:$0xff] %vm938_vm6, %v865_v3 }
 0x1f3   : > { %v1251_v60 = vpop.permute.xlu1 %1250  ;;  %1143 = vst.msk [vmem:[#allocation3 + $0x88] sm:$0xff] %vm1131_vm7, %v1058_v46  ;;  %v1000_v46 = vld [vmem:[#allocation2 + $0x15c] sm:$0xff] }
 0x1f4   : > { %1336 = vst.msk [vmem:[#allocation3 + $0x88] sm:$0xff] %vm1324_vm8, %v1251_v60  ;;  %v3857_v60 = vld [vmem:[%s5796_s1 + $0xa8] sm:$0xff] }
 0x1f5   : > { %874 = vrot.lane.b32.xlu2 %v794_v22, %s4065_s6  ;;  %v3894_v22 = vld [vmem:[%s5796_s1 + $0xc8] sm:$0xff]  ;;  %3109 = vmatpush.msrb.mxu1 %v3857_v60 }
 0x1f6   : > { %3390 = vmatpush.msrb.mxu2 %v3894_v22 }
 0x1f7   : > { %v1474_v62 = vpop.permute.xlu2 %1473  ;;  %490 = vrot.lane.b32.xlu0 %v409_v6, %s4061_s29 }
 0x1f9   : > { %1262 = vrot.lane.b32.xlu1 %v1181_v2, %s4063_s4  ;;  %v895_v8 = vpop.permute.xlu0 %894  ;;  %v4943_v2 = vld [vmem:[#allocation3 + $0xe8] sm:$0xff] }
 0x1fa   : > { %965 = vst.msk [vmem:[#allocation3 + $0x100] sm:$0xff] %vm938_vm6, %v895_v8 }
 0x1fb   : > { %v1281_v4 = vpop.permute.xlu1 %1280  ;;  %1158 = vst.msk [vmem:[#allocation3 + $0x100] sm:$0xff] %vm1131_vm7, %v1088_v54 }
 0x1fc   : > { %1351 = vst.msk [vmem:[#allocation3 + $0x100] sm:$0xff] %vm1324_vm8, %v1281_v4 }
 0x1fd   : > { %1453 = vrot.lane.b32.xlu2 %v1373_v48, %s4066_s7  ;;  %1544 = vst.msk [vmem:[#allocation3 + $0x100] sm:$0xff] %vm1517_vm9, %v1474_v62  ;;  %v344_v48 = vld [vmem:[#allocation2 + $0xc0] sm:$0xff] }
 0x1fe   : > { %376 = vst.msk [vmem:[#allocation3 + $0xb0] sm:$0xff] %vm169_vm0, %v344_v48  ;;  %v3782_v48 = vld [vmem:[%s5796_s1 + $0x60] sm:$0xff] }
 0x1ff   : > { %v511_v5 = vpop.permute.xlu2 %510  ;;  %1069 = vrot.lane.b32.xlu0 %v988_v13, %s4064_s5 }
 0x200   : > { %580 = vst.msk [vmem:[#allocation3 + $0x108] sm:$0xff] %vm552_vm3, %v511_v5 }
 0x201   : > { %705 = vrot.lane.b32.xlu1 %v613_v24, %s4062_s30  ;;  %v1444_v41 = vpop.permute.xlu0 %1443  ;;  %v4957_v24 = vpop.f32.mrf.mxu0 }
 0x202   : > { %1529 = vst.msk [vmem:[#allocation3 + $0x88] sm:$0xff] %vm1517_vm9, %v1444_v41  ;;  %v4992_v41 = vpop.f32.mrf.mxu1 }
 0x203   : > { %v674_v9 = vpop.permute.xlu1 %673 }
 0x204   : > { %v4875_v20 = vld [vmem:[#allocation3 + $0x100] sm:$0xff] }
 0x205   : > { %876 = vrot.lane.b32.xlu2 %v795_v7, %s4065_s6  ;;  %3743 = vmatmul.msk.f32.gmra.mxu3 %vm283_vm2, %v4875_v20 }
 0x207   : > { %v1060_v11 = vpop.permute.xlu2 %1059  ;;  %512 = vrot.lane.b32.xlu0 %v420_v19, %s4061_s29 }
 0x209   : > { %1284 = vrot.lane.b32.xlu1 %v1192_v0, %s4063_s4  ;;  %v481_v25 = vpop.permute.xlu0 %480  ;;  %v4881_v27 = vld [vmem:[#allocation3 + $0x88] sm:$0xff] }
 0x20a   : > { %565 = vst.msk [vmem:[#allocation3 + $0x90] sm:$0xff] %vm552_vm3, %v481_v25  ;;  %3693 = vmatmul.msk.f32.gmra.mxu0 %vm283_vm2, %v4881_v27  ;;  %3728 = vmatmul.msk.f32.gmra.mxu1 %vm283_vm2, %v4881_v27  ;;  %v5007_v28 = vpop.f32.mrf.mxu1 }
 0x20b   : > { %v704_v17 = vpop.permute.xlu1 %703  ;;  %758 = vst.msk [vmem:[#allocation3 + $0x90] sm:$0xff] %vm745_vm5, %v674_v9  ;;  %3763 = vmatmul.msk.f32.gmra.mxu2 %vm283_vm2, %v4881_v27 }
 0x20c   : > { %773 = vst.msk [vmem:[#allocation3 + $0x108] sm:$0xff] %vm745_vm5, %v704_v17 }
 0x20d   : > { %1455 = vrot.lane.b32.xlu2 %v1374_v15, %s4066_s7 }
 0x20f   : > { %v1090_v18 = vpop.permute.xlu2 %1089  ;;  %1091 = vrot.lane.b32.xlu0 %v999_v31, %s4064_s5 }
 0x211   : > { %707 = vrot.lane.b32.xlu1 %v614_v21, %s4062_s30  ;;  %v867_v34 = vpop.permute.xlu0 %866  ;;  %v3784_v21 = vld [vmem:[%s5796_s1 + $0x70] sm:$0xff] }
 0x212   : > { %951 = vst.msk [vmem:[#allocation3 + $0x90] sm:$0xff] %vm938_vm6, %v867_v34  ;;  %2546 = vmatpush.msrb.mxu3 %v3784_v21  ;;  %v3856_v34 = vld [vmem:[%s5796_s1 + $0xa0] sm:$0xff] }
 0x213   : > { %v1253_v29 = vpop.permute.xlu1 %1252  ;;  %1144 = vst.msk [vmem:[#allocation3 + $0x90] sm:$0xff] %vm1131_vm7, %v1060_v11  ;;  %v345_v11 = vld [vmem:[#allocation2 + $0xc8] sm:$0xff]  ;;  %3110 = vmatpush.msrb.mxu1 %v3856_v34 }
 0x214   : > { %1337 = vst.msk [vmem:[#allocation3 + $0x90] sm:$0xff] %vm1324_vm8, %v1253_v29 }
 0x215   : > { %898 = vrot.lane.b32.xlu2 %v806_v23, %s4065_s6  ;;  %377 = vst.msk [vmem:[#allocation3 + $0xb8] sm:$0xff] %vm169_vm0, %v345_v11  ;;  %v356_v23 = vld [vmem:[#allocation2 + $0x150] sm:$0xff] }
 0x216   : > { %388 = vst.msk [vmem:[#allocation3 + $0x110] sm:$0xff] %vm169_vm0, %v356_v23 }
 0x217   : > { %v1476_v30 = vpop.permute.xlu2 %1475  ;;  %514 = vrot.lane.b32.xlu0 %v421_v37, %s4061_s29 }
 0x219   : > { %1286 = vrot.lane.b32.xlu1 %v1193_v32, %s4063_s4  ;;  %v897_v40 = vpop.permute.xlu0 %896 }
 0x21a   : > { %966 = vst.msk [vmem:[#allocation3 + $0x108] sm:$0xff] %vm938_vm6, %v897_v40  ;;  %v5036_v40 = vpop.f32.mrf.mxu1 }
 0x21b   : > { %v1283_v35 = vpop.permute.xlu1 %1282  ;;  %1159 = vst.msk [vmem:[#allocation3 + $0x108] sm:$0xff] %vm1131_vm7, %v1090_v18 }
 0x21c   : > { %1352 = vst.msk [vmem:[#allocation3 + $0x108] sm:$0xff] %vm1324_vm8, %v1283_v35 }
 0x21d   : > { %1477 = vrot.lane.b32.xlu2 %v1385_v33, %s4066_s7  ;;  %1545 = vst.msk [vmem:[#allocation3 + $0x108] sm:$0xff] %vm1517_vm9, %v1476_v30  ;;  %v3893_v30 = vld [vmem:[%s5796_s1 + $0xc0] sm:$0xff] }
 0x21e   : > { %3391 = vmatpush.msrb.mxu2 %v3893_v30  ;;  %v3819_v33 = vld [vmem:[%s5796_s1 + $0x80] sm:$0xff] }
 0x21f   : > { %v869_v36 = vpop.permute.xlu2 %868  ;;  %1093 = vrot.lane.b32.xlu0 %v1000_v46, %s4064_s5  ;;  %2829 = vmatpush.msrb.mxu0 %v3819_v33 }
 0x221   : > { %v1446_v49 = vpop.permute.xlu0 %1445 }
 0x222   : > { %1530 = vst.msk [vmem:[#allocation3 + $0x90] sm:$0xff] %vm1517_vm9, %v1446_v49  ;;  %v357_v49 = vld [vmem:[#allocation2 + $0x158] sm:$0xff] }
 0x223   : > { %v676_v43 = vpop.permute.xlu1 %675  ;;  %389 = vst.msk [vmem:[#allocation3 + $0x118] sm:$0xff] %vm169_vm0, %v357_v49 }
 0x224   : > { %v4909_v52 = vld [vmem:[#allocation3 + $0x108] sm:$0xff] }
 0x225   : > { %900 = vrot.lane.b32.xlu2 %v807_v38, %s4065_s6  ;;  %3744 = vmatmul.msk.f32.gmra.mxu3 %vm283_vm2, %v4909_v52  ;;  %v5033_v38 = vpop.f32.mrf.mxu2 }
 0x227   : > { %v1448_v44 = vpop.permute.xlu2 %1447 }
 0x229   : > { %v483_v54 = vpop.permute.xlu0 %482  ;;  %v4914_v55 = vld [vmem:[#allocation3 + $0x90] sm:$0xff] }
 0x22a   : > { %566 = vst.msk [vmem:[#allocation3 + $0x98] sm:$0xff] %vm552_vm3, %v483_v54  ;;  %3694 = vmatmul.msk.f32.gmra.mxu0 %vm283_vm2, %v4914_v55  ;;  %3729 = vmatmul.msk.f32.gmra.mxu1 %vm283_vm2, %v4914_v55  ;;  %v5059_v54 = vpop.f32.mrf.mxu1 }
 0x22b   : > { %v1255_v50 = vpop.permute.xlu1 %1254  ;;  %759 = vst.msk [vmem:[#allocation3 + $0x98] sm:$0xff] %vm745_vm5, %v676_v43  ;;  %3764 = vmatmul.msk.f32.gmra.mxu2 %vm283_vm2, %v4914_v55 }
 0x22c   : > { %952 = vst.msk [vmem:[#allocation3 + $0x98] sm:$0xff] %vm938_vm6, %v869_v36 }
 0x22d   : > { %1479 = vrot.lane.b32.xlu2 %v1386_v47, %s4066_s7  ;;  %3774 = vmatmul.msk.f32.vlgmr.msra.gmra.mxu3 %vm283_vm2, %v4928_v57 }
 0x22f   : > { %v871_v51 = vpop.permute.xlu2 %870 }
 0x231   : > { %v1062_v62 = vpop.permute.xlu0 %1061 }
 0x232   : > { %1145 = vst.msk [vmem:[#allocation3 + $0x98] sm:$0xff] %vm1131_vm7, %v1062_v62 }
 0x233   : > { %v678_v56 = vpop.permute.xlu1 %677  ;;  %1338 = vst.msk [vmem:[#allocation3 + $0x98] sm:$0xff] %vm1324_vm8, %v1255_v50 }
 0x234   : > { %1531 = vst.msk [vmem:[#allocation3 + $0x98] sm:$0xff] %vm1517_vm9, %v1448_v44  ;;  %v3783_v44 = vld [vmem:[%s5796_s1 + $0x68] sm:$0xff] }
 0x235   : > { %3775 = vmatmul.msk.f32.gmra.mxu3 %vm283_vm2, %v4943_v2 }
 0x236   : > { %2547 = vmatpush.msrb.mxu3 %v3783_v44 }
 0x237   : > { %v1450_v58 = vpop.permute.xlu2 %1449 }
 0x238   : > { %2548 = vmatpush.msrb.mxu3 %v3782_v48  ;;  %v5148_v48 = vld [vmem:[#allocation3 + $0xd0] sm:$0xff] }
 0x239   : > { %v485_v4 = vpop.permute.xlu0 %484 }
 0x23a   : > { %567 = vst.msk [vmem:[#allocation3 + $0xa0] sm:$0xff] %vm552_vm3, %v485_v4 }
 0x23b   : > { %v1257_v63 = vpop.permute.xlu1 %1256  ;;  %760 = vst.msk [vmem:[#allocation3 + $0xa0] sm:$0xff] %vm745_vm5, %v678_v56  ;;  %v4950_v6 = vld [vmem:[#allocation3 + $0x98] sm:$0xff] }
 0x23c   : > { %953 = vst.msk [vmem:[#allocation3 + $0xa0] sm:$0xff] %vm938_vm6, %v871_v51  ;;  %3695 = vmatmul.msk.f32.gmra.mxu0 %vm283_vm2, %v4950_v6  ;;  %3730 = vmatmul.msk.f32.gmra.mxu1 %vm283_vm2, %v4950_v6 }
 0x23d   : > { %3765 = vmatmul.msk.f32.gmra.mxu2 %vm283_vm2, %v4950_v6  ;;  %3776 = vmatmul.msk.f32.gmra.mxu3 %vm283_vm2, %v4673_v14  ;;  %v4975_v14 = vpop.f32.mrf.mxu0 }
 0x23f   : > { %v873_v3 = vpop.permute.xlu2 %872 }
 0x241   : > { %v1064_v7 = vpop.permute.xlu0 %1063 }
 0x242   : > { %1146 = vst.msk [vmem:[#allocation3 + $0xa0] sm:$0xff] %vm1131_vm7, %v1064_v7 }
 0x243   : > { %v680_v5 = vpop.permute.xlu1 %679  ;;  %1339 = vst.msk [vmem:[#allocation3 + $0xa0] sm:$0xff] %vm1324_vm8, %v1257_v63  ;;  %v5072_v63 = vpop.f32.mrf.mxu1 }
 0x244   : > { %1532 = vst.msk [vmem:[#allocation3 + $0xa0] sm:$0xff] %vm1517_vm9, %v1450_v58 }
 0x245   : > { %3777 = vmatmul.msk.f32.gmra.mxu3 %vm283_vm2, %v4704_v42  ;;  %v4990_v42 = vpop.f32.mrf.mxu3  ;;  %v4994_v17 = vpop.f32.mrf.mxu0 }
 0x246   : > { %5801 = vst [vmem:[#allocation7_spill] sm:$0xff] %v4990_v42 }
 0x247   : > { %v1452_v8 = vpop.permute.xlu2 %1451 }
 0x249   : > { %v487_v13 = vpop.permute.xlu0 %486 }
 0x24a   : > { %568 = vst.msk [vmem:[#allocation3 + $0xa8] sm:$0xff] %vm552_vm3, %v487_v13 }
 0x24b   : > { %v1259_v9 = vpop.permute.xlu1 %1258  ;;  %761 = vst.msk [vmem:[#allocation3 + $0xa8] sm:$0xff] %vm745_vm5, %v680_v5  ;;  %v4979_v15 = vld [vmem:[#allocation3 + $0xa0] sm:$0xff]  ;;  %v5092_v10 = vpop.f32.mrf.mxu1 }
 0x24c   : > { %954 = vst.msk [vmem:[#allocation3 + $0xa8] sm:$0xff] %vm938_vm6, %v873_v3  ;;  %3696 = vmatmul.msk.f32.gmra.mxu0 %vm283_vm2, %v4979_v15  ;;  %3731 = vmatmul.msk.f32.gmra.mxu1 %vm283_vm2, %v4979_v15 }
 0x24d   : > { %3766 = vmatmul.msk.f32.gmra.mxu2 %vm283_vm2, %v4979_v15  ;;  %3778 = vmatmul.msk.f32.gmra.mxu3 %vm283_vm2, %v4875_v20  ;;  %v5005_v25 = vpop.f32.mrf.mxu3  ;;  %v5013_v31 = vpop.f32.mrf.mxu0 }
 0x24e   : > { %5802 = vst [vmem:[#allocation8_spill] sm:$0xff] %v5005_v25 }
 0x24f   : > { %v875_v16 = vpop.permute.xlu2 %874 }
 0x251   : > { %v1066_v18 = vpop.permute.xlu0 %1065 }
 0x252   : > { %1147 = vst.msk [vmem:[#allocation3 + $0xa8] sm:$0xff] %vm1131_vm7, %v1066_v18  ;;  %v5102_v18 = vld [vmem:[#allocation3 + $0xc0] sm:$0xff] }
 0x253   : > { %v682_v0 = vpop.permute.xlu1 %681  ;;  %1340 = vst.msk [vmem:[#allocation3 + $0xa8] sm:$0xff] %vm1324_vm8, %v1259_v9  ;;  %v5113_v23 = vpop.f32.mrf.mxu1 }
 0x254   : > { %1533 = vst.msk [vmem:[#allocation3 + $0xa8] sm:$0xff] %vm1517_vm9, %v1452_v8 }
 0x255   : > { %3779 = vmatmul.msk.f32.gmra.mxu3 %vm283_vm2, %v4909_v52  ;;  %v5031_v35 = vpop.f32.mrf.mxu3  ;;  %v5040_v43 = vpop.f32.mrf.mxu0 }
 0x256   : > { %5803 = vst [vmem:[#allocation9_spill] sm:$0xff] %v5031_v35  ;;  %v5048_v52 = vpop.f32.mrf.mxu2 }
 0x257   : > { %v1454_v20 = vpop.permute.xlu2 %1453 }
 0x259   : > { %v489_v29 = vpop.permute.xlu0 %488 }
 0x25a   : > { %569 = vst.msk [vmem:[#allocation3 + $0xb0] sm:$0xff] %vm552_vm3, %v489_v29 }
 0x25b   : > { %v1261_v19 = vpop.permute.xlu1 %1260  ;;  %762 = vst.msk [vmem:[#allocation3 + $0xb0] sm:$0xff] %vm745_vm5, %v682_v0  ;;  %v5016_v32 = vld [vmem:[#allocation3 + $0xa8] sm:$0xff] }
 0x25c   : > { %955 = vst.msk [vmem:[#allocation3 + $0xb0] sm:$0xff] %vm938_vm6, %v875_v16  ;;  %3697 = vmatmul.msk.f32.gmra.mxu0 %vm283_vm2, %v5016_v32  ;;  %3732 = vmatmul.msk.f32.gmra.mxu1 %vm283_vm2, %v5016_v32 }
 0x25d   : > { %3767 = vmatmul.msk.f32.gmra.mxu2 %vm283_vm2, %v5016_v32  ;;  %v5045_v46 = vpop.f32.mrf.mxu3  ;;  %v5065_v22 = vpop.f32.mrf.mxu0 }
 0x25e   : > { %5804 = vst [vmem:[#allocation10_spill] sm:$0xff] %v5045_v46  ;;  %v5069_v62 = vpop.f32.mrf.mxu2 }
 0x25f   : > { %v877_v37 = vpop.permute.xlu2 %876 }
 0x261   : > { %v1068_v39 = vpop.permute.xlu0 %1067 }
 0x262   : > { %1148 = vst.msk [vmem:[#allocation3 + $0xb0] sm:$0xff] %vm1131_vm7, %v1068_v39  ;;  %v2679_v39 = vld [vmem:[#allocation3 + $0x48] sm:$0xff] }
 0x263   : > { %v684_v36 = vpop.permute.xlu1 %683  ;;  %1341 = vst.msk [vmem:[#allocation3 + $0xb0] sm:$0xff] %vm1324_vm8, %v1261_v19  ;;  %v5104_v19 = vld [vmem:[#allocation3 + $0x40] sm:$0xff] }
 0x264   : > { %1534 = vst.msk [vmem:[#allocation3 + $0xb0] sm:$0xff] %vm1517_vm9, %v1454_v20 }
 0x265   : > { %v5063_v56 = vpop.f32.mrf.mxu3  ;;  %v5079_v4 = vpop.f32.mrf.mxu0 }
 0x266   : > { %5805 = vst [vmem:[#allocation11_spill] sm:$0xff] %v5063_v56  ;;  %v5085_v8 = vpop.f32.mrf.mxu2 }
 0x267   : > { %v1456_v51 = vpop.permute.xlu2 %1455 }
 0x269   : > { %v491_v50 = vpop.permute.xlu0 %490 }
 0x26a   : > { %570 = vst.msk [vmem:[#allocation3 + $0xb8] sm:$0xff] %vm552_vm3, %v491_v50 }
 0x26b   : > { %v1263_v47 = vpop.permute.xlu1 %1262  ;;  %763 = vst.msk [vmem:[#allocation3 + $0xb8] sm:$0xff] %vm745_vm5, %v684_v36  ;;  %v5052_v53 = vld [vmem:[#allocation3 + $0xb0] sm:$0xff]  ;;  %v5123_v36 = vld [vmem:[#allocation3 + $0xc8] sm:$0xff] }
 0x26c   : > { %956 = vst.msk [vmem:[#allocation3 + $0xb8] sm:$0xff] %vm938_vm6, %v877_v37  ;;  %3698 = vmatmul.msk.f32.gmra.mxu0 %vm283_vm2, %v5052_v53  ;;  %3733 = vmatmul.msk.f32.gmra.mxu1 %vm283_vm2, %v5052_v53 }
 0x26d   : > { %3768 = vmatmul.msk.f32.gmra.mxu2 %vm283_vm2, %v5052_v53  ;;  %v5077_v3 = vpop.f32.mrf.mxu3  ;;  %v5098_v0 = vpop.f32.mrf.mxu0 }
 0x26e   : > { %5806 = vst [vmem:[#allocation12_spill] sm:$0xff] %v5077_v3  ;;  %v5111_v21 = vpop.f32.mrf.mxu2 }
 0x26f   : > { %v899_v60 = vpop.permute.xlu2 %898 }
 0x271   : > { %v1070_v58 = vpop.permute.xlu0 %1069 }
 0x272   : > { %1149 = vst.msk [vmem:[#allocation3 + $0xb8] sm:$0xff] %vm1131_vm7, %v1070_v58 }
 0x273   : > { %v706_v59 = vpop.permute.xlu1 %705  ;;  %1342 = vst.msk [vmem:[#allocation3 + $0xb8] sm:$0xff] %vm1324_vm8, %v1263_v47  ;;  %v5137_v47 = vpop.f32.mrf.mxu1 }
 0x274   : > { %1535 = vst.msk [vmem:[#allocation3 + $0xb8] sm:$0xff] %vm1517_vm9, %v1456_v51 }
 0x275   : > { %v5096_v13 = vpop.f32.mrf.mxu3  ;;  %v5119_v30 = vpop.f32.mrf.mxu0 }
 0x276   : > { %5807 = vst [vmem:[#allocation13_spill] sm:$0xff] %v5096_v13  ;;  %v5135_v44 = vpop.f32.mrf.mxu2  ;;  %v5184_v13 = vld [vmem:[#allocation3 + $0x60] sm:$0xff] }
 0x277   : > { %v1478_v11 = vpop.permute.xlu2 %1477 }
 0x279   : > { %v513_v5 = vpop.permute.xlu0 %512 }
 0x27a   : > { %581 = vst.msk [vmem:[#allocation3 + $0x110] sm:$0xff] %vm552_vm3, %v513_v5 }
 0x27b   : > { %774 = vst.msk [vmem:[#allocation3 + $0x110] sm:$0xff] %vm745_vm5, %v706_v59  ;;  %v5083_v7 = vld [vmem:[#allocation3 + $0xb8] sm:$0xff]  ;;  %v1285_v9 = vpop.permute.xlu1 %1284 }
 0x27c   : > { %967 = vst.msk [vmem:[#allocation3 + $0x110] sm:$0xff] %vm938_vm6, %v899_v60  ;;  %3699 = vmatmul.msk.f32.gmra.mxu0 %vm283_vm2, %v5083_v7  ;;  %3734 = vmatmul.msk.f32.gmra.mxu1 %vm283_vm2, %v5083_v7  ;;  %v5145_v60 = vld [vmem:[#allocation3 + $0x50] sm:$0xff] }
 0x27d   : > { %3769 = vmatmul.msk.f32.gmra.mxu2 %vm283_vm2, %v5083_v7  ;;  %v5117_v20 = vpop.f32.mrf.mxu3  ;;  %v5139_v49 = vpop.f32.mrf.mxu0 }
 0x27e   : > { %5808 = vst [vmem:[#allocation14_spill] sm:$0xff] %v5117_v20  ;;  %v5156_v5 = vpop.f32.mrf.mxu2  ;;  %v2397_v20 = vld [vmem:[#allocation3 + $0x30] sm:$0xff] }
 0x27f   : > { %v901_v33 = vpop.permute.xlu2 %900 }
 0x281   : > { %v1092_v16 = vpop.permute.xlu0 %1091 }
 0x282   : > { %1160 = vst.msk [vmem:[#allocation3 + $0x110] sm:$0xff] %vm1131_vm7, %v1092_v16 }
 0x283   : > { %1353 = vst.msk [vmem:[#allocation3 + $0x110] sm:$0xff] %vm1324_vm8, %v1285_v9  ;;  %v708_v29 = vpop.permute.xlu1 %707 }
 0x284   : > { %1546 = vst.msk [vmem:[#allocation3 + $0x110] sm:$0xff] %vm1517_vm9, %v1478_v11  ;;  %3735 = vmatmul.msk.f32.gmra.mxu1 %vm283_vm2, %v5102_v18  ;;  %3824 = vmatmul.msk.f32.vlgmr.msrb.gmra.mxu0 %vm283_vm2, %v5104_v19  ;;  %v5160_v11 = vpop.f32.mrf.mxu1 }
 0x285   : > { %3770 = vmatmul.msk.f32.gmra.mxu2 %vm283_vm2, %v5102_v18  ;;  %v5141_v50 = vpop.f32.mrf.mxu3  ;;  %v5158_v9 = vpop.f32.mrf.mxu0 }
 0x286   : > { %5809 = vst [vmem:[#allocation15_spill] sm:$0xff] %v5141_v50 }
 0x287   : > { %v1480_v59 = vpop.permute.xlu2 %1479 }
 0x289   : > { %v515_v34 = vpop.permute.xlu0 %514 }
 0x28a   : > { %582 = vst.msk [vmem:[#allocation3 + $0x118] sm:$0xff] %vm552_vm3, %v515_v34  ;;  %v5168_v34 = vld [vmem:[#allocation3 + $0xd8] sm:$0xff] }
 0x28b   : > { %775 = vst.msk [vmem:[#allocation3 + $0x118] sm:$0xff] %vm745_vm5, %v708_v29  ;;  %v5125_v37 = vld [vmem:[#allocation3 + $0x110] sm:$0xff]  ;;  %v1287_v51 = vpop.permute.xlu1 %1286 }
 0x28c   : > { %968 = vst.msk [vmem:[#allocation3 + $0x118] sm:$0xff] %vm938_vm6, %v901_v33  ;;  %3736 = vmatmul.msk.f32.gmra.mxu1 %vm283_vm2, %v5123_v36  ;;  %3780 = vmatmul.msk.f32.gmra.mxu3 %vm283_vm2, %v5125_v37  ;;  %v5166_v33 = vld [vmem:[#allocation3 + $0x58] sm:$0xff] }
 0x28d   : > { %3771 = vmatmul.msk.f32.gmra.mxu2 %vm283_vm2, %v5123_v36  ;;  %3825 = vmatmul.msk.f32.gmra.mxu0 %vm283_vm2, %v2679_v39  ;;  %v5162_v16 = vpop.f32.mrf.mxu3 }
 0x28e   : > { %5810 = vst [vmem:[#allocation16_spill] sm:$0xff] %v5162_v16  ;;  %v2398_v16 = vld [vmem:[#allocation3 + $0x38] sm:$0xff] }
 0x291   : > { %v1094_v58 = vpop.permute.xlu0 %1093 }
 0x292   : > { %1161 = vst.msk [vmem:[#allocation3 + $0x118] sm:$0xff] %vm1131_vm7, %v1094_v58  ;;  %v5180_v58 = vpop.f32.mrf.mxu0 }
 0x293   : > { %1354 = vst.msk [vmem:[#allocation3 + $0x118] sm:$0xff] %vm1324_vm8, %v1287_v51  ;;  %v5178_v51 = vpop.f32.mrf.mxu2 }
 0x294   : > { %1547 = vst.msk [vmem:[#allocation3 + $0x118] sm:$0xff] %vm1517_vm9, %v1480_v59  ;;  %3861 = vmatmul.msk.f32.vlgmr.msrb.gmra.mxu1 %vm283_vm2, %v5145_v60  ;;  %v5182_v59 = vpop.f32.mrf.mxu1 }
 0x295   : > { %3772 = vmatmul.msk.f32.gmra.mxu2 %vm283_vm2, %v5148_v48  ;;  %3826 = vmatmul.msk.f32.gmra.mxu0 %vm283_vm2, %v5145_v60  ;;  %v5186_v3 = vpop.f32.mrf.mxu3 }
 0x296   : > { %5811 = vst [vmem:[#allocation17_spill] sm:$0xff] %v5186_v3  ;;  %v5201_v3 = vld [vmem:[#allocation3 + $0x68] sm:$0xff] }
 0x29a   : > { %v5197_v46 = vpop.f32.mrf.mxu0 }
 0x29b   : > { %v5164_v29 = vld [vmem:[#allocation3 + $0x118] sm:$0xff]  ;;  %v5195_v56 = vpop.f32.mrf.mxu2  ;;  %5812 = vst [vmem:[#allocation18_spill] sm:$0xff] %v5197_v46 }
 0x29c   : > { %3781 = vmatmul.msk.f32.gmra.mxu3 %vm283_vm2, %v5164_v29  ;;  %3862 = vmatmul.msk.f32.gmra.mxu1 %vm283_vm2, %v5166_v33  ;;  %v5199_v35 = vpop.f32.mrf.mxu1 }
 0x29d   : > { %3773 = vmatmul.msk.f32.gmra.mxu2 %vm283_vm2, %v5168_v34  ;;  %3827 = vmatmul.msk.f32.gmra.mxu0 %vm283_vm2, %v5166_v33 }
 0x2a2   : > { %v5214_v50 = vpop.f32.mrf.mxu0 }
 0x2a3   : > { %v5212_v25 = vpop.f32.mrf.mxu2  ;;  %5814 = vst [vmem:[#allocation20_spill] sm:$0xff] %v5214_v50 }
 0x2a4   : > { %3787 = vmatmul.msk.f32.vlgmr.msrb.gmra.mxu3 %vm283_vm2, %v2397_v20  ;;  %3863 = vmatmul.msk.f32.gmra.mxu1 %vm283_vm2, %v5184_v13  ;;  %v5210_v20 = vpop.f32.mrf.mxu3  ;;  %v5216_v42 = vpop.f32.mrf.mxu1 }
 0x2a5   : > { %3828 = vmatmul.msk.f32.gmra.mxu0 %vm283_vm2, %v5184_v13  ;;  %3898 = vmatmul.msk.f32.vlgmr.msrb.gmra.mxu2 %vm283_vm2, %v5184_v13  ;;  %5813 = vst [vmem:[#allocation19_spill] sm:$0xff] %v5210_v20 }
 0x2a6   : > { %5815 = vst [vmem:[#allocation21_spill] sm:$0xff] %v5216_v42 }
 0x2aa   : > { %v5232_v46 = vpop.f32.mrf.mxu0 }
 0x2ab   : > { %v5230_v50 = vpop.f32.mrf.mxu2  ;;  %5817 = vst [vmem:[#allocation23_spill] sm:$0xff] %v5232_v46 }
 0x2ac   : > { %3788 = vmatmul.msk.f32.gmra.mxu3 %vm283_vm2, %v2398_v16  ;;  %3864 = vmatmul.msk.f32.gmra.mxu1 %vm283_vm2, %v5201_v3  ;;  %v249_v16 = vld [vmem:[%s4149_s28 + $0xf0] sm:$0xff]  ;;  %v5228_v20 = vpop.f32.mrf.mxu3 }
 0x2ad   : > { %3829 = vmatmul.msk.f32.gmra.mxu0 %vm283_vm2, %v5201_v3  ;;  %3899 = vmatmul.msk.f32.gmra.mxu2 %vm283_vm2, %v5201_v3  ;;  %281 = vst.msk [vmem:[#allocation2 + $0x16b] sm:$0xff] %vm169_vm0, %v249_v16 }
 0x2ae   : > { %5816 = vst [vmem:[#allocation22_spill] sm:$0xff] %v5228_v20  ;;  %v250_v20 = vld [vmem:[%s4149_s28 + $0xf8] sm:$0xff] }
 0x2af   : > { %282 = vst.msk [vmem:[#allocation2 + $0x173] sm:$0xff] %vm169_vm0, %v250_v20 }
 0x2b3   : > { %v5247_v46 = vpop.f32.mrf.mxu2 }
 0x2b4   : > { %3789 = vmatmul.msk.f32.gmra.mxu3 %vm283_vm2, %v5104_v19  ;;  %3865 = vmatmul.msk.f32.gmra.mxu1 %vm283_vm2, %v4778_v26  ;;  %v5234_v19 = vpop.f32.mrf.mxu1  ;;  %v615_v16 = vld [vmem:[#allocation2 + $0x16a] sm:$0xff]  ;;  %v5253_v42 = vpop.f32.mrf.mxu3 }
 0x2b5   : > { %3830 = vmatmul.msk.f32.gmra.mxu0 %vm283_vm2, %v4778_v26  ;;  %3900 = vmatmul.msk.f32.gmra.mxu2 %vm283_vm2, %v4778_v26  ;;  %5818 = vst [vmem:[#allocation24_spill] sm:$0xff] %v5234_v19  ;;  %v422_v26 = vld [vmem:[#allocation2 + $0x169] sm:$0xff] }
 0x2b6   : > { %516 = vrot.lane.b32.xlu0 %v422_v26, %s4061_s29  ;;  %709 = vrot.lane.b32.xlu1 %v615_v16, %s4062_s30  ;;  %5821 = vst [vmem:[#allocation27_spill] sm:$0xff] %v5253_v42  ;;  %v1194_v20 = vld [vmem:[#allocation2 + $0x16d] sm:$0xff] }
 0x2bb   : > { %v5265_v26 = vpop.f32.mrf.mxu2 }
 0x2bc   : > { %3790 = vmatmul.msk.f32.gmra.mxu3 %vm283_vm2, %v2679_v39  ;;  %3866 = vmatmul.msk.f32.gmra.mxu1 %vm283_vm2, %v4812_v45  ;;  %v5249_v39 = vpop.f32.mrf.mxu0  ;;  %v5251_v19 = vpop.f32.mrf.mxu1  ;;  %5822 = vst [vmem:[#allocation28_spill] sm:$0xff] %v5265_v26 }
 0x2bd   : > { %3831 = vmatmul.msk.f32.gmra.mxu0 %vm283_vm2, %v4812_v45  ;;  %3901 = vmatmul.msk.f32.gmra.mxu2 %vm283_vm2, %v4812_v45  ;;  %5819 = vst [vmem:[#allocation25_spill] sm:$0xff] %v5249_v39  ;;  %v1001_v45 = vld [vmem:[#allocation2 + $0x16c] sm:$0xff]  ;;  %v5271_v42 = vpop.f32.mrf.mxu3 }
 0x2be   : > { %5820 = vst [vmem:[#allocation26_spill] sm:$0xff] %v5251_v19  ;;  %1095 = vrot.lane.b32.xlu0 %v1001_v45, %s4064_s5  ;;  %1288 = vrot.lane.b32.xlu1 %v1194_v20, %s4063_s4  ;;  %v616_v45 = vld [vmem:[#allocation2 + $0x172] sm:$0xff] }
 0x2bf   : > { %5825 = vst [vmem:[#allocation31_spill] sm:$0xff] %v5271_v42  ;;  %v808_v39 = vld [vmem:[#allocation2 + $0x16b] sm:$0xff] }
 0x2c0   : > { %902 = vrot.lane.b32.xlu2 %v808_v39, %s4065_s6  ;;  %v1387_v39 = vld [vmem:[#allocation2 + $0x16e] sm:$0xff] }
 0x2c3   : > { %v5283_v20 = vpop.f32.mrf.mxu2 }
 0x2c4   : > { %3791 = vmatmul.msk.f32.gmra.mxu3 %vm283_vm2, %v5145_v60  ;;  %3867 = vmatmul.msk.f32.gmra.mxu1 %vm283_vm2, %v4838_v61  ;;  %v5267_v16 = vpop.f32.mrf.mxu0  ;;  %v5269_v60 = vpop.f32.mrf.mxu1  ;;  %5826 = vst [vmem:[#allocation32_spill] sm:$0xff] %v5283_v20 }
 0x2c5   : > { %3832 = vmatmul.msk.f32.gmra.mxu0 %vm283_vm2, %v4838_v61  ;;  %3902 = vmatmul.msk.f32.gmra.mxu2 %vm283_vm2, %v4838_v61  ;;  %5823 = vst [vmem:[#allocation29_spill] sm:$0xff] %v5267_v16  ;;  %v423_v61 = vld [vmem:[#allocation2 + $0x171] sm:$0xff]  ;;  %v5289_v16 = vpop.f32.mrf.mxu3 }
 0x2c6   : > { %5824 = vst [vmem:[#allocation30_spill] sm:$0xff] %v5269_v60  ;;  %518 = vrot.lane.b32.xlu0 %v423_v61, %s4061_s29  ;;  %711 = vrot.lane.b32.xlu1 %v616_v45, %s4062_s30  ;;  %v1002_v61 = vld [vmem:[#allocation2 + $0x174] sm:$0xff]  ;;  %s161_s30 = sand.u32 1, %s4050_s13  }
 0x2c7   : > { %5829 = vst [vmem:[#allocation35_spill] sm:$0xff] %v5289_v16  ;;  %v1195_v45 = vld [vmem:[#allocation2 + $0x175] sm:$0xff]  ;;  %s3592_s20 = scalar_lea.sflag [#allocation5], %s161_s30 }
 0x2c8   : > { %1481 = vrot.lane.b32.xlu2 %v1387_v39, %s4066_s7 }
 0x2cb   : > { %v5302_v16 = vpop.f32.mrf.mxu2 }
 0x2cc   : > { %3792 = vmatmul.msk.f32.gmra.mxu3 %vm283_vm2, %v5166_v33  ;;  %3868 = vmatmul.msk.f32.gmra.mxu1 %vm283_vm2, %v4881_v27  ;;  %v5285_v42 = vpop.f32.mrf.mxu0  ;;  %v5287_v33 = vpop.f32.mrf.mxu1  ;;  %5830 = vst [vmem:[#allocation36_spill] sm:$0xff] %v5302_v16 }
 0x2cd   : > { %3833 = vmatmul.msk.f32.gmra.mxu0 %vm283_vm2, %v4881_v27  ;;  %3903 = vmatmul.msk.f32.gmra.mxu2 %vm283_vm2, %v4881_v27  ;;  %5827 = vst [vmem:[#allocation33_spill] sm:$0xff] %v5285_v42 }
 0x2ce   : > { %5828 = vst [vmem:[#allocation34_spill] sm:$0xff] %v5287_v33  ;;  %1097 = vrot.lane.b32.xlu0 %v1002_v61, %s4064_s5  ;;  %1290 = vrot.lane.b32.xlu1 %v1195_v45, %s4063_s4  ;;  %v5308_v33 = vpop.f32.mrf.mxu3  ;;  %s3946_s4 = smul.u32 48, %s161_s30 }
 0x2cf   : > { %5833 = vst [vmem:[#allocation39_spill] sm:$0xff] %v5308_v33 }
 0x2d3   : > { %v5319_v61 = vpop.f32.mrf.mxu2 }
 0x2d4   : > { %3793 = vmatmul.msk.f32.gmra.mxu3 %vm283_vm2, %v5184_v13  ;;  %3869 = vmatmul.msk.f32.gmra.mxu1 %vm283_vm2, %v4914_v55  ;;  %v5304_v13 = vpop.f32.mrf.mxu0  ;;  %v5306_v42 = vpop.f32.mrf.mxu1  ;;  %5834 = vst [vmem:[#allocation40_spill] sm:$0xff] %v5319_v61 }
 0x2d5   : > { %3834 = vmatmul.msk.f32.gmra.mxu0 %vm283_vm2, %v4914_v55  ;;  %3904 = vmatmul.msk.f32.gmra.mxu2 %vm283_vm2, %v4914_v55  ;;  %5831 = vst [vmem:[#allocation37_spill] sm:$0xff] %v5304_v13  ;;  %v2405_v13 = vld [vmem:[#allocation3 + $0x70] sm:$0xff] }
 0x2d6   : > { %5832 = vst [vmem:[#allocation38_spill] sm:$0xff] %v5306_v42  ;;  %v5332_v39 = vpop.f32.mrf.mxu3 }
 0x2d7   : > { %5837 = vst [vmem:[#allocation43_spill] sm:$0xff] %v5332_v39  ;;  %v1388_v39 = vld [vmem:[#allocation2 + $0x176] sm:$0xff] }
 0x2dc   : > { %3794 = vmatmul.msk.f32.gmra.mxu3 %vm283_vm2, %v5201_v3  ;;  %3870 = vmatmul.msk.f32.gmra.mxu1 %vm283_vm2, %v4950_v6  ;;  %v5321_v45 = vpop.f32.mrf.mxu0  ;;  %v5323_v33 = vpop.f32.mrf.mxu1  ;;  %v809_v3 = vld [vmem:[#allocation2 + $0x173] sm:$0xff] }
 0x2dd   : > { %3835 = vmatmul.msk.f32.gmra.mxu0 %vm283_vm2, %v4950_v6  ;;  %3905 = vmatmul.msk.f32.gmra.mxu2 %vm283_vm2, %v4950_v6  ;;  %5835 = vst [vmem:[#allocation41_spill] sm:$0xff] %v5321_v45  ;;  %v5335_v45 = vpop.f32.mrf.mxu2 }
 0x2de   : > { %5836 = vst [vmem:[#allocation42_spill] sm:$0xff] %v5323_v33  ;;  %904 = vrot.lane.b32.xlu2 %v809_v3, %s4065_s6  ;;  %v5349_v3 = vpop.f32.mrf.mxu3  ;;  %s5740_s6 = scalar_lea.vmem [#allocation4], %s3946_s4 }
 0x2df   : > { %5838 = vst [vmem:[#allocation44_spill] sm:$0xff] %v5335_v45  ;;  %s3604_s17 = sshll.u32 %s5740_s6, 4  ;;  %s3605_s17 = int_to_ptr.vmem [resolvable:$true] %s3604_s17 }
 0x2e0   : > { %5841 = vst [vmem:[#allocation47_spill] sm:$0xff] %v5349_v3 }
 0x2e4   : > { %3795 = vmatmul.msk.f32.gmra.mxu3 %vm283_vm2, %v2405_v13  ;;  %3871 = vmatmul.msk.f32.gmra.mxu1 %vm283_vm2, %v4979_v15  ;;  %v5337_v33 = vpop.f32.mrf.mxu0  ;;  %v5339_v42 = vpop.f32.mrf.mxu1  ;;  %v2406_v13 = vld [vmem:[#allocation3 + $0x78] sm:$0xff] }
 0x2e5   : > { %3836 = vmatmul.msk.f32.gmra.mxu0 %vm283_vm2, %v4979_v15  ;;  %3906 = vmatmul.msk.f32.gmra.mxu2 %vm283_vm2, %v4979_v15  ;;  %5839 = vst [vmem:[#allocation45_spill] sm:$0xff] %v5337_v33  ;;  %v5351_v33 = vpop.f32.mrf.mxu2 }
 0x2e6   : > { %5840 = vst [vmem:[#allocation46_spill] sm:$0xff] %v5339_v42  ;;  %1483 = vrot.lane.b32.xlu2 %v1388_v39, %s4066_s7  ;;  %s3947_s7 = smul.u32 48, %s4109_s16 }
 0x2e7   : > { %5842 = vst [vmem:[#allocation48_spill] sm:$0xff] %v5351_v33 }
 0x2e8   : > { %s3603_s11 = scalar_lea.hbm %s5798_s3, %s3947_s7 }
 0x2e9   : > { %s3606_s19 = sshll.u32 %s3603_s11, 4  ;;  %s3607_s19 = int_to_ptr.hbm [resolvable:$true] %s3606_s19 }
 0x2ea   : > { %s4010_s24 = sshra.s32 %s3607_s19, 4  ;;  %s4011_s24 = int_to_ptr.hbm [resolvable:$true] %s4010_s24 }
 0x2eb   : > { %s4012_s25 = scalar_lea.hbm %s4011_s24, 48  ;;  %p4017_p0 = scmp.lt.s32.totalorder %s4011_s24, %s5798_s3 }
 0x2ec   : > { %3796 = vmatmul.msk.f32.gmra.mxu3 %vm283_vm2, %v2406_v13  ;;  %3872 = vmatmul.msk.f32.gmra.mxu1 %vm283_vm2, %v5016_v32  ;;  %v5353_v42 = vpop.f32.mrf.mxu0  ;;  %v5355_v45 = vpop.f32.mrf.mxu1  ;;  %v2407_v13 = vld [vmem:[#allocation3 + $0x80] sm:$0xff]  ;;  %p4013_p11 = scmp.ne.s32.totalorder %s4011_s24, %s4012_s25  ;;  %p4018_p1 = scmp.lt.s32.totalorder %s4016_s27, %s4012_s25 }
 0x2ed   : > { %3837 = vmatmul.msk.f32.gmra.mxu0 %vm283_vm2, %v5016_v32  ;;  %3907 = vmatmul.msk.f32.gmra.mxu2 %vm283_vm2, %v5016_v32  ;;  %5843 = vst [vmem:[#allocation49_spill] sm:$0xff] %v5353_v42  ;;  %v5370_v42 = vpop.f32.mrf.mxu3 }
 0x2ee   : > { %5844 = vst [vmem:[#allocation50_spill] sm:$0xff] %v5355_v45  ;;  %p4014_p12 = pnand %p4013_p11, %p4126_p5  ;;  %p4019_p2 = por %p4018_p1, %p4017_p0 }
 0x2ef   : > { %5848 = vst [vmem:[#allocation54_spill] sm:$0xff] %v5370_v42 }
 0x2f0   : > { %v5364_v39 = vpop.f32.mrf.mxu2  ;;  %p4015_p13 = pneg %p4014_p12 }
 0x2f1   : > { %5845 = vst [vmem:[#allocation51_spill] sm:$0xff] %v5364_v39 }
 0x2f2   : > { %p4020_p3 = pnand %p4019_p2, %p4015_p13 }
 0x2f4   : > { %3797 = vmatmul.msk.f32.gmra.mxu3 %vm283_vm2, %v2407_v13  ;;  %3873 = vmatmul.msk.f32.gmra.mxu1 %vm283_vm2, %v5052_v53 }
 0x2f5   : > { %3838 = vmatmul.msk.f32.gmra.mxu0 %vm283_vm2, %v5052_v53  ;;  %3908 = vmatmul.msk.f32.gmra.mxu2 %vm283_vm2, %v5052_v53 }
 0x2f9   : > { %v5366_v3 = vpop.f32.mrf.mxu0  ;;  %v5368_v33 = vpop.f32.mrf.mxu1 }
 0x2fa   : > { %5846 = vst [vmem:[#allocation52_spill] sm:$0xff] %v5366_v3 }
 0x2fb   : > { %5847 = vst [vmem:[#allocation53_spill] sm:$0xff] %v5368_v33 }
 0x2fc   : > { %3798 = vmatmul.msk.f32.gmra.mxu3 %vm283_vm2, %v4881_v27  ;;  %3874 = vmatmul.msk.f32.gmra.mxu1 %vm283_vm2, %v5083_v7  ;;  %v5388_v27 = vpop.f32.mrf.mxu3 }
 0x2fd   : > { %3839 = vmatmul.msk.f32.gmra.mxu0 %vm283_vm2, %v5083_v7  ;;  %3909 = vmatmul.msk.f32.gmra.mxu2 %vm283_vm2, %v5083_v7  ;;  %5851 = vst [vmem:[#allocation57_spill] sm:$0xff] %v5388_v27 }
 0x300   : > { %v5380_v13 = vpop.f32.mrf.mxu2 }
 0x301   : > { %5849 = vst [vmem:[#allocation55_spill] sm:$0xff] %v5380_v13  ;;  %v5382_v45 = vpop.f32.mrf.mxu1  ;;  %v2831_v3 = vpop.f32.mrf.mxu0 }
 0x302   : > { %5850 = vst [vmem:[#allocation56_spill] sm:$0xff] %v5382_v45 }
 0x304   : > { %3799 = vmatmul.msk.f32.gmra.mxu3 %vm283_vm2, %v4914_v55  ;;  %3875 = vmatmul.msk.f32.gmra.mxu1 %vm283_vm2, %v5102_v18  ;;  %v5406_v55 = vpop.f32.mrf.mxu3 }
 0x305   : > { %3840 = vmatmul.msk.f32.gmra.mxu0 %vm283_vm2, %v5102_v18  ;;  %3910 = vmatmul.msk.f32.gmra.mxu2 %vm283_vm2, %v5102_v18  ;;  %5854 = vst [vmem:[#allocation60_spill] sm:$0xff] %v5406_v55 }
 0x308   : > { %v5394_v42 = vpop.f32.mrf.mxu2 }
 0x309   : > { %5852 = vst [vmem:[#allocation58_spill] sm:$0xff] %v5394_v42  ;;  %v5396_v33 = vpop.f32.mrf.mxu1 }
 0x30a   : > { %5853 = vst [vmem:[#allocation59_spill] sm:$0xff] %v5396_v33  ;;  %v2834_v45 = vpop.f32.mrf.mxu0 }
 0x30c   : > { %3800 = vmatmul.msk.f32.gmra.mxu3 %vm283_vm2, %v4950_v6  ;;  %3876 = vmatmul.msk.f32.gmra.mxu1 %vm283_vm2, %v5123_v36 }
 0x30d   : > { %3841 = vmatmul.msk.f32.gmra.mxu0 %vm283_vm2, %v5123_v36  ;;  %3911 = vmatmul.msk.f32.gmra.mxu2 %vm283_vm2, %v5123_v36 }
 0x30f   : > { %v5420_v6 = vpop.f32.mrf.mxu3 }
 0x310   : > { %v5408_v27 = vpop.f32.mrf.mxu2  ;;  %5856 = vst [vmem:[#allocation62_spill] sm:$0xff] %v5420_v6 }
 0x311   : > { %5855 = vst [vmem:[#allocation61_spill] sm:$0xff] %v5408_v27  ;;  %v3112_v42 = vpop.f32.mrf.mxu1 }
 0x312   : > { %v5410_v13 = vpop.f32.mrf.mxu0 }
 0x314   : > { %3801 = vmatmul.msk.f32.gmra.mxu3 %vm283_vm2, %v4979_v15  ;;  %3877 = vmatmul.msk.f32.gmra.mxu1 %vm283_vm2, %v5148_v48  ;;  %v5429_v15 = vld [vmem:[%s5797_s2] ss:$0 sm:$0xff] }
 0x315   : > { %3842 = vmatmul.msk.f32.gmra.mxu0 %vm283_vm2, %v5148_v48  ;;  %3912 = vmatmul.msk.f32.gmra.mxu2 %vm283_vm2, %v5148_v48  ;;  %v1803_v6 = vadd.f32 %v5429_v15, %v4939_v1  ;;  %v1804_v1 = vadd.f32 %v5429_v15, %v4957_v24 }
 0x318   : > { %v5422_v55 = vpop.f32.mrf.mxu2 }
 0x319   : > { %5857 = vst [vmem:[#allocation63_spill] sm:$0xff] %v5422_v55  ;;  %v3115_v33 = vpop.f32.mrf.mxu1 }
 0x31a   : > { %v5424_v27 = vpop.f32.mrf.mxu0 }
 0x31c   : > { %3802 = vmatmul.msk.f32.gmra.mxu3 %vm283_vm2, %v5016_v32  ;;  %3878 = vmatmul.msk.f32.gmra.mxu1 %vm283_vm2, %v5168_v34  ;;  %v2084_v32 = vadd.f32 %v4969_v12, %v1803_v6 }
 0x31d   : > { %3843 = vmatmul.msk.f32.gmra.mxu0 %vm283_vm2, %v5168_v34  ;;  %3913 = vmatmul.msk.f32.gmra.mxu2 %vm283_vm2, %v5168_v34 }
 0x31f   : > { %v5441_v55 = vpop.f32.mrf.mxu3 }
 0x320   : > { %5858 = vst [vmem:[#allocation64_spill] sm:$0xff] %v5441_v55  ;;  %v5443_v39 = vpop.f32.mrf.mxu2  ;;  %v2365_v55 = vadd.f32 %v5033_v38, %v2084_v32  ;;  %v358_v38 = vld [vmem:[#allocation2 + $0x168] sm:$0xff] }
 0x321   : > { %5859 = vst [vmem:[#allocation65_spill] sm:$0xff] %v5443_v39  ;;  %v5445_v61 = vpop.f32.mrf.mxu1 }
 0x322   : > { %v5448_v60 = vpop.f32.mrf.mxu0  ;;  %390 = vst.msk [vmem:[#allocation3 + $0x120] sm:$0xff] %vm169_vm0, %v358_v38 }
 0x324   : > { %3803 = vmatmul.msk.f32.gmra.mxu3 %vm283_vm2, %v5052_v53  ;;  %3879 = vmatmul.msk.f32.gmra.mxu1 %vm283_vm2, %v4928_v57  ;;  %v2085_v53 = vadd.f32 %v4992_v41, %v1804_v1 }
 0x325   : > { %3844 = vmatmul.msk.f32.gmra.mxu0 %vm283_vm2, %v4928_v57  ;;  %3914 = vmatmul.msk.f32.gmra.mxu2 %vm283_vm2, %v4928_v57  ;;  %v1805_v57 = vadd.f32 %v5429_v15, %v4975_v14 }
 0x326   : > { %v2366_v24 = vadd.f32 %v5048_v52, %v2085_v53  ;;  %v903_v52 = vpop.permute.xlu2 %902 }
 0x327   : > { %v2550_v12 = vpop.f32.mrf.mxu3 }
 0x328   : > { %v2646_v6 = vadd.f32 %v2550_v12, %v2365_v55  ;;  %v3393_v39 = vpop.f32.mrf.mxu2  ;;  %v710_v32 = vpop.permute.xlu1 %709 }
 0x329   : > { %v5461_v16 = vpop.f32.mrf.mxu1 }
 0x32a   : > { %v2927_v19 = vadd.f32 %v2831_v3, %v2646_v6  ;;  %v5464_v20 = vpop.f32.mrf.mxu0  ;;  %v517_v3 = vpop.permute.xlu0 %516 }
 0x32b   : > { %583 = vst.msk [vmem:[#allocation3 + $0x120] sm:$0xff] %vm552_vm3, %v517_v3 }
 0x32c   : > { %v3208_v26 = vadd.f32 %v3112_v42, %v2927_v19  ;;  %3804 = vmatmul.msk.f32.gmra.mxu3 %vm283_vm2, %v5083_v7  ;;  %3880 = vmatmul.msk.f32.gmra.mxu1 %vm283_vm2, %v4943_v2  ;;  %776 = vst.msk [vmem:[#allocation3 + $0x120] sm:$0xff] %vm745_vm5, %v710_v32 }
 0x32d   : > { %3845 = vmatmul.msk.f32.gmra.mxu0 %vm283_vm2, %v4943_v2  ;;  %3915 = vmatmul.msk.f32.gmra.mxu2 %vm283_vm2, %v4943_v2  ;;  %v2086_v2 = vadd.f32 %v5007_v28, %v1805_v57  ;;  %969 = vst.msk [vmem:[#allocation3 + $0x120] sm:$0xff] %vm938_vm6, %v903_v52  ;;  %v1806_v28 = vadd.f32 %v5429_v15, %v4994_v17 }
 0x32e   : > { %v3489_v41 = vadd.f32 %v3393_v39, %v3208_v26  ;;  %v5485_v26 = vld [vmem:[#allocation3 + $0xf0] sm:$0xff]  ;;  %v1482_v17 = vpop.permute.xlu2 %1481 }
 0x32f   : > { %v2553_v42 = vpop.f32.mrf.mxu3 }
 0x330   : > { %v2647_v7 = vadd.f32 %v2553_v42, %v2366_v24  ;;  %v3396_v19 = vpop.f32.mrf.mxu2  ;;  %3521 = vxpose.xlu0.b32.start [1/16] (narrow) %v3489_v41, 24  ;;  %v1289_v24 = vpop.permute.xlu1 %1288  ;;  %v2087_v41 = vadd.f32 %v5036_v40, %v1806_v28 }
 0x331   : > { %v5478_v55 = vpop.f32.mrf.mxu1 }
 0x332   : > { %v2928_v1 = vadd.f32 %v2834_v45, %v2647_v7  ;;  %v5482_v14 = vpop.f32.mrf.mxu0  ;;  %v2367_v45 = vadd.f32 %v5069_v62, %v2086_v2  ;;  %v5507_v62 = vld [vmem:[#allocation3 + $0xf8] sm:$0xff]  ;;  %v2368_v40 = vadd.f32 %v5085_v8, %v2087_v41 }
 0x334   : > { %v3209_v39 = vadd.f32 %v3115_v33, %v2928_v1  ;;  %3805 = vmatmul.msk.f32.gmra.mxu3 %vm283_vm2, %v5102_v18  ;;  %3881 = vmatmul.msk.f32.gmra.mxu1 %vm283_vm2, %v5485_v26  ;;  %v1096_v18 = vpop.permute.xlu0 %1095 }
 0x335   : > { %3846 = vmatmul.msk.f32.gmra.mxu0 %vm283_vm2, %v5485_v26  ;;  %3916 = vmatmul.msk.f32.gmra.mxu2 %vm283_vm2, %v5485_v26  ;;  %1162 = vst.msk [vmem:[#allocation3 + $0x120] sm:$0xff] %vm1131_vm7, %v1096_v18 }
 0x336   : > { %v3490_v12 = vadd.f32 %v3396_v19, %v3209_v39  ;;  %1355 = vst.msk [vmem:[#allocation3 + $0x120] sm:$0xff] %vm1324_vm8, %v1289_v24  ;;  %v359_v19 = vld [vmem:[#allocation2 + $0x170] sm:$0xff] }
 0x337   : > { %v2556_v6 = vpop.f32.mrf.mxu3  ;;  %1548 = vst.msk [vmem:[#allocation3 + $0x120] sm:$0xff] %vm1517_vm9, %v1482_v17  ;;  %v5551_v17 = vld [vmem:[#allocation3 + $0x108] sm:$0xff] }
 0x338   : > { %v2648_v33 = vadd.f32 %v2556_v6, %v2367_v45  ;;  %v3399_v53 = vpop.f32.mrf.mxu2  ;;  %3522 = vxpose.xlu0.b32.cont [2/16] (narrow) %v3490_v12, 24  ;;  %391 = vst.msk [vmem:[#allocation3 + $0x128] sm:$0xff] %vm169_vm0, %v359_v19  ;;  %v712_v52 = vpop.permute.xlu1 %711  ;;  %v5530_v45 = vld [vmem:[#allocation3 + $0x100] sm:$0xff] }
 0x339   : > { %v5499_v57 = vpop.f32.mrf.mxu1  ;;  %v905_v28 = vpop.permute.xlu2 %904 }
 0x33a   : > { %v2929_v38 = vadd.f32 %v5410_v13, %v2648_v33  ;;  %v5504_v42 = vpop.f32.mrf.mxu0 }
 0x33c   : > { %v3210_v7 = vadd.f32 %v5445_v61, %v2929_v38  ;;  %3806 = vmatmul.msk.f32.gmra.mxu3 %vm283_vm2, %v5123_v36  ;;  %3882 = vmatmul.msk.f32.gmra.mxu1 %vm283_vm2, %v5507_v62  ;;  %v1807_v61 = vadd.f32 %v5429_v15, %v5013_v31  ;;  %v519_v2 = vpop.permute.xlu0 %518 }
 0x33d   : > { %3847 = vmatmul.msk.f32.gmra.mxu0 %vm283_vm2, %v5507_v62  ;;  %3917 = vmatmul.msk.f32.gmra.mxu2 %vm283_vm2, %v5507_v62  ;;  %584 = vst.msk [vmem:[#allocation3 + $0x128] sm:$0xff] %vm552_vm3, %v519_v2 }
 0x33e   : > { %v3491_v13 = vadd.f32 %v3399_v53, %v3210_v7  ;;  %777 = vst.msk [vmem:[#allocation3 + $0x128] sm:$0xff] %vm745_vm5, %v712_v52  ;;  %v2088_v31 = vadd.f32 %v5059_v54, %v1807_v61  ;;  %v1808_v54 = vadd.f32 %v5429_v15, %v5040_v43 }
 0x33f   : > { %v2559_v3 = vpop.f32.mrf.mxu3  ;;  %970 = vst.msk [vmem:[#allocation3 + $0x128] sm:$0xff] %vm938_vm6, %v905_v28 }
 0x340   : > { %v2649_v36 = vadd.f32 %v2559_v3, %v2368_v40  ;;  %v3402_v32 = vpop.f32.mrf.mxu2  ;;  %3523 = vxpose.xlu0.b32.cont [3/16] (narrow) %v3491_v13, 24  ;;  %v1291_v24 = vpop.permute.xlu1 %1290  ;;  %v2089_v43 = vadd.f32 %v5072_v63, %v1808_v54 }
 0x341   : > { %v5523_v1 = vpop.f32.mrf.mxu1 }
 0x342   : > { %v2930_v39 = vadd.f32 %v5424_v27, %v2649_v36  ;;  %v5527_v8 = vpop.f32.mrf.mxu0  ;;  %v2369_v27 = vadd.f32 %v5111_v21, %v2088_v31  ;;  %v1484_v21 = vpop.permute.xlu2 %1483  ;;  %v2419_v36 = vld [vmem:[#allocation3 + $0xe0] sm:$0xff] }
 0x344   : > { %v3211_v12 = vadd.f32 %v5461_v16, %v2930_v39  ;;  %3807 = vmatmul.msk.f32.gmra.mxu3 %vm283_vm2, %v5148_v48  ;;  %3883 = vmatmul.msk.f32.gmra.mxu1 %vm283_vm2, %v5530_v45  ;;  %v1098_v48 = vpop.permute.xlu0 %1097 }
 0x345   : > { %3848 = vmatmul.msk.f32.gmra.mxu0 %vm283_vm2, %v5530_v45  ;;  %3918 = vmatmul.msk.f32.gmra.mxu2 %vm283_vm2, %v5530_v45  ;;  %1163 = vst.msk [vmem:[#allocation3 + $0x128] sm:$0xff] %vm1131_vm7, %v1098_v48 }
 0x346   : > { %v3492_v6 = vadd.f32 %v3402_v32, %v3211_v12  ;;  %1356 = vst.msk [vmem:[#allocation3 + $0x128] sm:$0xff] %vm1324_vm8, %v1291_v24  ;;  %v2420_v12 = vld [vmem:[#allocation3 + $0xe8] sm:$0xff] }
 0x347   : > { %v2562_v33 = vpop.f32.mrf.mxu3  ;;  %1549 = vst.msk [vmem:[#allocation3 + $0x128] sm:$0xff] %vm1517_vm9, %v1484_v21 }
 0x348   : > { %v2650_v16 = vadd.f32 %v2562_v33, %v2369_v27  ;;  %v3405_v53 = vpop.f32.mrf.mxu2  ;;  %3524 = vxpose.xlu0.b32.cont [4/16] (narrow) %v3492_v6, 24 }
 0x349   : > { %v3133_v18 = vpop.f32.mrf.mxu1 }
 0x34a   : > { %v2931_v41 = vadd.f32 %v5448_v60, %v2650_v16  ;;  %v5548_v38 = vpop.f32.mrf.mxu0  ;;  %v2370_v60 = vadd.f32 %v5135_v44, %v2089_v43  ;;  %v1812_v43 = vadd.f32 %v5429_v15, %v5119_v30 }
 0x34c   : > { %v3212_v7 = vadd.f32 %v5478_v55, %v2931_v41  ;;  %3808 = vmatmul.msk.f32.gmra.mxu3 %vm283_vm2, %v5168_v34  ;;  %3884 = vmatmul.msk.f32.gmra.mxu1 %vm283_vm2, %v5551_v17  ;;  %v1809_v34 = vadd.f32 %v5429_v15, %v5065_v22 }
 0x34d   : > { %3849 = vmatmul.msk.f32.gmra.mxu0 %vm283_vm2, %v5551_v17  ;;  %3919 = vmatmul.msk.f32.gmra.mxu2 %vm283_vm2, %v5551_v17 }
 0x34e   : > { %v3493_v40 = vadd.f32 %v3405_v53, %v3212_v7  ;;  %v2090_v32 = vadd.f32 %v5092_v10, %v1809_v34  ;;  %v5598_v53 = vld [vmem:[#allocation3 + $0x120] sm:$0xff]  ;;  %v3266_v34 = vld [vmem:[#allocation3 + $0x130] sm:$0xff] }
 0x34f   : > { %v2565_v13 = vpop.f32.mrf.mxu3 }
 0x350   : > { %v2651_v19 = vadd.f32 %v2565_v13, %v2370_v60  ;;  %v3408_v63 = vpop.f32.mrf.mxu2  ;;  %3525 = vxpose.xlu0.b32.cont [5/16] (narrow) %v3493_v40, 24  ;;  %v2371_v22 = vadd.f32 %v5156_v5, %v2090_v32  ;;  %v2093_v60 = vadd.f32 %v5160_v11, %v1812_v43 }
 0x351   : > { %v3136_v55 = vpop.f32.mrf.mxu1 }
 0x352   : > { %v2932_v3 = vadd.f32 %v5464_v20, %v2651_v19  ;;  %v5568_v61 = vpop.f32.mrf.mxu0 }
 0x354   : > { %v3213_v2 = vadd.f32 %v5499_v57, %v2932_v3  ;;  %3809 = vmatmul.msk.f32.gmra.mxu3 %vm283_vm2, %v2419_v36  ;;  %3885 = vmatmul.msk.f32.gmra.mxu1 %vm283_vm2, %v5125_v37  ;;  %v1810_v57 = vadd.f32 %v5429_v15, %v5079_v4 }
 0x355   : > { %3850 = vmatmul.msk.f32.gmra.mxu0 %vm283_vm2, %v5125_v37  ;;  %3920 = vmatmul.msk.f32.gmra.mxu2 %vm283_vm2, %v5125_v37 }
 0x356   : > { %v3494_v44 = vadd.f32 %v3408_v63, %v3213_v2  ;;  %v2091_v27 = vadd.f32 %v5113_v23, %v1810_v57 }
 0x357   : > { %v2568_v20 = vpop.f32.mrf.mxu3 }
 0x358   : > { %v2652_v52 = vadd.f32 %v2568_v20, %v2371_v22  ;;  %v3411_v39 = vpop.f32.mrf.mxu2  ;;  %3526 = vxpose.xlu0.b32.cont [6/16] (narrow) %v3494_v44, 24  ;;  %v2372_v4 = vadd.f32 %v5178_v51, %v2091_v27  ;;  %v1814_v44 = vadd.f32 %v5429_v15, %v5158_v9  ;;  %v3267_v20 = vld [vmem:[#allocation3 + $0x138] sm:$0xff] }
 0x359   : > { %v3139_v10 = vpop.f32.mrf.mxu1 }
 0x35a   : > { %v2933_v28 = vadd.f32 %v5482_v14, %v2652_v52  ;;  %v5583_v31 = vpop.f32.mrf.mxu0  ;;  %v2095_v52 = vadd.f32 %v5199_v35, %v1814_v44  ;;  %v1815_v35 = vadd.f32 %v5429_v15, %v5180_v58 }
 0x35c   : > { %v3214_v6 = vadd.f32 %v5523_v1, %v2933_v28  ;;  %3810 = vmatmul.msk.f32.gmra.mxu3 %vm283_vm2, %v2420_v12  ;;  %3886 = vmatmul.msk.f32.gmra.mxu1 %vm283_vm2, %v5164_v29  ;;  %v1811_v1 = vadd.f32 %v5429_v15, %v5098_v0 }
 0x35d   : > { %3851 = vmatmul.msk.f32.gmra.mxu0 %vm283_vm2, %v5164_v29  ;;  %3921 = vmatmul.msk.f32.gmra.mxu2 %vm283_vm2, %v5164_v29 }
 0x35e   : > { %v3495_v5 = vadd.f32 %v3411_v39, %v3214_v6  ;;  %v2092_v48 = vadd.f32 %v5137_v47, %v1811_v1  ;;  %v5860_v6 = vld [vmem:[#allocation21_spill] sm:$0xff]  ;;  %v5862_v1 = vld [vmem:[#allocation18_spill] sm:$0xff] }
 0x35f   : > { %v2571_v14 = vpop.f32.mrf.mxu3 }
 0x360   : > { %v2653_v33 = vadd.f32 %v2571_v14, %v2372_v4  ;;  %v3414_v54 = vpop.f32.mrf.mxu2  ;;  %3527 = vxpose.xlu0.b32.cont [7/16] (narrow) %v3495_v5, 24  ;;  %v2373_v0 = vadd.f32 %v5195_v56, %v2092_v48  ;;  %v2374_v56 = vadd.f32 %v5212_v25, %v2093_v60  ;;  %v2096_v4 = vadd.f32 %v5860_v6, %v1815_v35  ;;  %v5873_v6 = vld [vmem:[#allocation44_spill] sm:$0xff] }
 0x361   : > { %v3142_v23 = vpop.f32.mrf.mxu1 }
 0x362   : > { %v2934_v16 = vadd.f32 %v5504_v42, %v2653_v33  ;;  %v5605_v51 = vpop.f32.mrf.mxu0 }
 0x364   : > { %v3215_v24 = vadd.f32 %v3133_v18, %v2934_v16  ;;  %3811 = vmatmul.msk.f32.gmra.mxu3 %vm283_vm2, %v5485_v26  ;;  %3887 = vmatmul.msk.f32.gmra.mxu1 %vm283_vm2, %v5598_v53  ;;  %v5612_v26 = vld [vmem:[#allocation3 + $0x128] sm:$0xff]  ;;  %v1816_v16 = vadd.f32 %v5429_v15, %v5862_v1  ;;  %v5875_v1 = vld [vmem:[#allocation38_spill] sm:$0xff] }
 0x365   : > { %3852 = vmatmul.msk.f32.gmra.mxu0 %vm283_vm2, %v5598_v53  ;;  %3922 = vmatmul.msk.f32.gmra.mxu2 %vm283_vm2, %v5598_v53 }
 0x366   : > { %v3496_v42 = vadd.f32 %v3414_v54, %v3215_v24  ;;  %v3269_v24 = vld [vmem:[#allocation3 + $0x148] sm:$0xff] }
 0x367   : > { %v2574_v41 = vpop.f32.mrf.mxu3 }
 0x368   : > { %v2654_v47 = vadd.f32 %v2574_v41, %v2373_v0  ;;  %v3417_v18 = vpop.f32.mrf.mxu2  ;;  %3528 = vxpose.xlu0.b32.cont [8/16] (narrow) %v3496_v42, 24  ;;  %v5863_v0 = vld [vmem:[#allocation24_spill] sm:$0xff] }
 0x369   : > { %v3145_v21 = vpop.f32.mrf.mxu1 }
 0x36a   : > { %v2935_v7 = vadd.f32 %v5527_v8, %v2654_v47  ;;  %v5627_v13 = vpop.f32.mrf.mxu0  ;;  %v5864_v47 = vld [vmem:[#allocation32_spill] sm:$0xff] }
 0x36c   : > { %v3216_v40 = vadd.f32 %v3136_v55, %v2935_v7  ;;  %3812 = vmatmul.msk.f32.gmra.mxu3 %vm283_vm2, %v5507_v62  ;;  %3888 = vmatmul.msk.f32.gmra.mxu1 %vm283_vm2, %v5612_v26  ;;  %v1813_v62 = vadd.f32 %v5429_v15, %v5139_v49 }
 0x36d   : > { %3853 = vmatmul.msk.f32.gmra.mxu0 %vm283_vm2, %v5612_v26  ;;  %3923 = vmatmul.msk.f32.gmra.mxu2 %vm283_vm2, %v5612_v26 }
 0x36e   : > { %v3497_v30 = vadd.f32 %v3417_v18, %v3216_v40  ;;  %v2094_v3 = vadd.f32 %v5182_v59, %v1813_v62  ;;  %v5865_v40 = vld [vmem:[#allocation20_spill] sm:$0xff] }
 0x36f   : > { %v2577_v8 = vpop.f32.mrf.mxu3 }
 0x370   : > { %v2655_v11 = vadd.f32 %v2577_v8, %v2374_v56  ;;  %v3420_v19 = vpop.f32.mrf.mxu2  ;;  %3529 = vxpose.xlu0.b32.cont [9/16] (narrow) %v3497_v30, 24  ;;  %v2375_v25 = vadd.f32 %v5230_v50, %v2094_v3  ;;  %v2376_v50 = vadd.f32 %v5247_v46, %v2095_v52  ;;  %v5861_v46 = vld [vmem:[#allocation28_spill] sm:$0xff]  ;;  %v1817_v56 = vadd.f32 %v5429_v15, %v5865_v40  ;;  %v3270_v8 = vld [vmem:[#allocation3 + $0x150] sm:$0xff] }
 0x371   : > { %v3148_v63 = vpop.f32.mrf.mxu1  ;;  %v2377_v14 = vadd.f32 %v5861_v46, %v2096_v4 }
 0x372   : > { %v2936_v55 = vadd.f32 %v5548_v38, %v2655_v11  ;;  %v5639_v38 = vpop.f32.mrf.mxu0 }
 0x374   : > { %v3217_v36 = vadd.f32 %v3139_v10, %v2936_v55  ;;  %3813 = vmatmul.msk.f32.gmra.mxu3 %vm283_vm2, %v5530_v45  ;;  %3889 = vmatmul.msk.f32.gmra.mxu1 %vm283_vm2, %v3266_v34 }
 0x375   : > { %3924 = vmatmul.msk.f32.gmra.mxu2 %vm283_vm2, %v3266_v34  ;;  %3854 = vmatmul.msk.f32.gmra.mxu0 %vm283_vm2, %v3266_v34 }
 0x376   : > { %v3498_v32 = vadd.f32 %v3420_v19, %v3217_v36 }
 0x377   : > { %v2580_v2 = vpop.f32.mrf.mxu3 }
 0x378   : > { %v2656_v49 = vadd.f32 %v2580_v2, %v2375_v25  ;;  %v3423_v22 = vpop.f32.mrf.mxu2  ;;  %3530 = vxpose.xlu0.b32.cont [10/16] (narrow) %v3498_v32, 24  ;;  %v5868_v2 = vld [vmem:[#allocation23_spill] sm:$0xff] }
 0x379   : > { %v3151_v59 = vpop.f32.mrf.mxu1 }
 0x37a   : > { %v2937_v45 = vadd.f32 %v5568_v61, %v2656_v49  ;;  %v2876_v27 = vpop.f32.mrf.mxu0 }
 0x37c   : > { %v3218_v39 = vadd.f32 %v3142_v23, %v2937_v45  ;;  %3814 = vmatmul.msk.f32.gmra.mxu3 %vm283_vm2, %v5551_v17  ;;  %3890 = vmatmul.msk.f32.gmra.mxu1 %vm283_vm2, %v3267_v20  ;;  %v3268_v17 = vld [vmem:[#allocation3 + $0x140] sm:$0xff]  ;;  %v5870_v45 = vld [vmem:[#allocation40_spill] sm:$0xff] }
 0x37d   : > { %3925 = vmatmul.msk.f32.gmra.mxu2 %vm283_vm2, %v3267_v20  ;;  %3855 = vmatmul.msk.f32.gmra.mxu0 %vm283_vm2, %v3267_v20 }
 0x37e   : > { %v3499_v10 = vadd.f32 %v3423_v22, %v3218_v39  ;;  %v3271_v22 = vld [vmem:[#allocation3 + $0x158] sm:$0xff] }
 0x37f   : > { %v2583_v57 = vpop.f32.mrf.mxu3 }
 0x380   : > { %v2657_v9 = vadd.f32 %v2583_v57, %v2376_v50  ;;  %v3426_v28 = vpop.f32.mrf.mxu2  ;;  %3531 = vxpose.xlu0.b32.cont [11/16] (narrow) %v3499_v10, 24 }
 0x381   : > { %v3154_v61 = vpop.f32.mrf.mxu1 }
 0x382   : > { %v2938_v12 = vadd.f32 %v5583_v31, %v2657_v9  ;;  %v2879_v41 = vpop.f32.mrf.mxu0  ;;  %v5871_v9 = vld [vmem:[#allocation25_spill] sm:$0xff] }
 0x384   : > { %v3219_v5 = vadd.f32 %v3145_v21, %v2938_v12  ;;  %3815 = vmatmul.msk.f32.gmra.mxu3 %vm283_vm2, %v5125_v37  ;;  %3891 = vmatmul.msk.f32.gmra.mxu1 %vm283_vm2, %v3268_v17  ;;  %v2097_v37 = vadd.f32 %v5863_v0, %v1816_v16  ;;  %v5872_v12 = vld [vmem:[#allocation34_spill] sm:$0xff] }
 0x385   : > { %3926 = vmatmul.msk.f32.gmra.mxu2 %vm283_vm2, %v3268_v17 }
 0x386   : > { %v3500_v33 = vadd.f32 %v3426_v28, %v3219_v5  ;;  %v2378_v18 = vadd.f32 %v5864_v47, %v2097_v37 }
 0x387   : > { %v2586_v54 = vpop.f32.mrf.mxu3 }
 0x388   : > { %v2658_v23 = vadd.f32 %v2586_v54, %v2377_v14  ;;  %v3429_v58 = vpop.f32.mrf.mxu2  ;;  %3532 = vxpose.xlu0.b32.cont [12/16] (narrow) %v3500_v33, 24  ;;  %v5874_v33 = vld [vmem:[#allocation29_spill] sm:$0xff] }
 0x389   : > { %v3157_v31 = vpop.f32.mrf.mxu1  ;;  %v1820_v54 = vadd.f32 %v5429_v15, %v5874_v33 }
 0x38a   : > { %v2939_v48 = vadd.f32 %v5605_v51, %v2658_v23  ;;  %v2882_v34 = vpop.f32.mrf.mxu0 }
 0x38b   : > { %v2101_v16 = vadd.f32 %v5875_v1, %v1820_v54 }
 0x38c   : > { %v3220_v42 = vadd.f32 %v3148_v63, %v2939_v48  ;;  %3816 = vmatmul.msk.f32.gmra.mxu3 %vm283_vm2, %v5164_v29  ;;  %3892 = vmatmul.msk.f32.gmra.mxu1 %vm283_vm2, %v3269_v24  ;;  %v5866_v29 = vld [vmem:[#allocation26_spill] sm:$0xff]  ;;  %v5867_v63 = vld [vmem:[#allocation36_spill] sm:$0xff] }
 0x38d   : > { %3927 = vmatmul.msk.f32.gmra.mxu2 %vm283_vm2, %v3269_v24  ;;  %v2098_v11 = vadd.f32 %v5866_v29, %v1817_v56  ;;  %v5876_v24 = vld [vmem:[#allocation48_spill] sm:$0xff]  ;;  %v5879_v56 = vld [vmem:[#allocation51_spill] sm:$0xff] }
 0x38e   : > { %v3501_v21 = vadd.f32 %v3429_v58, %v3220_v42  ;;  %v2382_v0 = vadd.f32 %v5876_v24, %v2101_v16  ;;  %v5889_v16 = vld [vmem:[#allocation49_spill] sm:$0xff] }
 0x38f   : > { %v2589_v43 = vpop.f32.mrf.mxu3  ;;  %v2379_v62 = vadd.f32 %v5867_v63, %v2098_v11  ;;  %v5880_v63 = vld [vmem:[#allocation37_spill] sm:$0xff] }
 0x390   : > { %v2659_v7 = vadd.f32 %v2589_v43, %v2378_v18  ;;  %v3432_v60 = vpop.f32.mrf.mxu2  ;;  %3533 = vxpose.xlu0.b32.cont [13/16] (narrow) %v3501_v21, 24  ;;  %v5877_v18 = vld [vmem:[#allocation33_spill] sm:$0xff] }
 0x391   : > { %v3160_v51 = vpop.f32.mrf.mxu1  ;;  %v1821_v21 = vadd.f32 %v5429_v15, %v5877_v18 }
 0x392   : > { %v2940_v30 = vadd.f32 %v5627_v13, %v2659_v7  ;;  %v1818_v13 = vadd.f32 %v5429_v15, %v5868_v2  ;;  %v2885_v57 = vpop.f32.mrf.mxu0  ;;  %v5878_v7 = vld [vmem:[#allocation42_spill] sm:$0xff] }
 0x394   : > { %v3221_v19 = vadd.f32 %v3151_v59, %v2940_v30  ;;  %3817 = vmatmul.msk.f32.gmra.mxu3 %vm283_vm2, %v5598_v53  ;;  %v5869_v59 = vld [vmem:[#allocation30_spill] sm:$0xff] }
 0x395   : > { %3928 = vmatmul.msk.f32.gmra.mxu2 %vm283_vm2, %v3270_v8  ;;  %v2099_v44 = vadd.f32 %v5869_v59, %v1818_v13 }
 0x396   : > { %v3502_v55 = vadd.f32 %v3432_v60, %v3221_v19  ;;  %v2102_v60 = vadd.f32 %v5878_v7, %v1821_v21 }
 0x397   : > { %v2592_v3 = vpop.f32.mrf.mxu3  ;;  %v2380_v20 = vadd.f32 %v5870_v45, %v2099_v44 }
 0x398   : > { %v2660_v36 = vadd.f32 %v2592_v3, %v2379_v62  ;;  %v3435_v25 = vpop.f32.mrf.mxu2  ;;  %3534 = vxpose.xlu0.b32.cont [14/16] (narrow) %v3502_v55, 24  ;;  %v2383_v30 = vadd.f32 %v5879_v56, %v2102_v60  ;;  %v1822_v62 = vadd.f32 %v5429_v15, %v5880_v63  ;;  %v5881_v3 = vld [vmem:[#allocation46_spill] sm:$0xff] }
 0x399   : > { %v3163_v32 = vpop.f32.mrf.mxu1 }
 0x39a   : > { %v2941_v49 = vadd.f32 %v5639_v38, %v2660_v36  ;;  %v1819_v38 = vadd.f32 %v5429_v15, %v5871_v9  ;;  %v2888_v58 = vpop.f32.mrf.mxu0  ;;  %v2103_v36 = vadd.f32 %v5881_v3, %v1822_v62 }
 0x39c   : > { %v3222_v53 = vadd.f32 %v3154_v61, %v2941_v49  ;;  %3818 = vmatmul.msk.f32.gmra.mxu3 %vm283_vm2, %v5612_v26  ;;  %v2100_v61 = vadd.f32 %v5872_v12, %v1819_v38 }
 0x39d   : > { %3929 = vmatmul.msk.f32.gmra.mxu2 %vm283_vm2, %v3271_v22 }
 0x39e   : > { %v3503_v52 = vadd.f32 %v3435_v25, %v3222_v53  ;;  %v2381_v26 = vadd.f32 %v5873_v6, %v2100_v61  ;;  %v5883_v53 = vld [vmem:[#allocation41_spill] sm:$0xff] }
 0x39f   : > { %v2595_v39 = vpop.f32.mrf.mxu3  ;;  %v1823_v45 = vadd.f32 %v5429_v15, %v5883_v53  ;;  %v5886_v61 = vld [vmem:[#allocation45_spill] sm:$0xff] }
 0x3a0   : > { %v2661_v50 = vadd.f32 %v2595_v39, %v2380_v20  ;;  %v3438_v10 = vpop.f32.mrf.mxu2  ;;  %3535 = vxpose.xlu0.b32.cont [15/16] (narrow) %v3503_v52, 24  ;;  %v5884_v52 = vld [vmem:[#allocation50_spill] sm:$0xff] }
 0x3a1   : > { %v3166_v35 = vpop.f32.mrf.mxu1  ;;  %v2104_v39 = vadd.f32 %v5884_v52, %v1823_v45 }
 0x3a2   : > { %v2942_v28 = vadd.f32 %v2876_v27, %v2661_v50 }
 0x3a4   : > { %v3223_v17 = vadd.f32 %v3157_v31, %v2942_v28 }
 0x3a6   : > { %v3504_v4 = vadd.f32 %v3438_v10, %v3223_v17  ;;  %v5885_v10 = vld [vmem:[#allocation58_spill] sm:$0xff]  ;;  %v1824_v17 = vadd.f32 %v5429_v15, %v5886_v61 }
 0x3a7   : > { %v2598_v5 = vpop.f32.mrf.mxu3 }
 0x3a8   : > { %v2662_v46 = vadd.f32 %v2598_v5, %v2381_v26  ;;  %v3441_v14 = vpop.f32.mrf.mxu2  ;;  %3536 = vxpose.xlu0.b32.end [16/16] (narrow) %v3504_v4, 24  ;;  %v5887_v4 = vld [vmem:[#allocation53_spill] sm:$0xff] }
 0x3a9   : > { %v3169_v27 = vpop.f32.mrf.mxu1  ;;  %v2105_v5 = vadd.f32 %v5887_v4, %v1824_v17 }
 0x3aa   : > { %v2943_v23 = vadd.f32 %v2879_v41, %v2662_v46  ;;  %v2891_v41 = vpop.f32.mrf.mxu0 }
 0x3ac   : > { %v3224_v48 = vadd.f32 %v3160_v51, %v2943_v23 }
 0x3ae   : > { %v3505_v37 = vadd.f32 %v3441_v14, %v3224_v48  ;;  %v5888_v14 = vld [vmem:[#allocation61_spill] sm:$0xff]  ;;  %v1825_v48 = vadd.f32 %v5429_v15, %v5889_v16 }
 0x3af   : > { %v2601_v31 = vpop.f32.mrf.mxu3  ;;  %v2386_v33 = vadd.f32 %v5888_v14, %v2105_v5  ;;  %v5901_v5 = vld [vmem:[#allocation9_spill] sm:$0xff] }
 0x3b0   : > { %v2663_v42 = vadd.f32 %v2601_v31, %v2382_v0  ;;  %v3444_v47 = vpop.f32.mrf.mxu2  ;;  %3553 = vxpose.xlu1.b32.start [1/16] (narrow) %v3505_v37, 24  ;;  %v5890_v0 = vld [vmem:[#allocation56_spill] sm:$0xff] }
 0x3b1   : > { %v3172_v51 = vpop.f32.mrf.mxu1  ;;  %v2106_v37 = vadd.f32 %v5890_v0, %v1825_v48 }
 0x3b2   : > { %v2944_v43 = vadd.f32 %v2882_v34, %v2663_v42  ;;  %v5882_v34 = vld [vmem:[#allocation55_spill] sm:$0xff] }
 0x3b3   : > { %v2384_v2 = vadd.f32 %v5882_v34, %v2103_v36 }
 0x3b4   : > { %v3225_v40 = vadd.f32 %v3163_v32, %v2944_v43  ;;  %v2894_v32 = vpop.f32.mrf.mxu0 }
 0x3b6   : > { %v3506_v8 = vadd.f32 %v3444_v47, %v3225_v40  ;;  %v5891_v47 = vld [vmem:[#allocation63_spill] sm:$0xff]  ;;  %v5892_v40 = vld [vmem:[#allocation52_spill] sm:$0xff] }
 0x3b7   : > { %v2604_v29 = vpop.f32.mrf.mxu3  ;;  %v2387_v18 = vadd.f32 %v5891_v47, %v2106_v37  ;;  %v5904_v37 = vld [vmem:[#allocation10_spill] sm:$0xff] }
 0x3b8   : > { %v2664_v11 = vadd.f32 %v2604_v29, %v2383_v30  ;;  %v3447_v19 = vpop.f32.mrf.mxu2  ;;  %3554 = vxpose.xlu1.b32.cont [2/16] (narrow) %v3506_v8, 24  ;;  %v5893_v30 = vld [vmem:[#allocation59_spill] sm:$0xff] }
 0x3b9   : > { %v3175_v44 = vpop.f32.mrf.mxu1 }
 0x3ba   : > { %v2945_v55 = vadd.f32 %v2885_v57, %v2664_v11  ;;  %v2385_v57 = vadd.f32 %v5885_v10, %v2104_v39  ;;  %v5894_v11 = vld [vmem:[#allocation65_spill] sm:$0xff] }
 0x3bc   : > { %v3226_v25 = vadd.f32 %v3166_v35, %v2945_v55  ;;  %v2897_v12 = vpop.f32.mrf.mxu0 }
 0x3be   : > { %v3507_v13 = vadd.f32 %v3447_v19, %v3226_v25  ;;  %v5895_v25 = vld [vmem:[#allocation7_spill] sm:$0xff] }
 0x3bf   : > { %v2607_v49 = vpop.f32.mrf.mxu3  ;;  %v1827_v34 = vadd.f32 %v5429_v15, %v5895_v25 }
 0x3c0   : > { %v2665_v22 = vadd.f32 %v2607_v49, %v2384_v2  ;;  %v3450_v59 = vpop.f32.mrf.mxu2  ;;  %3555 = vxpose.xlu1.b32.cont [3/16] (narrow) %v3507_v13, 24  ;;  %v5896_v13 = vld [vmem:[#allocation15_spill] sm:$0xff] }
 0x3c1   : > { %v3178_v26 = vpop.f32.mrf.mxu1 }
 0x3c2   : > { %v2946_v20 = vadd.f32 %v2888_v58, %v2665_v22  ;;  %v5897_v22 = vld [vmem:[#allocation39_spill] sm:$0xff] }
 0x3c4   : > { %v3227_v50 = vadd.f32 %v3169_v27, %v2946_v20  ;;  %v2900_v24 = vpop.f32.mrf.mxu0 }
 0x3c6   : > { %v3508_v9 = vadd.f32 %v3450_v59, %v3227_v50  ;;  %v5898_v50 = vld [vmem:[#allocation8_spill] sm:$0xff] }
 0x3c7   : > { %v2610_v38 = vpop.f32.mrf.mxu3  ;;  %v1828_v10 = vadd.f32 %v5429_v15, %v5898_v50  ;;  %v5912_v50 = vld [vmem:[#allocation60_spill] sm:$0xff] }
 0x3c8   : > { %v2666_v28 = vadd.f32 %v2610_v38, %v2385_v57  ;;  %v3453_v35 = vpop.f32.mrf.mxu2  ;;  %3556 = vxpose.xlu1.b32.cont [4/16] (narrow) %v3508_v9, 24  ;;  %v5899_v9 = vld [vmem:[#allocation16_spill] sm:$0xff] }
 0x3c9   : > { %v3181_v42 = vpop.f32.mrf.mxu1  ;;  %v2109_v38 = vadd.f32 %v5899_v9, %v1828_v10 }
 0x3ca   : > { %v2947_v6 = vadd.f32 %v2891_v41, %v2666_v28  ;;  %v1826_v41 = vadd.f32 %v5429_v15, %v5892_v40 }
 0x3cc   : > { %v3228_v46 = vadd.f32 %v3172_v51, %v2947_v6  ;;  %v2107_v8 = vadd.f32 %v5893_v30, %v1826_v41  ;;  %v2903_v29 = vpop.f32.mrf.mxu0 }
 0x3ce   : > { %v3509_v54 = vadd.f32 %v3453_v35, %v3228_v46  ;;  %v2388_v19 = vadd.f32 %v5894_v11, %v2107_v8  ;;  %v5900_v35 = vld [vmem:[#allocation43_spill] sm:$0xff]  ;;  %v1829_v46 = vadd.f32 %v5429_v15, %v5901_v5  ;;  %v5915_v5 = vld [vmem:[#allocation62_spill] sm:$0xff] }
 0x3cf   : > { %v2613_v23 = vpop.f32.mrf.mxu3 }
 0x3d0   : > { %v2667_v58 = vadd.f32 %v2613_v23, %v2386_v33  ;;  %v3456_v1 = vpop.f32.mrf.mxu2  ;;  %3557 = vxpose.xlu1.b32.cont [5/16] (narrow) %v3509_v54, 24  ;;  %v5902_v54 = vld [vmem:[#allocation17_spill] sm:$0xff] }
 0x3d1   : > { %v3184_v62 = vpop.f32.mrf.mxu1  ;;  %v2110_v23 = vadd.f32 %v5902_v54, %v1829_v46 }
 0x3d2   : > { %v2948_v27 = vadd.f32 %v2894_v32, %v2667_v58  ;;  %v2108_v32 = vadd.f32 %v5896_v13, %v1827_v34 }
 0x3d4   : > { %v3229_v31 = vadd.f32 %v3175_v44, %v2948_v27  ;;  %v2389_v59 = vadd.f32 %v5897_v22, %v2108_v32  ;;  %v2906_v53 = vpop.f32.mrf.mxu0  ;;  %v5910_v22 = vld [vmem:[#allocation12_spill] sm:$0xff] }
 0x3d6   : > { %v3510_v21 = vadd.f32 %v3456_v1, %v3229_v31  ;;  %v5903_v1 = vld [vmem:[#allocation47_spill] sm:$0xff]  ;;  %v1830_v31 = vadd.f32 %v5429_v15, %v5904_v37  ;;  %v5918_v37 = vld [vmem:[#allocation64_spill] sm:$0xff] }
 0x3d7   : > { %v2616_v43 = vpop.f32.mrf.mxu3  ;;  %v2391_v16 = vadd.f32 %v5903_v1, %v2110_v23  ;;  %v5916_v1 = vld [vmem:[#allocation14_spill] sm:$0xff] }
 0x3d8   : > { %v2668_v7 = vadd.f32 %v2616_v43, %v2387_v18  ;;  %v3459_v60 = vpop.f32.mrf.mxu2  ;;  %3558 = vxpose.xlu1.b32.cont [6/16] (narrow) %v3510_v21, 24  ;;  %v5905_v21 = vld [vmem:[#allocation19_spill] sm:$0xff] }
 0x3d9   : > { %v3187_v39 = vpop.f32.mrf.mxu1  ;;  %v2111_v43 = vadd.f32 %v5905_v21, %v1830_v31 }
 0x3da   : > { %v2949_v56 = vadd.f32 %v2897_v12, %v2668_v7  ;;  %v2390_v12 = vadd.f32 %v5900_v35, %v2109_v38  ;;  %v5913_v35 = vld [vmem:[#allocation13_spill] sm:$0xff] }
 0x3dc   : > { %v3230_v51 = vadd.f32 %v3178_v26, %v2949_v56  ;;  %v2909_v4 = vpop.f32.mrf.mxu0 }
 0x3de   : > { %v3511_v63 = vadd.f32 %v3459_v60, %v3230_v51  ;;  %v5906_v60 = vld [vmem:[#allocation54_spill] sm:$0xff]  ;;  %v5907_v51 = vld [vmem:[#allocation11_spill] sm:$0xff] }
 0x3df   : > { %v2619_v55 = vpop.f32.mrf.mxu3  ;;  %v2392_v40 = vadd.f32 %v5906_v60, %v2111_v43 }
 0x3e0   : > { %v2669_v3 = vadd.f32 %v2619_v55, %v2388_v19  ;;  %v3462_v36 = vpop.f32.mrf.mxu2  ;;  %3559 = vxpose.xlu1.b32.cont [7/16] (narrow) %v3511_v63, 24  ;;  %v5908_v63 = vld [vmem:[#allocation22_spill] sm:$0xff] }
 0x3e1   : > { %v3190_v33 = vpop.f32.mrf.mxu1 }
 0x3e2   : > { %v2950_v2 = vadd.f32 %v2900_v24, %v2669_v3 }
 0x3e4   : > { %v3231_v49 = vadd.f32 %v3181_v42, %v2950_v2  ;;  %v2912_v47 = vpop.f32.mrf.mxu0 }
 0x3e6   : > { %v3512_v44 = vadd.f32 %v3462_v36, %v3231_v49  ;;  %v5909_v36 = vld [vmem:[#allocation57_spill] sm:$0xff]  ;;  %v3537_v49 = vpop.trf.xlu0 }
 0x3e7   : > { %v2622_v45 = vpop.f32.mrf.mxu3  ;;  %3585 = vst [vmem:[%s5740_s6] sm:$0xff] %v3537_v49 }
 0x3e8   : > { %v2670_v20 = vadd.f32 %v2622_v45, %v2389_v59  ;;  %v3465_v52 = vpop.f32.mrf.mxu2  ;;  %3560 = vxpose.xlu1.b32.cont [8/16] (narrow) %v3512_v44, 24  ;;  %v1832_v59 = vadd.f32 %v5429_v15, %v5910_v22 }
 0x3e9   : > { %v3193_v18 = vpop.f32.mrf.mxu1 }
 0x3ea   : > { %v2951_v57 = vadd.f32 %v2903_v29, %v2670_v20  ;;  %v1831_v29 = vadd.f32 %v5429_v15, %v5907_v51 }
 0x3ec   : > { %v3232_v28 = vadd.f32 %v3184_v62, %v2951_v57  ;;  %v2112_v62 = vadd.f32 %v5908_v63, %v1831_v29  ;;  %v2915_v3 = vpop.f32.mrf.mxu0 }
 0x3ee   : > { %v3513_v61 = vadd.f32 %v3465_v52, %v3232_v28  ;;  %v2393_v25 = vadd.f32 %v5909_v36, %v2112_v62 }
 0x3ef   : > { %v2625_v17 = vpop.f32.mrf.mxu3 }
 0x3f0   : > { %v2671_v6 = vadd.f32 %v2625_v17, %v2390_v12  ;;  %3561 = vxpose.xlu1.b32.cont [9/16] (narrow) %v3513_v61, 24  ;;  %v3468_v26 = vpop.f32.mrf.mxu2  ;;  %v1833_v12 = vadd.f32 %v5429_v15, %v5913_v35  ;;  %v5914_v17 = vld [vmem:[#allocation31_spill] sm:$0xff] }
 0x3f1   : > { %v3196_v19 = vpop.f32.mrf.mxu1 }
 0x3f2   : > { %v2952_v14 = vadd.f32 %v2906_v53, %v2671_v6  ;;  %v5911_v53 = vld [vmem:[#allocation27_spill] sm:$0xff]  ;;  %v2114_v6 = vadd.f32 %v5914_v17, %v1833_v12 }
 0x3f3   : > { %v2113_v45 = vadd.f32 %v5911_v53, %v1832_v59 }
 0x3f4   : > { %v3233_v58 = vadd.f32 %v3187_v39, %v2952_v14  ;;  %v2918_v52 = vpop.f32.mrf.mxu0  ;;  %v2395_v46 = vadd.f32 %v5915_v5, %v2114_v6 }
 0x3f5   : > { %v2394_v10 = vadd.f32 %v5912_v50, %v2113_v45 }
 0x3f6   : > { %v3514_v48 = vadd.f32 %v3468_v26, %v3233_v58 }
 0x3f7   : > { %v2628_v27 = vpop.f32.mrf.mxu3 }
 0x3f8   : > { %v2672_v24 = vadd.f32 %v2628_v27, %v2391_v16  ;;  %3562 = vxpose.xlu1.b32.cont [10/16] (narrow) %v3514_v48, 24  ;;  %v3471_v0 = vpop.f32.mrf.mxu2  ;;  %v1834_v16 = vadd.f32 %v5429_v15, %v5916_v1  ;;  %v5917_v27 = vld [vmem:[#allocation35_spill] sm:$0xff] }
 0x3f9   : > { %v3199_v39 = vpop.f32.mrf.mxu1 }
 0x3fa   : > { %v2953_v42 = vadd.f32 %v2909_v4, %v2672_v24  ;;  %v2115_v24 = vadd.f32 %v5917_v27, %v1834_v16 }
 0x3fc   : > { %v3234_v7 = vadd.f32 %v3190_v33, %v2953_v42  ;;  %v2921_v4 = vpop.f32.mrf.mxu0  ;;  %v2396_v31 = vadd.f32 %v5918_v37, %v2115_v24 }
 0x3fe   : > { %v3515_v41 = vadd.f32 %v3471_v0, %v3234_v7 }
 0x3ff   : > { %v2631_v56 = vpop.f32.mrf.mxu3 }
 0x400   : > { %v2673_v30 = vadd.f32 %v2631_v56, %v2392_v40  ;;  %3563 = vxpose.xlu1.b32.cont [11/16] (narrow) %v3515_v41, 24  ;;  %v3474_v8 = vpop.f32.mrf.mxu2  ;;  %v3538_v41 = vpop.trf.xlu0 }
 0x401   : > { %v3202_v54 = vpop.f32.mrf.mxu1  ;;  %3587 = vst [vmem:[%s5740_s6 + $0x10] sm:$0xff] %v3538_v41 }
 0x402   : > { %v2954_v11 = vadd.f32 %v2912_v47, %v2673_v30 }
 0x404   : > { %v3235_v55 = vadd.f32 %v3193_v18, %v2954_v11  ;;  %v2924_v18 = vpop.f32.mrf.mxu0 }
 0x406   : > { %v3516_v34 = vadd.f32 %v3474_v8, %v3235_v55 }
 0x407   : > { %v2634_v2 = vpop.f32.mrf.mxu3 }
 0x408   : > { %v2674_v13 = vadd.f32 %v2634_v2, %v2393_v25  ;;  %3564 = vxpose.xlu1.b32.cont [12/16] (narrow) %v3516_v34, 24  ;;  %v3477_v32 = vpop.f32.mrf.mxu2  ;;  %v3539_v56 = vpop.trf.xlu0 }
 0x409   : > { %v3205_v43 = vpop.f32.mrf.mxu1  ;;  %3589 = vst [vmem:[%s5740_s6 + $0x20] sm:$0xff] %v3539_v56 }
 0x40a   : > { %v2955_v44 = vadd.f32 %v2915_v3, %v2674_v13 }
 0x40c   : > { %v3236_v20 = vadd.f32 %v3196_v19, %v2955_v44 }
 0x40e   : > { %v3517_v57 = vadd.f32 %v3477_v32, %v3236_v20 }
 0x40f   : > { %v2637_v9 = vpop.f32.mrf.mxu3 }
 0x410   : > { %v2675_v38 = vadd.f32 %v2637_v9, %v2394_v10  ;;  %3565 = vxpose.xlu1.b32.cont [13/16] (narrow) %v3517_v57, 24  ;;  %v3480_v28 = vpop.f32.mrf.mxu2 }
 0x412   : > { %v2956_v61 = vadd.f32 %v2918_v52, %v2675_v38 }
 0x414   : > { %v3237_v26 = vadd.f32 %v3199_v39, %v2956_v61 }
 0x416   : > { %v3518_v14 = vadd.f32 %v3480_v28, %v3237_v26 }
 0x417   : > { %v2640_v33 = vpop.f32.mrf.mxu3 }
 0x418   : > { %v2676_v23 = vadd.f32 %v2640_v33, %v2395_v46  ;;  %3566 = vxpose.xlu1.b32.cont [14/16] (narrow) %v3518_v14, 24  ;;  %v3483_v58 = vpop.f32.mrf.mxu2 }
 0x41a   : > { %v2957_v48 = vadd.f32 %v2921_v4, %v2676_v23 }
 0x41c   : > { %v3238_v0 = vadd.f32 %v3202_v54, %v2957_v48 }
 0x41e   : > { %v3519_v42 = vadd.f32 %v3483_v58, %v3238_v0 }
 0x41f   : > { %v2643_v47 = vpop.f32.mrf.mxu3 }
 0x420   : > { %v2677_v21 = vadd.f32 %v2643_v47, %v2396_v31  ;;  %3567 = vxpose.xlu1.b32.cont [15/16] (narrow) %v3519_v42, 24  ;;  %v3486_v15 = vpop.f32.mrf.mxu2 }
 0x422   : > { %v2958_v7 = vadd.f32 %v2924_v18, %v2677_v21 }
 0x424   : > { %v3239_v60 = vadd.f32 %v3205_v43, %v2958_v7 }
 0x426   : > { %v3520_v40 = vadd.f32 %v3486_v15, %v3239_v60 }
 0x428   : > { %3568 = vxpose.xlu1.b32.end [16/16] (narrow) %v3520_v40, 24 }
 0x454   : > { %v3569_v30 = vpop.trf.xlu1 }
 0x455   : > { %3586 = vst [vmem:[%s5740_s6 + $0x8] sm:$0xff] %v3569_v30 }
 0x45c   : > { %v3570_v8 = vpop.trf.xlu1 }
 0x45d   : > { %3588 = vst [vmem:[%s5740_s6 + $0x18] sm:$0xff] %v3570_v8 }
 0x464   : > { %v3571_v51 = vpop.trf.xlu1 }
 0x465   : > { %3590 = vst [vmem:[%s5740_s6 + $0x28] sm:$0xff] %v3571_v51 }
 0x466   : > { %4023 = shalt.err (!%p4020_p3)
}
 0x467   : > { %s4067_s29 = smov 256  }
 0x468   : > { %3948 = dma.vmem_to_hbm [thread:$0]  (%p4126_p5), %s3605_s17, 768, %s3607_s19, %s3592_s20, %s4067_s29, %s4067_s29, %s4064_s5  }
 0x469 PF: > { %p3954_p4 = scmp.ge.s32.totalorder %s4058_s15, 2  ;;  %s3621_s30 = sand.u32 1, %s4046_s12  }
 0x46a   : > { %s3622_s4 = scalar_lea.sflag [#allocation5], %s3621_s30 }
 0x46b   : > { %p3951_p7 = pnand %p3954_p4, %p4130_p6 }
 0x46d   : > { %p3952_p8 = pneg %p3951_p7 }
 0x46f   : > { %4041 = dma.done.wait (%p3952_p8), %s3622_s4, 768  }
 0x470   : > { %4043 = vsyncadd (%p3952_p8), %s3622_s4, 4294966528  ;;  %p13_p9 = scmp.ge.s32.totalorder %s4113_s18, 4   ;;  %s5919_s12 = smov %s4050_s13 }
 0x471   : > { %s5920_s13 = smov %s4054_s14  ;;  %s5921_s14 = smov %s4124_s21 }
 0x472   : > { %s5922_s15 = smov %s4113_s18  ;;  %15 = sbr.rel (!%p13_p9) target bundleno = 3 (0x3), region = 73 }
 0x477   :  { %3628 = vsyncpa [#allocation5], 1 }
 0x478   :  { %3630 = vsyncpa [#allocation5 + $0x1], 1 }

</bundles_post_ra>
